<compile_context>
chip_gen: v7x
topology: tpu7x:2x2x1
jax: 0.10.0
libtpu: 0.0.40
codegen_flags: <defaults>
</compile_context>

<pallas_src>
import functools

import jax
import jax.numpy as jnp
from jax.experimental import pallas as pl
from jax.experimental.pallas import tpu as pltpu

_BN_EPS = 1e-5
_CP = 128          # MXU lane padding for the weight matrix (compute only)


# ----------------------------------------------------------------------------
# Kernel 1: one row-tile of a 3x3 'SAME' conv (no bias) + per-tile BN stats,
# with optional fused BN+ReLU applied to the *input* (previous stage).
# ----------------------------------------------------------------------------
def _conv_stage_kernel(x_ref, scale_ref, shift_ref, w_ref, y_ref, stats_ref,
                       *, h, w, th, cin, cout, apply_input_act):
    # x_ref     : (1, h, w, cin)    resident input image (f32 or bf16)
    # scale_ref : (1, cin)          input-BN scale (unused if apply_input_act=False)
    # shift_ref : (1, cin)          input-BN shift
    # w_ref     : (9*cin, _CP)      bf16 weights, Cout zero-padded to _CP lanes
    # y_ref     : (1, th, w, cout)  bf16 raw conv output tile (pre-BN)
    # stats_ref : (1, 1, 2, cout)   f32 per-tile [sum, centered sum of squares]
    i = pl.program_id(1)
    nh = pl.num_programs(1)
    r0 = pl.multiple_of(i * th, th)

    if apply_input_act:
        scale = scale_ref[...]        # (1, cin), broadcasts over (rows, w, cin)
        shift = shift_ref[...]

    def load_rows(start, size):
        v = x_ref[0, pl.ds(start, size), :, :].astype(jnp.float32)  # (size, w, cin)
        if apply_input_act:
            # Fused BN(scale/shift)+ReLU of the previous stage, applied BEFORE
            # zero-padding so the 'SAME' halo stays exactly zero.
            v = jnp.maximum(v * scale + shift, 0.0)
        return v

    mid = load_rows(r0, th)                                  # rows [r0, r0+th)
    top = load_rows(jnp.maximum(r0 - 1, 0), 1)               # row  r0-1 (clamped)
    bot = load_rows(jnp.minimum(r0 + th, h - 1), 1)          # row  r0+th (clamped)
    top = jnp.where(i == 0, 0.0, top)                        # zero halo at image top
    bot = jnp.where(i == nh - 1, 0.0, bot)                   # zero halo at image bottom
    band = jnp.concatenate([top, mid, bot], axis=0)          # (th+2, w, cin)

    zcol = jnp.zeros((th + 2, 1, cin), jnp.float32)
    p = jnp.concatenate([zcol, band, zcol], axis=1)          # (th+2, w+2, cin)

    # Per-tile im2col: row index = pixel within tile, column = (ky*3+kx)*cin+ci.
    patches = [p[ky:ky + th, kx:kx + w, :].reshape(th * w, cin)
               for ky in range(3) for kx in range(3)]
    lhs = jnp.concatenate(patches, axis=1).astype(jnp.bfloat16)   # (th*w, 9*cin)

    acc = jnp.dot(lhs, w_ref[...],
                  preferred_element_type=jnp.float32)[:, :cout]   # (th*w, cout) f32

    y_ref[...] = acc.reshape(1, th, w, cout).astype(y_ref.dtype)

    # Per-tile centered BN statistics (numerically stable parallel combine
    # happens in the wrapper).
    rows = th * w
    s1 = jnp.sum(acc, axis=0, keepdims=True)                 # (1, cout)
    d = acc - s1 / rows
    m2 = jnp.sum(d * d, axis=0, keepdims=True)               # (1, cout)
    stats_ref[...] = jnp.concatenate([s1, m2], axis=0).reshape(1, 1, 2, cout)


def conv3x3_stage(x_nhwc, w_mat, in_scale, in_shift, *, cin, cout,
                  apply_input_act, th):
    """x_nhwc: (N,H,W,cin); w_mat: (9*cin,_CP) bf16 -> (y_raw bf16, stats f32)."""
    n, h, w, ca = x_nhwc.shape
    assert ca == cin, (ca, cin)
    assert h % th == 0, (h, th)
    nh = h // th
    kernel = functools.partial(_conv_stage_kernel, h=h, w=w, th=th, cin=cin,
                               cout=cout, apply_input_act=apply_input_act)
    return pl.pallas_call(
        kernel,
        out_shape=(jax.ShapeDtypeStruct((n, h, w, cout), jnp.bfloat16),
                   jax.ShapeDtypeStruct((n, nh, 2, cout), jnp.float32)),
        grid_spec=pltpu.PrefetchScalarGridSpec(
            num_scalar_prefetch=0,
            grid=(n, nh),
            in_specs=[
                pl.BlockSpec((1, h, w, cin), lambda b, i: (b, 0, 0, 0)),
                pl.BlockSpec((1, cin), lambda b, i: (0, 0)),
                pl.BlockSpec((1, cin), lambda b, i: (0, 0)),
                pl.BlockSpec((9 * cin, _CP), lambda b, i: (0, 0)),
            ],
            out_specs=[
                pl.BlockSpec((1, th, w, cout), lambda b, i: (b, i, 0, 0)),
                pl.BlockSpec((1, 1, 2, cout), lambda b, i: (b, i, 0, 0)),
            ],
        ),
        # No cross-step state: both axes are independent (megacore-friendly).
        compiler_params=pltpu.CompilerParams(
            dimension_semantics=("parallel", "parallel")),
    )(x_nhwc, in_scale, in_shift, w_mat)


# ----------------------------------------------------------------------------
# Kernel 2: final fused BN affine + ReLU (elementwise pass over y2).
# ----------------------------------------------------------------------------
def _bn_relu_kernel(x_ref, scale_ref, shift_ref, o_ref):
    o_ref[...] = jnp.maximum(
        x_ref[...].astype(jnp.float32) * scale_ref[...] + shift_ref[...],
        0.0).astype(o_ref.dtype)


def bn_relu(x_nhwc, scale, shift, *, th):
    n, h, w, c = x_nhwc.shape
    nh = h // th
    return pl.pallas_call(
        _bn_relu_kernel,
        out_shape=jax.ShapeDtypeStruct((n, h, w, c), jnp.float32),
        grid_spec=pltpu.PrefetchScalarGridSpec(
            num_scalar_prefetch=0,
            grid=(n, nh),
            in_specs=[
                pl.BlockSpec((1, th, w, c), lambda b, i: (b, i, 0, 0)),
                pl.BlockSpec((1, c), lambda b, i: (0, 0)),
                pl.BlockSpec((1, c), lambda b, i: (0, 0)),
            ],
            out_specs=pl.BlockSpec((1, th, w, c), lambda b, i: (b, i, 0, 0)),
        ),
        compiler_params=pltpu.CompilerParams(
            dimension_semantics=("parallel", "parallel")),
    )(x_nhwc, scale, shift)


# ----------------------------------------------------------------------------
# Glue: numerically stable combine of per-tile BN stats -> BN scale/shift.
# ----------------------------------------------------------------------------
def _finalize_bn(stats, gamma, beta, *, rows_per_tile, total):
    # stats: (n, nh, 2, c) with [tile_sum, tile_centered_sum_of_squares].
    s1 = stats[:, :, 0, :]                                   # (n, nh, c)
    m2 = stats[:, :, 1, :]                                   # (n, nh, c)
    mean = jnp.sum(s1, axis=(0, 1)) / total                  # (c,)
    tile_mean = s1 / rows_per_tile
    m2_total = (jnp.sum(m2, axis=(0, 1))
                + rows_per_tile * jnp.sum((tile_mean - mean) ** 2, axis=(0, 1)))
    var = m2_total / total                                   # biased (training BN)
    scale = gamma * jax.lax.rsqrt(var + _BN_EPS)
    shift = beta - mean * scale
    return scale.reshape(1, -1), shift.reshape(1, -1)


def _torch_w_to_mat(w_oihw):
    # (Cout, Cin, 3, 3) -> (9*Cin, _CP) bf16, row index = (ky*3+kx)*Cin + ci,
    # columns >= Cout zero-padded (sliced off inside the kernel before stores).
    cout, cin = w_oihw.shape[0], w_oihw.shape[1]
    assert cout <= _CP
    m = jnp.transpose(w_oihw, (2, 3, 1, 0)).reshape(9 * cin, cout)
    m = jnp.pad(m, ((0, 0), (0, _CP - cout)))
    return m.astype(jnp.bfloat16)


def double_conv_forward(x_nchw, params, *, th=8):
    """Equivalent of DoubleConv.forward for NCHW f32 input (training-mode BN)."""
    n, cin, h, w = x_nchw.shape
    cmid = params["gamma1"].shape[0]
    cout = params["gamma2"].shape[0]
    x = jnp.transpose(x_nchw, (0, 2, 3, 1)).astype(jnp.float32)        # -> NHWC

    ones = jnp.ones((1, cin), jnp.float32)    # dummy (stage 1 has no input BN)
    zeros = jnp.zeros((1, cin), jnp.float32)

    # Stage 1: raw conv (pre-BN, bf16) + per-tile BN statistics.
    y1, st1 = conv3x3_stage(x, params["w1_mat"], ones, zeros,
                            cin=cin, cout=cmid, apply_input_act=False, th=th)
    scale1, shift1 = _finalize_bn(st1, params["gamma1"], params["beta1"],
                                  rows_per_tile=th * w, total=n * h * w)

    # Stage 2: BN1+ReLU fused into the conv-2 input path; raw conv-2 output
    # plus its BN statistics.
    y2, st2 = conv3x3_stage(y1, params["w2_mat"], scale1, shift1,
                            cin=cmid, cout=cout, apply_input_act=True, th=th)
    scale2, shift2 = _finalize_bn(st2, params["gamma2"], params["beta2"],
                                  rows_per_tile=th * w, total=n * h * w)

    # Final BN2 + ReLU; transpose back to NCHW in the wrapper (W is not a
    # multiple of 128 here, so an in-kernel NCHW store would be lane-sparse).
    a2 = bn_relu(y2, scale2, shift2, th=th)
    return jnp.transpose(a2, (0, 3, 1, 2))                              # -> NCHW


# ----------------------------------------------------------------------------
# Pure-JAX f32 reference (mirrors the PyTorch math) for correctness checking.
# ----------------------------------------------------------------------------
def _reference(x_nchw, params):
    def conv(x, w_oihw):
        return jax.lax.conv_general_dilated(
            x, w_oihw, window_strides=(1, 1), padding="SAME",
            dimension_numbers=("NCHW", "OIHW", "NCHW"))

    def bn_relu_ref(y, gamma, beta):
        mean = jnp.mean(y, axis=(0, 2, 3), keepdims=True)
        var = jnp.var(y, axis=(0, 2, 3), keepdims=True)
        yhat = (y - mean) / jnp.sqrt(var + _BN_EPS)
        return jnp.maximum(yhat * gamma[None, :, None, None]
                           + beta[None, :, None, None], 0.0)

    y1 = bn_relu_ref(conv(x_nchw, params["w1"]), params["gamma1"], params["beta1"])
    y2 = bn_relu_ref(conv(y1, params["w2"]), params["gamma2"], params["beta2"])
    return y2


if __name__ == "__main__":
    # Small shapes: batch=2, in_channels=4, mid=out_channels=8, spatial=16x16.
    N, Cin, Cmid, Cout, H, W = 2, 4, 8, 8, 16, 16

    key = jax.random.PRNGKey(0)
    k_x, k_w1, k_w2 = jax.random.split(key, 3)

    x = jax.random.normal(k_x, (N, Cin, H, W), dtype=jnp.float32)
    w1 = jax.random.normal(k_w1, (Cmid, Cin, 3, 3), dtype=jnp.float32) * 0.1
    w2 = jax.random.normal(k_w2, (Cout, Cmid, 3, 3), dtype=jnp.float32) * 0.1

    params = {
        "w1": w1, "w2": w2,
        "w1_mat": _torch_w_to_mat(w1),
        "w2_mat": _torch_w_to_mat(w2),
        "gamma1": jnp.ones((Cmid,), jnp.float32),   # nn.BatchNorm2d default init
        "beta1": jnp.zeros((Cmid,), jnp.float32),
        "gamma2": jnp.ones((Cout,), jnp.float32),
        "beta2": jnp.zeros((Cout,), jnp.float32),
    }

    out = jax.jit(double_conv_forward)(x, params)
    out = jax.block_until_ready(out)
    assert out.shape == (N, Cout, H, W), out.shape

    ref = _reference(x, params)
    # bf16 MXU operands and bf16-stored intermediates (f32 accumulation and
    # f32 BN stats) -> looser tolerance than a pure-f32 comparison.
    max_err = float(jnp.max(jnp.abs(out - ref)))
    assert jnp.allclose(out, ref, rtol=5e-2, atol=5e-2), max_err

    print("KERNEL_OK")
</pallas_src>

<mosaic_0001>
module attributes {stable_mosaic.version = 11 : i64} {
  func.func @_conv_stage_kernel(%arg0: i32, %arg1: i32, %arg2: memref<1x16x16x4xf32, #tpu.memory_space<vmem>>, %arg3: memref<1x4xf32, #tpu.memory_space<vmem>>, %arg4: memref<1x4xf32, #tpu.memory_space<vmem>>, %arg5: memref<36x128xbf16, #tpu.memory_space<vmem>>, %arg6: memref<1x8x16x8xbf16, #tpu.memory_space<vmem>>, %arg7: memref<1x1x2x8xf32, #tpu.memory_space<vmem>>) attributes {dimension_semantics = [#tpu.dimension_semantics<parallel>, #tpu.dimension_semantics<parallel>], iteration_bounds = array<i64: 2, 2>, scalar_prefetch = 0 : i64, scratch_operands = 0 : i64, tpu.core_type = #tpu.core_type<tc>, window_params = [{transform_indices = @transform_0, window_bounds = array<i64: 1, 16, 16, 4>}, {pipeline_mode = #tpu.pipeline_mode<synchronous>, transform_indices = @transform_1, window_bounds = array<i64: 1, 4>}, {pipeline_mode = #tpu.pipeline_mode<synchronous>, transform_indices = @transform_2, window_bounds = array<i64: 1, 4>}, {pipeline_mode = #tpu.pipeline_mode<synchronous>, transform_indices = @transform_3, window_bounds = array<i64: 36, 128>}, {transform_indices = @transform_4, window_bounds = array<i64: 1, 8, 16, 8>}, {transform_indices = @transform_5, window_bounds = array<i64: 1, 1, 2, 8>}]} {
    %c8_i32 = arith.constant 8 : i32
    %0 = arith.muli %arg1, %c8_i32 : i32
    %1 = tpu.assume_multiple %0, 8 : i32
    %c0 = arith.constant 0 : index
    %2 = arith.index_cast %1 : i32 to index
    %c0_0 = arith.constant 0 : index
    %c0_1 = arith.constant 0 : index
    %3 = vector.load %arg2[%c0, %2, %c0_0, %c0_1] : memref<1x16x16x4xf32, #tpu.memory_space<vmem>>, vector<1x8x16x4xf32>
    %4 = vector.shape_cast %3 : vector<1x8x16x4xf32> to vector<8x16x4xf32>
    %c1_i32 = arith.constant 1 : i32
    %5 = arith.subi %1, %c1_i32 : i32
    %c0_i32 = arith.constant 0 : i32
    %6 = arith.maxsi %5, %c0_i32 : i32
    %c0_2 = arith.constant 0 : index
    %7 = arith.index_cast %6 : i32 to index
    %c0_3 = arith.constant 0 : index
    %c0_4 = arith.constant 0 : index
    %8 = vector.load %arg2[%c0_2, %7, %c0_3, %c0_4] : memref<1x16x16x4xf32, #tpu.memory_space<vmem>>, vector<1x1x16x4xf32>
    %9 = vector.shape_cast %8 : vector<1x1x16x4xf32> to vector<1x16x4xf32>
    %c8_i32_5 = arith.constant 8 : i32
    %10 = arith.addi %1, %c8_i32_5 : i32
    %c15_i32 = arith.constant 15 : i32
    %11 = arith.minsi %10, %c15_i32 : i32
    %c0_6 = arith.constant 0 : index
    %12 = arith.index_cast %11 : i32 to index
    %c0_7 = arith.constant 0 : index
    %c0_8 = arith.constant 0 : index
    %13 = vector.load %arg2[%c0_6, %12, %c0_7, %c0_8] : memref<1x16x16x4xf32, #tpu.memory_space<vmem>>, vector<1x1x16x4xf32>
    %14 = vector.shape_cast %13 : vector<1x1x16x4xf32> to vector<1x16x4xf32>
    %c0_i32_9 = arith.constant 0 : i32
    %15 = arith.cmpi eq, %arg1, %c0_i32_9 : i32
    %cst = arith.constant 0.000000e+00 : f32
    %16 = vector.broadcast %cst : f32 to vector<1x16x4xf32>
    %17 = arith.select %15, %16, %9 : vector<1x16x4xf32>
    %c1_i32_10 = arith.constant 1 : i32
    %18 = arith.cmpi eq, %arg1, %c1_i32_10 : i32
    %cst_11 = arith.constant 0.000000e+00 : f32
    %19 = vector.broadcast %cst_11 : f32 to vector<1x16x4xf32>
    %20 = arith.select %18, %19, %14 : vector<1x16x4xf32>
    %21 = tpu.concatenate %17, %4, %20 in 0 : vector<1x16x4xf32>, vector<8x16x4xf32>, vector<1x16x4xf32> -> vector<10x16x4xf32>
    %cst_12 = arith.constant 0.000000e+00 : f32
    %22 = vector.broadcast %cst_12 : f32 to vector<10x1x4xf32>
    %23 = tpu.concatenate %22, %21, %22 in 1 : vector<10x1x4xf32>, vector<10x16x4xf32>, vector<10x1x4xf32> -> vector<10x18x4xf32>
    %24 = vector.extract_strided_slice %23 {offsets = [0, 0, 0], sizes = [8, 16, 4], strides = [1, 1, 1]} : vector<10x18x4xf32> to vector<8x16x4xf32>
    %25 = vector.shape_cast %24 : vector<8x16x4xf32> to vector<128x4xf32>
    %26 = vector.extract_strided_slice %23 {offsets = [0, 1, 0], sizes = [8, 16, 4], strides = [1, 1, 1]} : vector<10x18x4xf32> to vector<8x16x4xf32>
    %27 = vector.shape_cast %26 : vector<8x16x4xf32> to vector<128x4xf32>
    %28 = vector.extract_strided_slice %23 {offsets = [0, 2, 0], sizes = [8, 16, 4], strides = [1, 1, 1]} : vector<10x18x4xf32> to vector<8x16x4xf32>
    %29 = vector.shape_cast %28 : vector<8x16x4xf32> to vector<128x4xf32>
    %30 = vector.extract_strided_slice %23 {offsets = [1, 0, 0], sizes = [8, 16, 4], strides = [1, 1, 1]} : vector<10x18x4xf32> to vector<8x16x4xf32>
    %31 = vector.shape_cast %30 : vector<8x16x4xf32> to vector<128x4xf32>
    %32 = vector.extract_strided_slice %23 {offsets = [1, 1, 0], sizes = [8, 16, 4], strides = [1, 1, 1]} : vector<10x18x4xf32> to vector<8x16x4xf32>
    %33 = vector.shape_cast %32 : vector<8x16x4xf32> to vector<128x4xf32>
    %34 = vector.extract_strided_slice %23 {offsets = [1, 2, 0], sizes = [8, 16, 4], strides = [1, 1, 1]} : vector<10x18x4xf32> to vector<8x16x4xf32>
    %35 = vector.shape_cast %34 : vector<8x16x4xf32> to vector<128x4xf32>
    %36 = vector.extract_strided_slice %23 {offsets = [2, 0, 0], sizes = [8, 16, 4], strides = [1, 1, 1]} : vector<10x18x4xf32> to vector<8x16x4xf32>
    %37 = vector.shape_cast %36 : vector<8x16x4xf32> to vector<128x4xf32>
    %38 = vector.extract_strided_slice %23 {offsets = [2, 1, 0], sizes = [8, 16, 4], strides = [1, 1, 1]} : vector<10x18x4xf32> to vector<8x16x4xf32>
    %39 = vector.shape_cast %38 : vector<8x16x4xf32> to vector<128x4xf32>
    %40 = vector.extract_strided_slice %23 {offsets = [2, 2, 0], sizes = [8, 16, 4], strides = [1, 1, 1]} : vector<10x18x4xf32> to vector<8x16x4xf32>
    %41 = vector.shape_cast %40 : vector<8x16x4xf32> to vector<128x4xf32>
    %42 = tpu.concatenate %25, %27, %29, %31, %33, %35, %37, %39, %41 in 1 : vector<128x4xf32>, vector<128x4xf32>, vector<128x4xf32>, vector<128x4xf32>, vector<128x4xf32>, vector<128x4xf32>, vector<128x4xf32>, vector<128x4xf32>, vector<128x4xf32> -> vector<128x36xf32>
    %43 = arith.truncf %42 : vector<128x36xf32> to vector<128x36xbf16>
    %c0_13 = arith.constant 0 : index
    %c0_14 = arith.constant 0 : index
    %44 = vector.load %arg5[%c0_13, %c0_14] : memref<36x128xbf16, #tpu.memory_space<vmem>>, vector<36x128xbf16>
    %cst_15 = arith.constant dense<0.000000e+00> : vector<128x128xf32>
    %45 = tpu.matmul %43, %44, %cst_15 {dimension_numbers = #tpu.dot_dimension_numbers<[1], [0], [0], [1], [0, 0, 1, 1], [], []>} : vector<128x36xbf16>, vector<36x128xbf16>, vector<128x128xf32> -> vector<128x128xf32>
    %46 = vector.extract_strided_slice %45 {offsets = [0, 0], sizes = [128, 8], strides = [1, 1]} : vector<128x128xf32> to vector<128x8xf32>
    %47 = vector.shape_cast %46 : vector<128x8xf32> to vector<1x8x16x8xf32>
    %48 = arith.truncf %47 : vector<1x8x16x8xf32> to vector<1x8x16x8xbf16>
    %c0_16 = arith.constant 0 : index
    %c0_17 = arith.constant 0 : index
    %c0_18 = arith.constant 0 : index
    %c0_19 = arith.constant 0 : index
    %49 = vector.load %arg6[%c0_16, %c0_17, %c0_18, %c0_19] : memref<1x8x16x8xbf16, #tpu.memory_space<vmem>>, vector<1x8x16x8xbf16>
    tpu.vector_store %arg6[%c0_16, %c0_17, %c0_18, %c0_19], %48 {strides = array<i32>} : memref<1x8x16x8xbf16, #tpu.memory_space<vmem>>, vector<1x8x16x8xbf16>,
    %cst_20 = arith.constant dense<0.000000e+00> : vector<8xf32>
    %50 = vector.multi_reduction <add>, %46, %cst_20 [0] : vector<128x8xf32> to vector<8xf32>
    %51 = vector.shape_cast %50 : vector<8xf32> to vector<1x8xf32>
    %cst_21 = arith.constant 1.280000e+02 : f32
    %52 = vector.broadcast %cst_21 : f32 to vector<1x8xf32>
    %53 = arith.divf %51, %52 : vector<1x8xf32>
    %54 = vector.broadcast %53 : vector<1x8xf32> to vector<128x8xf32>
    %55 = arith.subf %46, %54 : vector<128x8xf32>
    %56 = arith.mulf %55, %55 : vector<128x8xf32>
    %cst_22 = arith.constant dense<0.000000e+00> : vector<8xf32>
    %57 = vector.multi_reduction <add>, %56, %cst_22 [0] : vector<128x8xf32> to vector<8xf32>
    %58 = vector.shape_cast %57 : vector<8xf32> to vector<1x8xf32>
    %59 = tpu.concatenate %51, %58 in 0 : vector<1x8xf32>, vector<1x8xf32> -> vector<2x8xf32>
    %60 = vector.shape_cast %59 : vector<2x8xf32> to vector<1x1x2x8xf32>
    %c0_23 = arith.constant 0 : index
    %c0_24 = arith.constant 0 : index
    %c0_25 = arith.constant 0 : index
    %c0_26 = arith.constant 0 : index
    %61 = vector.load %arg7[%c0_23, %c0_24, %c0_25, %c0_26] : memref<1x1x2x8xf32, #tpu.memory_space<vmem>>, vector<1x1x2x8xf32>
    tpu.vector_store %arg7[%c0_23, %c0_24, %c0_25, %c0_26], %60 {strides = array<i32>} : memref<1x1x2x8xf32, #tpu.memory_space<vmem>>, vector<1x1x2x8xf32>,
    return
  }
  func.func @transform_0(%arg0: i32, %arg1: i32) -> (i32, i32, i32, i32) {
    %c0_i32 = arith.constant 0 : i32
    %c0_i32_0 = arith.constant 0 : i32
    %c0_i32_1 = arith.constant 0 : i32
    %c0_i32_2 = arith.constant 0 : i32
    return %arg0, %c0_i32, %c0_i32_0, %c0_i32_1 : i32, i32, i32, i32
  }
  func.func @transform_1(%arg0: i32, %arg1: i32) -> (i32, i32) {
    %c0_i32 = arith.constant 0 : i32
    %c0_i32_0 = arith.constant 0 : i32
    %c0_i32_1 = arith.constant 0 : i32
    return %c0_i32, %c0_i32_0 : i32, i32
  }
  func.func @transform_2(%arg0: i32, %arg1: i32) -> (i32, i32) {
    %c0_i32 = arith.constant 0 : i32
    %c0_i32_0 = arith.constant 0 : i32
    %c0_i32_1 = arith.constant 0 : i32
    return %c0_i32, %c0_i32_0 : i32, i32
  }
  func.func @transform_3(%arg0: i32, %arg1: i32) -> (i32, i32) {
    %c0_i32 = arith.constant 0 : i32
    %c0_i32_0 = arith.constant 0 : i32
    %c0_i32_1 = arith.constant 0 : i32
    return %c0_i32, %c0_i32_0 : i32, i32
  }
  func.func @transform_4(%arg0: i32, %arg1: i32) -> (i32, i32, i32, i32) {
    %c0_i32 = arith.constant 0 : i32
    %c0_i32_0 = arith.constant 0 : i32
    %c0_i32_1 = arith.constant 0 : i32
    return %arg0, %arg1, %c0_i32, %c0_i32_0 : i32, i32, i32, i32
  }
  func.func @transform_5(%arg0: i32, %arg1: i32) -> (i32, i32, i32, i32) {
    %c0_i32 = arith.constant 0 : i32
    %c0_i32_0 = arith.constant 0 : i32
    %c0_i32_1 = arith.constant 0 : i32
    return %arg0, %arg1, %c0_i32, %c0_i32_0 : i32, i32, i32, i32
  }
}

module attributes {stable_mosaic.version = 11 : i64} {
  func.func @_bn_relu_kernel(%arg0: i32, %arg1: i32, %arg2: memref<1x8x16x8xbf16, #tpu.memory_space<vmem>>, %arg3: memref<1x8xf32, #tpu.memory_space<vmem>>, %arg4: memref<1x8xf32, #tpu.memory_space<vmem>>, %arg5: memref<1x8x16x8xf32, #tpu.memory_space<vmem>>) attributes {dimension_semantics = [#tpu.dimension_semantics<parallel>, #tpu.dimension_semantics<parallel>], iteration_bounds = array<i64: 2, 2>, scalar_prefetch = 0 : i64, scratch_operands = 0 : i64, tpu.core_type = #tpu.core_type<tc>, window_params = [{transform_indices = @transform_0, window_bounds = array<i64: 1, 8, 16, 8>}, {pipeline_mode = #tpu.pipeline_mode<synchronous>, transform_indices = @transform_1, window_bounds = array<i64: 1, 8>}, {pipeline_mode = #tpu.pipeline_mode<synchronous>, transform_indices = @transform_2, window_bounds = array<i64: 1, 8>}, {transform_indices = @transform_3, window_bounds = array<i64: 1, 8, 16, 8>}]} {
    %c0 = arith.constant 0 : index
    %c0_0 = arith.constant 0 : index
    %c0_1 = arith.constant 0 : index
    %c0_2 = arith.constant 0 : index
    %0 = vector.load %arg2[%c0, %c0_0, %c0_1, %c0_2] : memref<1x8x16x8xbf16, #tpu.memory_space<vmem>>, vector<1x8x16x8xbf16>
    %1 = arith.extf %0 : vector<1x8x16x8xbf16> to vector<1x8x16x8xf32>
    %c0_3 = arith.constant 0 : index
    %c0_4 = arith.constant 0 : index
    %2 = vector.load %arg3[%c0_3, %c0_4] : memref<1x8xf32, #tpu.memory_space<vmem>>, vector<1x8xf32>
    %3 = vector.shape_cast %2 : vector<1x8xf32> to vector<1x1x1x8xf32>
    %4 = vector.broadcast %3 : vector<1x1x1x8xf32> to vector<1x8x16x8xf32>
    %5 = arith.mulf %1, %4 : vector<1x8x16x8xf32>
    %c0_5 = arith.constant 0 : index
    %c0_6 = arith.constant 0 : index
    %6 = vector.load %arg4[%c0_5, %c0_6] : memref<1x8xf32, #tpu.memory_space<vmem>>, vector<1x8xf32>
    %7 = vector.shape_cast %6 : vector<1x8xf32> to vector<1x1x1x8xf32>
    %8 = vector.broadcast %7 : vector<1x1x1x8xf32> to vector<1x8x16x8xf32>
    %9 = arith.addf %5, %8 : vector<1x8x16x8xf32>
    %cst = arith.constant 0.000000e+00 : f32
    %10 = vector.broadcast %cst : f32 to vector<1x8x16x8xf32>
    %11 = arith.maximumf %9, %10 : vector<1x8x16x8xf32>
    %c0_7 = arith.constant 0 : index
    %c0_8 = arith.constant 0 : index
    %c0_9 = arith.constant 0 : index
    %c0_10 = arith.constant 0 : index
    %12 = vector.load %arg5[%c0_7, %c0_8, %c0_9, %c0_10] : memref<1x8x16x8xf32, #tpu.memory_space<vmem>>, vector<1x8x16x8xf32>
    tpu.vector_store %arg5[%c0_7, %c0_8, %c0_9, %c0_10], %11 {strides = array<i32>} : memref<1x8x16x8xf32, #tpu.memory_space<vmem>>, vector<1x8x16x8xf32>,
    return
  }
  func.func @transform_0(%arg0: i32, %arg1: i32) -> (i32, i32, i32, i32) {
    %c0_i32 = arith.constant 0 : i32
    %c0_i32_0 = arith.constant 0 : i32
    %c0_i32_1 = arith.constant 0 : i32
    return %arg0, %arg1, %c0_i32, %c0_i32_0 : i32, i32, i32, i32
  }
  func.func @transform_1(%arg0: i32, %arg1: i32) -> (i32, i32) {
    %c0_i32 = arith.constant 0 : i32
    %c0_i32_0 = arith.constant 0 : i32
    %c0_i32_1 = arith.constant 0 : i32
    return %c0_i32, %c0_i32_0 : i32, i32
  }
  func.func @transform_2(%arg0: i32, %arg1: i32) -> (i32, i32) {
    %c0_i32 = arith.constant 0 : i32
    %c0_i32_0 = arith.constant 0 : i32
    %c0_i32_1 = arith.constant 0 : i32
    return %c0_i32, %c0_i32_0 : i32, i32
  }
  func.func @transform_3(%arg0: i32, %arg1: i32) -> (i32, i32, i32, i32) {
    %c0_i32 = arith.constant 0 : i32
    %c0_i32_0 = arith.constant 0 : i32
    %c0_i32_1 = arith.constant 0 : i32
    return %arg0, %arg1, %c0_i32, %c0_i32_0 : i32, i32, i32, i32
  }
}

module attributes {stable_mosaic.version = 11 : i64} {
  func.func @_conv_stage_kernel(%arg0: i32, %arg1: i32, %arg2: memref<1x16x16x8xbf16, #tpu.memory_space<vmem>>, %arg3: memref<1x8xf32, #tpu.memory_space<vmem>>, %arg4: memref<1x8xf32, #tpu.memory_space<vmem>>, %arg5: memref<72x128xbf16, #tpu.memory_space<vmem>>, %arg6: memref<1x8x16x8xbf16, #tpu.memory_space<vmem>>, %arg7: memref<1x1x2x8xf32, #tpu.memory_space<vmem>>) attributes {dimension_semantics = [#tpu.dimension_semantics<parallel>, #tpu.dimension_semantics<parallel>], iteration_bounds = array<i64: 2, 2>, scalar_prefetch = 0 : i64, scratch_operands = 0 : i64, tpu.core_type = #tpu.core_type<tc>, window_params = [{transform_indices = @transform_0, window_bounds = array<i64: 1, 16, 16, 8>}, {pipeline_mode = #tpu.pipeline_mode<synchronous>, transform_indices = @transform_1, window_bounds = array<i64: 1, 8>}, {pipeline_mode = #tpu.pipeline_mode<synchronous>, transform_indices = @transform_2, window_bounds = array<i64: 1, 8>}, {pipeline_mode = #tpu.pipeline_mode<synchronous>, transform_indices = @transform_3, window_bounds = array<i64: 72, 128>}, {transform_indices = @transform_4, window_bounds = array<i64: 1, 8, 16, 8>}, {transform_indices = @transform_5, window_bounds = array<i64: 1, 1, 2, 8>}]} {
    %c8_i32 = arith.constant 8 : i32
    %0 = arith.muli %arg1, %c8_i32 : i32
    %1 = tpu.assume_multiple %0, 8 : i32
    %c0 = arith.constant 0 : index
    %c0_0 = arith.constant 0 : index
    %2 = vector.load %arg3[%c0, %c0_0] : memref<1x8xf32, #tpu.memory_space<vmem>>, vector<1x8xf32>
    %c0_1 = arith.constant 0 : index
    %c0_2 = arith.constant 0 : index
    %3 = vector.load %arg4[%c0_1, %c0_2] : memref<1x8xf32, #tpu.memory_space<vmem>>, vector<1x8xf32>
    %c0_3 = arith.constant 0 : index
    %4 = arith.index_cast %1 : i32 to index
    %c0_4 = arith.constant 0 : index
    %c0_5 = arith.constant 0 : index
    %5 = vector.load %arg2[%c0_3, %4, %c0_4, %c0_5] : memref<1x16x16x8xbf16, #tpu.memory_space<vmem>>, vector<1x8x16x8xbf16>
    %6 = vector.shape_cast %5 : vector<1x8x16x8xbf16> to vector<8x16x8xbf16>
    %7 = arith.extf %6 : vector<8x16x8xbf16> to vector<8x16x8xf32>
    %8 = vector.shape_cast %2 : vector<1x8xf32> to vector<1x1x8xf32>
    %9 = vector.broadcast %8 : vector<1x1x8xf32> to vector<8x16x8xf32>
    %10 = arith.mulf %7, %9 : vector<8x16x8xf32>
    %11 = vector.shape_cast %3 : vector<1x8xf32> to vector<1x1x8xf32>
    %12 = vector.broadcast %11 : vector<1x1x8xf32> to vector<8x16x8xf32>
    %13 = arith.addf %10, %12 : vector<8x16x8xf32>
    %cst = arith.constant 0.000000e+00 : f32
    %14 = vector.broadcast %cst : f32 to vector<8x16x8xf32>
    %15 = arith.maximumf %13, %14 : vector<8x16x8xf32>
    %c1_i32 = arith.constant 1 : i32
    %16 = arith.subi %1, %c1_i32 : i32
    %c0_i32 = arith.constant 0 : i32
    %17 = arith.maxsi %16, %c0_i32 : i32
    %c0_6 = arith.constant 0 : index
    %18 = arith.index_cast %17 : i32 to index
    %c0_7 = arith.constant 0 : index
    %c0_8 = arith.constant 0 : index
    %19 = vector.load %arg2[%c0_6, %18, %c0_7, %c0_8] : memref<1x16x16x8xbf16, #tpu.memory_space<vmem>>, vector<1x1x16x8xbf16>
    %20 = vector.shape_cast %19 : vector<1x1x16x8xbf16> to vector<1x16x8xbf16>
    %21 = arith.extf %20 : vector<1x16x8xbf16> to vector<1x16x8xf32>
    %22 = vector.shape_cast %2 : vector<1x8xf32> to vector<1x1x8xf32>
    %23 = vector.broadcast %22 : vector<1x1x8xf32> to vector<1x16x8xf32>
    %24 = arith.mulf %21, %23 : vector<1x16x8xf32>
    %25 = vector.shape_cast %3 : vector<1x8xf32> to vector<1x1x8xf32>
    %26 = vector.broadcast %25 : vector<1x1x8xf32> to vector<1x16x8xf32>
    %27 = arith.addf %24, %26 : vector<1x16x8xf32>
    %cst_9 = arith.constant 0.000000e+00 : f32
    %28 = vector.broadcast %cst_9 : f32 to vector<1x16x8xf32>
    %29 = arith.maximumf %27, %28 : vector<1x16x8xf32>
    %c8_i32_10 = arith.constant 8 : i32
    %30 = arith.addi %1, %c8_i32_10 : i32
    %c15_i32 = arith.constant 15 : i32
    %31 = arith.minsi %30, %c15_i32 : i32
    %c0_11 = arith.constant 0 : index
    %32 = arith.index_cast %31 : i32 to index
    %c0_12 = arith.constant 0 : index
    %c0_13 = arith.constant 0 : index
    %33 = vector.load %arg2[%c0_11, %32, %c0_12, %c0_13] : memref<1x16x16x8xbf16, #tpu.memory_space<vmem>>, vector<1x1x16x8xbf16>
    %34 = vector.shape_cast %33 : vector<1x1x16x8xbf16> to vector<1x16x8xbf16>
    %35 = arith.extf %34 : vector<1x16x8xbf16> to vector<1x16x8xf32>
    %36 = vector.shape_cast %2 : vector<1x8xf32> to vector<1x1x8xf32>
    %37 = vector.broadcast %36 : vector<1x1x8xf32> to vector<1x16x8xf32>
    %38 = arith.mulf %35, %37 : vector<1x16x8xf32>
    %39 = vector.shape_cast %3 : vector<1x8xf32> to vector<1x1x8xf32>
    %40 = vector.broadcast %39 : vector<1x1x8xf32> to vector<1x16x8xf32>
    %41 = arith.addf %38, %40 : vector<1x16x8xf32>
    %cst_14 = arith.constant 0.000000e+00 : f32
    %42 = vector.broadcast %cst_14 : f32 to vector<1x16x8xf32>
    %43 = arith.maximumf %41, %42 : vector<1x16x8xf32>
    %c0_i32_15 = arith.constant 0 : i32
    %44 = arith.cmpi eq, %arg1, %c0_i32_15 : i32
    %cst_16 = arith.constant 0.000000e+00 : f32
    %45 = vector.broadcast %cst_16 : f32 to vector<1x16x8xf32>
    %46 = arith.select %44, %45, %29 : vector<1x16x8xf32>
    %c1_i32_17 = arith.constant 1 : i32
    %47 = arith.cmpi eq, %arg1, %c1_i32_17 : i32
    %cst_18 = arith.constant 0.000000e+00 : f32
    %48 = vector.broadcast %cst_18 : f32 to vector<1x16x8xf32>
    %49 = arith.select %47, %48, %43 : vector<1x16x8xf32>
    %50 = tpu.concatenate %46, %15, %49 in 0 : vector<1x16x8xf32>, vector<8x16x8xf32>, vector<1x16x8xf32> -> vector<10x16x8xf32>
    %cst_19 = arith.constant 0.000000e+00 : f32
    %51 = vector.broadcast %cst_19 : f32 to vector<10x1x8xf32>
    %52 = tpu.concatenate %51, %50, %51 in 1 : vector<10x1x8xf32>, vector<10x16x8xf32>, vector<10x1x8xf32> -> vector<10x18x8xf32>
    %53 = vector.extract_strided_slice %52 {offsets = [0, 0, 0], sizes = [8, 16, 8], strides = [1, 1, 1]} : vector<10x18x8xf32> to vector<8x16x8xf32>
    %54 = vector.shape_cast %53 : vector<8x16x8xf32> to vector<128x8xf32>
    %55 = vector.extract_strided_slice %52 {offsets = [0, 1, 0], sizes = [8, 16, 8], strides = [1, 1, 1]} : vector<10x18x8xf32> to vector<8x16x8xf32>
    %56 = vector.shape_cast %55 : vector<8x16x8xf32> to vector<128x8xf32>
    %57 = vector.extract_strided_slice %52 {offsets = [0, 2, 0], sizes = [8, 16, 8], strides = [1, 1, 1]} : vector<10x18x8xf32> to vector<8x16x8xf32>
    %58 = vector.shape_cast %57 : vector<8x16x8xf32> to vector<128x8xf32>
    %59 = vector.extract_strided_slice %52 {offsets = [1, 0, 0], sizes = [8, 16, 8], strides = [1, 1, 1]} : vector<10x18x8xf32> to vector<8x16x8xf32>
    %60 = vector.shape_cast %59 : vector<8x16x8xf32> to vector<128x8xf32>
    %61 = vector.extract_strided_slice %52 {offsets = [1, 1, 0], sizes = [8, 16, 8], strides = [1, 1, 1]} : vector<10x18x8xf32> to vector<8x16x8xf32>
    %62 = vector.shape_cast %61 : vector<8x16x8xf32> to vector<128x8xf32>
    %63 = vector.extract_strided_slice %52 {offsets = [1, 2, 0], sizes = [8, 16, 8], strides = [1, 1, 1]} : vector<10x18x8xf32> to vector<8x16x8xf32>
    %64 = vector.shape_cast %63 : vector<8x16x8xf32> to vector<128x8xf32>
    %65 = vector.extract_strided_slice %52 {offsets = [2, 0, 0], sizes = [8, 16, 8], strides = [1, 1, 1]} : vector<10x18x8xf32> to vector<8x16x8xf32>
    %66 = vector.shape_cast %65 : vector<8x16x8xf32> to vector<128x8xf32>
    %67 = vector.extract_strided_slice %52 {offsets = [2, 1, 0], sizes = [8, 16, 8], strides = [1, 1, 1]} : vector<10x18x8xf32> to vector<8x16x8xf32>
    %68 = vector.shape_cast %67 : vector<8x16x8xf32> to vector<128x8xf32>
    %69 = vector.extract_strided_slice %52 {offsets = [2, 2, 0], sizes = [8, 16, 8], strides = [1, 1, 1]} : vector<10x18x8xf32> to vector<8x16x8xf32>
    %70 = vector.shape_cast %69 : vector<8x16x8xf32> to vector<128x8xf32>
    %71 = tpu.concatenate %54, %56, %58, %60, %62, %64, %66, %68, %70 in 1 : vector<128x8xf32>, vector<128x8xf32>, vector<128x8xf32>, vector<128x8xf32>, vector<128x8xf32>, vector<128x8xf32>, vector<128x8xf32>, vector<128x8xf32>, vector<128x8xf32> -> vector<128x72xf32>
    %72 = arith.truncf %71 : vector<128x72xf32> to vector<128x72xbf16>
    %c0_20 = arith.constant 0 : index
    %c0_21 = arith.constant 0 : index
    %73 = vector.load %arg5[%c0_20, %c0_21] : memref<72x128xbf16, #tpu.memory_space<vmem>>, vector<72x128xbf16>
    %cst_22 = arith.constant dense<0.000000e+00> : vector<128x128xf32>
    %74 = tpu.matmul %72, %73, %cst_22 {dimension_numbers = #tpu.dot_dimension_numbers<[1], [0], [0], [1], [0, 0, 1, 1], [], []>} : vector<128x72xbf16>, vector<72x128xbf16>, vector<128x128xf32> -> vector<128x128xf32>
    %75 = vector.extract_strided_slice %74 {offsets = [0, 0], sizes = [128, 8], strides = [1, 1]} : vector<128x128xf32> to vector<128x8xf32>
    %76 = vector.shape_cast %75 : vector<128x8xf32> to vector<1x8x16x8xf32>
    %77 = arith.truncf %76 : vector<1x8x16x8xf32> to vector<1x8x16x8xbf16>
    %c0_23 = arith.constant 0 : index
    %c0_24 = arith.constant 0 : index
    %c0_25 = arith.constant 0 : index
    %c0_26 = arith.constant 0 : index
    %78 = vector.load %arg6[%c0_23, %c0_24, %c0_25, %c0_26] : memref<1x8x16x8xbf16, #tpu.memory_space<vmem>>, vector<1x8x16x8xbf16>
    tpu.vector_store %arg6[%c0_23, %c0_24, %c0_25, %c0_26], %77 {strides = array<i32>} : memref<1x8x16x8xbf16, #tpu.memory_space<vmem>>, vector<1x8x16x8xbf16>,
    %cst_27 = arith.constant dense<0.000000e+00> : vector<8xf32>
    %79 = vector.multi_reduction <add>, %75, %cst_27 [0] : vector<128x8xf32> to vector<8xf32>
    %80 = vector.shape_cast %79 : vector<8xf32> to vector<1x8xf32>
    %cst_28 = arith.constant 1.280000e+02 : f32
    %81 = vector.broadcast %cst_28 : f32 to vector<1x8xf32>
    %82 = arith.divf %80, %81 : vector<1x8xf32>
    %83 = vector.broadcast %82 : vector<1x8xf32> to vector<128x8xf32>
    %84 = arith.subf %75, %83 : vector<128x8xf32>
    %85 = arith.mulf %84, %84 : vector<128x8xf32>
    %cst_29 = arith.constant dense<0.000000e+00> : vector<8xf32>
    %86 = vector.multi_reduction <add>, %85, %cst_29 [0] : vector<128x8xf32> to vector<8xf32>
    %87 = vector.shape_cast %86 : vector<8xf32> to vector<1x8xf32>
    %88 = tpu.concatenate %80, %87 in 0 : vector<1x8xf32>, vector<1x8xf32> -> vector<2x8xf32>
    %89 = vector.shape_cast %88 : vector<2x8xf32> to vector<1x1x2x8xf32>
    %c0_30 = arith.constant 0 : index
    %c0_31 = arith.constant 0 : index
    %c0_32 = arith.constant 0 : index
    %c0_33 = arith.constant 0 : index
    %90 = vector.load %arg7[%c0_30, %c0_31, %c0_32, %c0_33] : memref<1x1x2x8xf32, #tpu.memory_space<vmem>>, vector<1x1x2x8xf32>
    tpu.vector_store %arg7[%c0_30, %c0_31, %c0_32, %c0_33], %89 {strides = array<i32>} : memref<1x1x2x8xf32, #tpu.memory_space<vmem>>, vector<1x1x2x8xf32>,
    return
  }
  func.func @transform_0(%arg0: i32, %arg1: i32) -> (i32, i32, i32, i32) {
    %c0_i32 = arith.constant 0 : i32
    %c0_i32_0 = arith.constant 0 : i32
    %c0_i32_1 = arith.constant 0 : i32
    %c0_i32_2 = arith.constant 0 : i32
    return %arg0, %c0_i32, %c0_i32_0, %c0_i32_1 : i32, i32, i32, i32
  }
  func.func @transform_1(%arg0: i32, %arg1: i32) -> (i32, i32) {
    %c0_i32 = arith.constant 0 : i32
    %c0_i32_0 = arith.constant 0 : i32
    %c0_i32_1 = arith.constant 0 : i32
    return %c0_i32, %c0_i32_0 : i32, i32
  }
  func.func @transform_2(%arg0: i32, %arg1: i32) -> (i32, i32) {
    %c0_i32 = arith.constant 0 : i32
    %c0_i32_0 = arith.constant 0 : i32
    %c0_i32_1 = arith.constant 0 : i32
    return %c0_i32, %c0_i32_0 : i32, i32
  }
  func.func @transform_3(%arg0: i32, %arg1: i32) -> (i32, i32) {
    %c0_i32 = arith.constant 0 : i32
    %c0_i32_0 = arith.constant 0 : i32
    %c0_i32_1 = arith.constant 0 : i32
    return %c0_i32, %c0_i32_0 : i32, i32
  }
  func.func @transform_4(%arg0: i32, %arg1: i32) -> (i32, i32, i32, i32) {
    %c0_i32 = arith.constant 0 : i32
    %c0_i32_0 = arith.constant 0 : i32
    %c0_i32_1 = arith.constant 0 : i32
    return %arg0, %arg1, %c0_i32, %c0_i32_0 : i32, i32, i32, i32
  }
  func.func @transform_5(%arg0: i32, %arg1: i32) -> (i32, i32, i32, i32) {
    %c0_i32 = arith.constant 0 : i32
    %c0_i32_0 = arith.constant 0 : i32
    %c0_i32_1 = arith.constant 0 : i32
    return %arg0, %arg1, %c0_i32, %c0_i32_0 : i32, i32, i32, i32
  }
}

</mosaic_0001>

<bundles_post_ra>
// kernel: double_conv_forward.5
= control target key start
LH: loop header
LB: loop body
LE: loop exit
PB: predicated region body
PF: predicated region fallthrough
CT: control target
= control target key end

     0   :  { %s581_s12 = smov 0   ;;  %s583_s13 = smov 0   ;;  %s722_s0 = inlined_call_operand.vmem [shape: bf16[2,16,16,8], index: 0, kind: input, shape index: {}]   ;;  %s723_s1 = inlined_call_operand.vmem [shape: f32[1,8], index: 1, kind: input, shape index: {}]   ;;  %s724_s2 = inlined_call_operand.vmem [shape: f32[1,8], index: 2, kind: input, shape index: {}]   ;;  %s725_s3 = inlined_call_operand.vmem [shape: f32[2,16,16,8], index: 3, kind: output, shape index: {}]  }
   0x1   :  { %s585_s14 = smov 0   ;;  %s587_s15 = smov 0  }
   0x2   :  { %s589_s16 = smov 0  }
   0x3 LB: > { %s22_s17 = sadd.s32 1, %s551_s14  ;;  %s25_s18 = sadd.s32 1, %s555_s15  ;;  %s559_s16 = sphi %s589_s16, %s13_s16   ;;  %s555_s15 = sphi %s587_s15, %s729_s15   ;;  %s551_s14 = sphi %s585_s14, %s728_s14   ;;  %s547_s13 = sphi %s583_s13, %s727_s13   ;;  %s543_s12 = sphi %s581_s12, %s726_s12  }
   0x4   : > { %p23_p0 = scmp.ge.s32.totalorder %s22_s17, 2  ;;  %p429_p1 = scmp.ge.s32.totalorder %s559_s16, 1 }
   0x5   : > { %p159_p2 = scmp.lt.s32.totalorder %s559_s16, 5 }
   0x6   : > { %s731_s17 = smov (%p23_p0, %s22_s17), 0  ;;  %s733_s18 = smov (!%p23_p0, %s25_s18), %s555_s15 }
   0x7   : > { %p160_p3 = pnand %p429_p1, %p159_p2  ;;  %p27_p4 = scmp.ge.s32.totalorder %s733_s18, 2 }
   0x8   : > { %s430_s19 = sshll.u32 (!%p160_p3), %s543_s12, 3  ;;  %p194_p5 = scmp.lt.s32.totalorder (!%p160_p3), %s547_s13, 1  ;;  %v622_v0 = vld [vmem:[%s723_s1] ss:$0 sm:$0xff] (!%p160_p3)  ;;  %vm309_vm0 = vcmask (!%p160_p3), 64512  }
   0x9   : > { %s735_s18 = smov (%p27_p4, %s733_s18), 0  ;;  %163 = sbr.rel (%p160_p3) target bundleno = 42 (0x2a), region = 32 }
   0xa   : > { %p196_p6 = scmp.lt.s32.totalorder (!%p160_p3), %s430_s19, 15  ;;  %v631_v9 = vld [vmem:[%s724_s2] ss:$0 sm:$0xff] (!%p160_p3) }
  0x10   : > { %s737_s13 = smov (!%p194_p5, %s547_s13), 1  ;;  %s739_s19 = smov (!%p196_p6, %s430_s19), 15 }
  0x11   : > { %s432_s20 = sshll.u32 %s737_s13, 5  ;;  %s431_s21 = sshll.u32 %s739_s19, 1 }
  0x12   : > { %s611_s22 = sadd.s32 %s432_s20, %s431_s21 }
  0x13   : > { %s433_s23 = sshll.u32 %s611_s22, 2  ;;  %s437_s4 = sshll.u32 %s611_s22, 3 }
  0x14   : > { %s617_s26 = scalar_lea.vmem %s722_s0, %s433_s23  ;;  %s649_s7 = scalar_lea.vmem %s725_s3, %s437_s4 }
  0x15   : > { %v443_v1 = vld [vmem:[%s617_s26] sm:$0xff]   ;;  %v474_v2 = vld [vmem:[%s617_s26 + $0x8] sm:$0xff]   ;;  %v475_v3 = vld [vmem:[%s617_s26 + $0x10] sm:$0xff]  }
  0x16   : > { %v444_v4 = vunpack.c.l.bf16 %v443_v1  ;;  %v445_v5 = vunpack.c.h.bf16 %v443_v1  ;;  %v448_v6 = vunpack.c.l.bf16 %v474_v2  ;;  %v449_v7 = vunpack.c.h.bf16 %v474_v2  ;;  %v476_v8 = vld [vmem:[%s617_s26 + $0x18] sm:$0xff]   ;;  %v477_v30 = vld [vmem:[%s617_s26 + $0x20] sm:$0xff]   ;;  %v478_v31 = vld [vmem:[%s617_s26 + $0x28] sm:$0xff]  }
  0x17   : > { %v452_v10 = vunpack.c.l.bf16 %v475_v3  ;;  %v453_v11 = vunpack.c.h.bf16 %v475_v3  ;;  %v456_v12 = vunpack.c.l.bf16 %v476_v8  ;;  %v457_v13 = vunpack.c.h.bf16 %v476_v8  ;;  %v479_v36 = vld [vmem:[%s617_s26 + $0x30] sm:$0xff]   ;;  %v480_v37 = vld [vmem:[%s617_s26 + $0x38] sm:$0xff]  }
  0x18   : > { %v254_v14 = vmul.f32 %v444_v4, %v622_v0  ;;  %v255_v15 = vmul.f32 %v445_v5, %v622_v0  ;;  %v256_v16 = vmul.f32 %v448_v6, %v622_v0  ;;  %v257_v17 = vmul.f32 %v449_v7, %v622_v0 }
  0x19   : > { %v258_v18 = vmul.f32 %v452_v10, %v622_v0  ;;  %v259_v19 = vmul.f32 %v453_v11, %v622_v0  ;;  %v260_v20 = vmul.f32 %v456_v12, %v622_v0  ;;  %v261_v21 = vmul.f32 %v457_v13, %v622_v0 }
  0x1a   : > { %v277_v22 = vadd.f32 %v631_v9, %v254_v14  ;;  %v278_v23 = vadd.f32 %v631_v9, %v255_v15  ;;  %v279_v24 = vadd.f32 %v631_v9, %v256_v16  ;;  %v280_v25 = vadd.f32 %v631_v9, %v257_v17 }
  0x1b   : > { %v281_v26 = vadd.f32 %v631_v9, %v258_v18  ;;  %v282_v27 = vadd.f32 %v631_v9, %v259_v19  ;;  %v283_v28 = vadd.f32 %v631_v9, %v260_v20  ;;  %v284_v29 = vadd.f32 %v631_v9, %v261_v21 }
  0x1c   : > { %v293_v32 = vmax.f32 %v277_v22, 0.0  ;;  %v294_v33 = vmax.f32 %v278_v23, 0.0  ;;  %v295_v34 = vmax.f32 %v279_v24, 0.0  ;;  %v296_v35 = vmax.f32 %v280_v25, 0.0 }
  0x1d   : > { %v297_v38 = vmax.f32 %v281_v26, 0.0  ;;  %v298_v39 = vmax.f32 %v282_v27, 0.0  ;;  %v299_v40 = vmax.f32 %v283_v28, 0.0  ;;  %v300_v41 = vmax.f32 %v284_v29, 0.0 }
  0x1e   : > { %310 = vst.msk [vmem:[%s649_s7] sm:$0xff] %vm309_vm0, %v293_v32  ;;  %311 = vst.msk [vmem:[%s649_s7 + $0x8] sm:$0xff] %vm309_vm0, %v294_v33  ;;  %v460_v42 = vunpack.c.l.bf16 %v477_v30  ;;  %v461_v43 = vunpack.c.h.bf16 %v477_v30  ;;  %v464_v44 = vunpack.c.l.bf16 %v478_v31  ;;  %v465_v45 = vunpack.c.h.bf16 %v478_v31 }
  0x1f   : > { %312 = vst.msk [vmem:[%s649_s7 + $0x10] sm:$0xff] %vm309_vm0, %v295_v34  ;;  %313 = vst.msk [vmem:[%s649_s7 + $0x18] sm:$0xff] %vm309_vm0, %v296_v35  ;;  %v468_v46 = vunpack.c.l.bf16 %v479_v36  ;;  %v469_v47 = vunpack.c.h.bf16 %v479_v36  ;;  %v472_v48 = vunpack.c.l.bf16 %v480_v37  ;;  %v473_v49 = vunpack.c.h.bf16 %v480_v37 }
  0x20   : > { %314 = vst.msk [vmem:[%s649_s7 + $0x20] sm:$0xff] %vm309_vm0, %v297_v38  ;;  %315 = vst.msk [vmem:[%s649_s7 + $0x28] sm:$0xff] %vm309_vm0, %v298_v39  ;;  %v262_v50 = vmul.f32 %v460_v42, %v622_v0  ;;  %v263_v51 = vmul.f32 %v461_v43, %v622_v0  ;;  %v264_v52 = vmul.f32 %v464_v44, %v622_v0 }
  0x21   : > { %316 = vst.msk [vmem:[%s649_s7 + $0x30] sm:$0xff] %vm309_vm0, %v299_v40  ;;  %317 = vst.msk [vmem:[%s649_s7 + $0x38] sm:$0xff] %vm309_vm0, %v300_v41  ;;  %v265_v53 = vmul.f32 %v465_v45, %v622_v0  ;;  %v266_v54 = vmul.f32 %v468_v46, %v622_v0  ;;  %v267_v55 = vmul.f32 %v469_v47, %v622_v0 }
  0x22   : > { %v268_v56 = vmul.f32 %v472_v48, %v622_v0  ;;  %v269_v57 = vmul.f32 %v473_v49, %v622_v0  ;;  %v285_v58 = vadd.f32 %v631_v9, %v262_v50  ;;  %v286_v59 = vadd.f32 %v631_v9, %v263_v51 }
  0x23   : > { %v287_v60 = vadd.f32 %v631_v9, %v264_v52  ;;  %v288_v61 = vadd.f32 %v631_v9, %v265_v53  ;;  %v289_v62 = vadd.f32 %v631_v9, %v266_v54  ;;  %v290_v63 = vadd.f32 %v631_v9, %v267_v55 }
  0x24   : > { %v291_v0 = vadd.f32 %v631_v9, %v268_v56  ;;  %v292_v1 = vadd.f32 %v631_v9, %v269_v57  ;;  %v301_v2 = vmax.f32 %v285_v58, 0.0  ;;  %v302_v3 = vmax.f32 %v286_v59, 0.0 }
  0x25   : > { %v303_v4 = vmax.f32 %v287_v60, 0.0  ;;  %v304_v5 = vmax.f32 %v288_v61, 0.0  ;;  %v305_v6 = vmax.f32 %v289_v62, 0.0  ;;  %v306_v7 = vmax.f32 %v290_v63, 0.0 }
  0x26   : > { %v307_v8 = vmax.f32 %v291_v0, 0.0  ;;  %v308_v10 = vmax.f32 %v292_v1, 0.0  ;;  %318 = vst.msk [vmem:[%s649_s7 + $0x40] sm:$0xff] %vm309_vm0, %v301_v2  ;;  %319 = vst.msk [vmem:[%s649_s7 + $0x48] sm:$0xff] %vm309_vm0, %v302_v3 }
  0x27   : > { %320 = vst.msk [vmem:[%s649_s7 + $0x50] sm:$0xff] %vm309_vm0, %v303_v4  ;;  %321 = vst.msk [vmem:[%s649_s7 + $0x58] sm:$0xff] %vm309_vm0, %v304_v5 }
  0x28   : > { %322 = vst.msk [vmem:[%s649_s7 + $0x60] sm:$0xff] %vm309_vm0, %v305_v6  ;;  %323 = vst.msk [vmem:[%s649_s7 + $0x68] sm:$0xff] %vm309_vm0, %v306_v7 }
  0x29   : > { %324 = vst.msk [vmem:[%s649_s7 + $0x70] sm:$0xff] %vm309_vm0, %v307_v8  ;;  %325 = vst.msk [vmem:[%s649_s7 + $0x78] sm:$0xff] %vm309_vm0, %v308_v10 }
  0x2a PF: > { %s13_s16 = sadd.s32 1, %s559_s16   ;;  %s726_s12 = smov %s551_s14 }
  0x2b   : > { %p10_p7 = scmp.ge.s32.totalorder %s13_s16, 6   ;;  %s727_s13 = smov %s555_s15 }
  0x2c   : > { %s728_s14 = smov %s731_s17  ;;  %s729_s15 = smov %s735_s18 }
  0x2d   :  { %12 = sbr.rel (!%p10_p7) target bundleno = 3 (0x3), region = 62 }

// kernel: double_conv_forward.3
= control target key start
LH: loop header
LB: loop body
LE: loop exit
PB: predicated region body
PF: predicated region fallthrough
CT: control target
= control target key end

     0   :  { %s2114_s18 = smov 0   ;;  %s2116_s19 = smov 0   ;;  %s2852_s0 = inlined_call_operand.vmem [shape: f32[2,16,16,4], index: 0, kind: input, shape index: {}]   ;;  %s2853_s1 = inlined_call_operand.vmem [shape: f32[1,4], index: 1, kind: input, shape index: {}]   ;;  %s2854_s2 = inlined_call_operand.vmem [shape: f32[1,4], index: 2, kind: input, shape index: {}]   ;;  %s2855_s3 = inlined_call_operand.vmem [shape: bf16[36,128], index: 3, kind: input, shape index: {}]   ;;  %s2856_s4 = inlined_call_operand.vmem [shape: bf16[2,16,16,8], index: 4, kind: output, shape index: {0}]   ;;  %s2857_s5 = inlined_call_operand.vmem [shape: f32[2,2,2,8], index: 5, kind: output, shape index: {1}]  }
   0x1   :  { %s2118_s20 = smov 0   ;;  %s2120_s21 = smov 0  }
   0x2   :  { %s2122_s1 = smov 0  }
   0x3 LB: > { %s25_s2 = sadd.s32 1, %s2066_s20  ;;  %s28_s22 = sadd.s32 1, %s2070_s21  ;;  %s2074_s1 = sphi %s2122_s1, %s16_s1   ;;  %s2070_s21 = sphi %s2120_s21, %s2862_s21   ;;  %s2066_s20 = sphi %s2118_s20, %s2861_s20   ;;  %s2062_s19 = sphi %s2116_s19, %s2860_s19   ;;  %s2058_s18 = sphi %s2114_s18, %s2859_s18  }
   0x4   : > { %p26_p0 = scmp.ge.s32.totalorder %s25_s2, 2  ;;  %p1551_p1 = scmp.ge.s32.totalorder %s2074_s1, 1 }
   0x5   : > { %p206_p2 = scmp.lt.s32.totalorder %s2074_s1, 5 }
   0x6   : > { %s2864_s2 = smov (%p26_p0, %s25_s2), 0  ;;  %s2866_s22 = smov (!%p26_p0, %s28_s22), %s2070_s21 }
   0x7   : > { %p207_p3 = pnand %p1551_p1, %p206_p2  ;;  %p30_p4 = scmp.ge.s32.totalorder %s2866_s22, 2 }
   0x8   : > { %p247_p5 = scmp.lt.s32.totalorder (!%p207_p3), %s2062_s19, 1  ;;  %s1595_s23 = sshll.u32 (!%p207_p3), %s2058_s18, 7  ;;  %vm337_vm0 = vcmask (!%p207_p3), 1040384   ;;  %vm473_vm1 = vcmask (!%p207_p3), 1045504   ;;  %vm432_vm2 = vcmask (!%p207_p3), 1046528   ;;  %v2033_v63 = vld [vmem:[%s2855_s3] sm:$0xff] (!%p207_p3)  }
   0x9   : > { %s2868_s22 = smov (%p30_p4, %s2866_s22), 0  ;;  %210 = sbr.rel (%p207_p3) target bundleno = 559 (0x22f), region = 36 }
   0xa   : > { %s2156_s28 = sshll.u32 (!%p207_p3), %s2058_s18, 3  ;;  %p305_p7 = scmp.eq.s32.totalorder (!%p207_p3), %s2058_s18, 0  ;;  %1623 = vmatprep.subr.bf16.mxu0 (!%p207_p3), %v2033_v63  ;;  %1645 = vmatprep.subr.bf16.mxu1 (!%p207_p3), %v2033_v63  ;;  %vm1111_vm3 = vcmask (!%p207_p3), 1041408   ;;  %vm922_vm4 = vcmask (!%p207_p3), 31744   ;;  %vm939_vm5 = vcmask (!%p207_p3), 64512   ;;  %vm956_vm6 = vcmask (!%p207_p3), 97280  }
   0xb   : > { %s1562_s30 = sadd.s32 (!%p207_p3), 4294967295, %s2156_s28  ;;  %s2076_s7 = smov (!%p207_p3), 12   ;;  %1624 = vmatpush3.bf16.msra.mxu0 (!%p207_p3), %v2033_v63  ;;  %1648 = vmatpush3.bf16.msra.mxu1 (!%p207_p3), %v2033_v63  ;;  %vm973_vm7 = vcmask (!%p207_p3), 130048   ;;  %vm990_vm8 = vcmask (!%p207_p3), 162816   ;;  %vm1007_vm9 = vcmask (!%p207_p3), 195584   ;;  %vm1024_vm10 = vcmask (!%p207_p3), 228352  }
   0xc   : > { %p2178_p6 = scmp.gt.s32.totalorder (!%p207_p3), %s1562_s30, 0  ;;  %s298_s9 = sadd.s32 (!%p207_p3), 8, %s2156_s28  ;;  %vm1041_vm11 = vcmask (!%p207_p3), 261120   ;;  %vm1086_vm12 = vcmask (!%p207_p3), 293888   ;;  %vm1276_vm13 = vcmask (!%p207_p3), 60416   ;;  %vm1402_vm14 = vcmask (!%p207_p3), 58368  }
   0xd   : > { %s2077_s10 = smov (!%p207_p3), 8   ;;  %s2078_s12 = smov (!%p207_p3), 4  }
   0xe   : > { %p299_p8 = scmp.lt.s32.totalorder (!%p207_p3), %s298_s9, 15  ;;  %s2079_s14 = smov (!%p207_p3), 16  }
   0xf   : > { %p311_p9 = scmp.eq.s32.totalorder (!%p207_p3), %s2058_s18, 1  ;;  %s2080_s17 = smov (!%p207_p3), 20  }
  0x10   : > { %s2870_s19 = smov (!%p247_p5, %s2062_s19), 1  ;;  %s2872_s30 = smov (!%p2178_p6, %s1562_s30), 0 }
  0x11   : > { %s1594_s24 = sshll.u32 %s2870_s19, 8  ;;  %s1563_s8 = sshll.u32 %s2872_s30, 4 }
  0x12   : > { %s2153_s27 = scalar_lea.vmem %s2852_s0, %s1594_s24  ;;  %s2874_s9 = smov (!%p299_p8, %s298_s9), 15 }
  0x13   : > { %s2159_s29 = scalar_lea.vmem %s2153_s27, %s1595_s23  ;;  %s295_s11 = scalar_lea.vmem %s2153_s27, %s1563_s8 }
  0x14   : > { %v277_v0 = vld [vmem:[%s2159_s29 + $0x10] sm:$0xff]  ;;  %v278_v1 = vld [vmem:[%s2159_s29 + $0x18] sm:$0xff]  ;;  %v275_v2 = vld [vmem:[%s2159_s29] sm:$0xff]  ;;  %s2022_s13 = scalar_select %p305_p7, 0, 255 }
  0x15   : > { %v344_v3 = vrot.slane %v277_v0, 7  ;;  %v345_v4 = vrot.slane %v278_v1, 7  ;;  %v276_v5 = vld [vmem:[%s2159_s29 + $0x8] sm:$0xff]  ;;  %v341_v6 = vrot.slane %v275_v2, 7  ;;  %v279_v28 = vld [vmem:[%s2159_s29 + $0x20] sm:$0xff]  ;;  %s1564_s15 = sshll.u32 %s2874_s9, 4 }
  0x16   : > { %v342_v7 = vrot.slane %v276_v5, 7  ;;  %v280_v38 = vld [vmem:[%s2159_s29 + $0x28] sm:$0xff]  ;;  %v347_v39 = vrot.slane %v279_v28, 7  ;;  %v2023_v44 = vld [vmem:[%s295_s11] sm:%s2022_s13]  ;;  %v281_v53 = vld [vmem:[%s2159_s29 + $0x30] sm:$0xff]  ;;  %s2246_s16 = scalar_lea.vmem %s2153_s27, %s1564_s15  ;;  %s2081_s30 = smov 24  }
  0x17   : > { %v2167_v8 = vsel %vm337_vm0, %v344_v3, %v345_v4  ;;  %v2170_v9 = vsel %vm337_vm0, 0.0, %v344_v3  ;;  %v2173_v10 = vsel %vm337_vm0, 0.0, %v341_v6  ;;  %v408_v11 = vsel %vm337_vm0, %v345_v4, 0.0  ;;  %v2026_v46 = vld [vmem:[%s295_s11 + $0x8] sm:%s2022_s13]  ;;  %v282_v54 = vld [vmem:[%s2159_s29 + $0x38] sm:$0xff]  ;;  %s2082_s6 = smov 28  }
  0x18   : > { %v2184_v12 = vpack.i.bf16 %v2167_v8, %v2170_v9  ;;  %v2187_v13 = vsel %vm337_vm0, %v341_v6, %v342_v7  ;;  %v407_v14 = vsel %vm337_vm0, %v342_v7, 0.0  ;;  %v479_v15 = vrot.slane %v2173_v10, 2  ;;  %s2028_s25 = scalar_select %p311_p9, 0, 255 }
  0x19   : > { %v1701_v16 = vpack.i.bf16 %v2187_v13, %v2173_v10  ;;  %v480_v17 = vrot.slane %v2187_v13, 2  ;;  %v482_v18 = vrot.slane %v407_v14, 2  ;;  %v438_v19 = vrot.slane %v2173_v10, 1  ;;  %s2083_s8 = smov 32   ;;  %p255_p10 = scmp.lt.s32.totalorder %s2156_s28, 15 }
  0x1a   : > { %1707 = vrot.lane.b32.xlu1 %v2184_v12, %s2076_s7  ;;  %v439_v20 = vrot.slane %v2187_v13, 1  ;;  %v441_v21 = vrot.slane %v407_v14, 1  ;;  %v443_v22 = vrot.slane %v2170_v9, 1  ;;  %v444_v23 = vrot.slane %v2167_v8, 1  ;;  %p265_p11 = scmp.lt.s32.totalorder %s2058_s18, 1 }
  0x1b   : > { %1702 = vrot.lane.b32.xlu0 %v1701_v16, %s2076_s7  ;;  %v481_v24 = vsel %vm473_vm1, %v479_v15, %v480_v17  ;;  %v483_v25 = vsel %vm473_vm1, %v480_v17, %v482_v18  ;;  %v446_v26 = vrot.slane %v408_v11, 1  ;;  %v484_v27 = vrot.slane %v2170_v9, 2  ;;  %v2034_v18 = vld [vmem:[%s2855_s3 + $0x8] sm:$0xff]   ;;  %s2876_s28 = smov (!%p255_p10, %s2156_s28), 15 }
  0x1c   : > { %v1716_v29 = vpack.i.bf16 %v483_v25, %v481_v24  ;;  %v440_v30 = vsel %vm432_vm2, %v438_v19, %v439_v20  ;;  %v442_v31 = vsel %vm432_vm2, %v439_v20, %v441_v21  ;;  %v445_v32 = vsel %vm432_vm2, %v443_v22, %v444_v23  ;;  %1625 = vmatprep.subr.bf16.mxu0 %v2034_v18  ;;  %s2878_s18 = smov (!%p265_p11, %s2058_s18), 1 }
  0x1d   : > { %v1711_v33 = vpack.i.bf16 %v442_v31, %v440_v30  ;;  %v447_v34 = vsel %vm432_vm2, %v444_v23, %v446_v26  ;;  %v485_v35 = vrot.slane %v2167_v8, 2  ;;  %v487_v37 = vrot.slane %v408_v11, 2  ;;  %v2288_v23 = vld [vmem:[%s2246_s16] sm:%s2028_s25]  ;;  %v2293_v26 = vld [vmem:[%s2246_s16 + $0x8] sm:%s2028_s25]  ;;  %1626 = vmatpush3.bf16.msra.mxu0 %v2034_v18  ;;  %1646 = vmatprep.subr.bf16.mxu1 %v2034_v18 }
  0x1e   : > { %1717 = vrot.lane.b32.xlu1 %v1716_v29, %s2077_s10  ;;  %v2217_v36 = vpack.i.bf16 %v447_v34, %v445_v32  ;;  %v348_v42 = vrot.slane %v280_v38, 7  ;;  %v2231_v45 = vsel %vm337_vm0, 0.0, %v347_v39  ;;  %v338_v47 = vrot.slane %v2023_v44, 7  ;;  %1649 = vmatpush3.bf16.msra.mxu1 %v2034_v18  ;;  %v286_v34 = vld [vmem:[%s2159_s29 + $0x58] sm:$0xff] }
  0x1f   : > { %1712 = vrot.lane.b32.xlu0 %v1711_v33, %s2078_s12  ;;  %v486_v40 = vsel %vm473_vm1, %v484_v27, %v485_v35  ;;  %v488_v41 = vsel %vm473_vm1, %v485_v35, %v487_v37  ;;  %v339_v48 = vrot.slane %v2026_v46, 7  ;;  %v448_v52 = vrot.slane %v2231_v45, 1 }
  0x20   : > { %v2228_v43 = vpack.i.bf16 %v488_v41, %v486_v40  ;;  %v2236_v49 = vsel %vm337_vm0, 0.0, %v338_v47  ;;  %v2239_v50 = vsel %vm337_vm0, %v347_v39, %v348_v42  ;;  %v409_v51 = vsel %vm337_vm0, %v348_v42, 0.0  ;;  %v283_v39 = vld [vmem:[%s2159_s29 + $0x40] sm:$0xff]  ;;  %v284_v40 = vld [vmem:[%s2159_s29 + $0x48] sm:$0xff] }
  0x21   : > { %v2251_v55 = vsel %vm337_vm0, %v338_v47, %v339_v48  ;;  %v406_v56 = vsel %vm337_vm0, %v339_v48, 0.0  ;;  %v474_v57 = vrot.slane %v2236_v49, 2  ;;  %v433_v58 = vrot.slane %v2236_v49, 1 }
  0x22   : > { %1727 = vrot.lane.b32.xlu1 %v2217_v36, %s2079_s14  ;;  %v475_v59 = vrot.slane %v2251_v55, 2  ;;  %v477_v60 = vrot.slane %v406_v56, 2  ;;  %v434_v61 = vrot.slane %v2251_v55, 1  ;;  %v436_v62 = vrot.slane %v406_v56, 1  ;;  %v288_v56 = vld [vmem:[%s2159_s29 + $0x68] sm:$0xff] }
  0x23   : > { %1722 = vrot.lane.b32.xlu0 %v1711_v33, %s2079_s14  ;;  %v449_v0 = vrot.slane %v2239_v50, 1  ;;  %v451_v1 = vrot.slane %v409_v51, 1  ;;  %v350_v2 = vrot.slane %v281_v53, 7  ;;  %v351_v3 = vrot.slane %v282_v54, 7  ;;  %v285_v33 = vld [vmem:[%s2159_s29 + $0x50] sm:$0xff]  ;;  %v287_v54 = vld [vmem:[%s2159_s29 + $0x60] sm:$0xff] }
  0x24   : > { %v476_v4 = vsel %vm473_vm1, %v474_v57, %v475_v59  ;;  %v478_v5 = vsel %vm473_vm1, %v475_v59, %v477_v60  ;;  %v435_v6 = vsel %vm432_vm2, %v433_v58, %v434_v61  ;;  %v437_v7 = vsel %vm432_vm2, %v434_v61, %v436_v62 }
  0x25   : > { %v1751_v11 = vpack.i.bf16 %v478_v5, %v476_v4  ;;  %v1741_v14 = vpack.i.bf16 %v437_v7, %v435_v6  ;;  %v2271_v15 = vpack.i.bf16 %v2239_v50, %v2231_v45  ;;  %v489_v16 = vrot.slane %v2231_v45, 2 }
  0x26   : > { %1737 = vrot.lane.b32.xlu1 %v2228_v43, %s2080_s17  ;;  %v490_v17 = vrot.slane %v2239_v50, 2  ;;  %v492_v19 = vrot.slane %v409_v51, 2  ;;  %v2281_v20 = vsel %vm337_vm0, %v350_v2, %v351_v3  ;;  %v2284_v21 = vsel %vm337_vm0, 0.0, %v350_v2 }
  0x27   : > { %1732 = vrot.lane.b32.xlu0 %v1716_v29, %s2080_s17  ;;  %v410_v22 = vsel %vm337_vm0, %v351_v3, 0.0  ;;  %v450_v24 = vsel %vm432_vm2, %v448_v52, %v449_v0  ;;  %v452_v25 = vsel %vm432_vm2, %v449_v0, %v451_v1  ;;  %v453_v27 = vrot.slane %v2284_v21, 1 }
  0x28   : > { %v454_v28 = vrot.slane %v2281_v20, 1  ;;  %v456_v29 = vrot.slane %v410_v22, 1  ;;  %v2301_v30 = vpack.i.bf16 %v452_v25, %v450_v24  ;;  %v491_v31 = vsel %vm473_vm1, %v489_v16, %v490_v17  ;;  %v289_v25 = vld [vmem:[%s2159_s29 + $0x70] sm:$0xff] }
  0x29   : > { %v493_v32 = vsel %vm473_vm1, %v490_v17, %v492_v19  ;;  %v495_v41 = vrot.slane %v2281_v20, 2  ;;  %v356_v42 = vrot.slane %v285_v33, 7  ;;  %v2321_v44 = vpack.i.bf16 %v2281_v20, %v2284_v21 }
  0x2a   : > { %1752 = vrot.lane.b32.xlu1 %v1751_v11, %s2077_s10  ;;  %v2307_v35 = vpack.i.bf16 %v493_v32, %v491_v31  ;;  %v455_v37 = vsel %vm432_vm2, %v453_v27, %v454_v28  ;;  %v457_v38 = vsel %vm432_vm2, %v454_v28, %v456_v29  ;;  %v497_v46 = vrot.slane %v410_v22, 2  ;;  %v290_v29 = vld [vmem:[%s2159_s29 + $0x78] sm:$0xff] }
  0x2b   : > { %1742 = vrot.lane.b32.xlu0 %v1741_v14, %s2078_s12  ;;  %v357_v47 = vrot.slane %v286_v34, 7  ;;  %v2323_v48 = vpack.i.bf16 %v457_v38, %v455_v37  ;;  %v353_v51 = vrot.slane %v283_v39, 7  ;;  %v354_v52 = vrot.slane %v284_v40, 7 }
  0x2c   : > { %v2326_v53 = vsel %vm337_vm0, 0.0, %v356_v42  ;;  %v498_v1 = vsel %vm473_vm1, %v495_v41, %v497_v46  ;;  %v359_v3 = vrot.slane %v287_v54, 7  ;;  %v360_v4 = vrot.slane %v288_v56, 7 }
  0x2d   : > { %v2331_v57 = vsel %vm337_vm0, %v356_v42, %v357_v47  ;;  %v412_v58 = vsel %vm337_vm0, %v357_v47, 0.0  ;;  %v463_v59 = vrot.slane %v2326_v53, 1  ;;  %v504_v60 = vrot.slane %v2326_v53, 2 }
  0x2e   : > { %1757 = vrot.lane.b32.xlu1 %v2271_v15, %s2081_s30  ;;  %v464_v62 = vrot.slane %v2331_v57, 1  ;;  %v466_v63 = vrot.slane %v412_v58, 1  ;;  %v505_v0 = vrot.slane %v2331_v57, 2  ;;  %v507_v2 = vrot.slane %v412_v58, 2 }
  0x2f   : > { %1747 = vrot.lane.b32.xlu0 %v2184_v12, %s2081_s30  ;;  %v494_v12 = vrot.slane %v2284_v21, 2  ;;  %v2356_v16 = vsel %vm337_vm0, %v359_v3, %v360_v4  ;;  %v2359_v17 = vsel %vm337_vm0, 0.0, %v359_v3  ;;  %v2366_v18 = vsel %vm337_vm0, 0.0, %v353_v51 }
  0x30   : > { %v465_v5 = vsel %vm432_vm2, %v463_v59, %v464_v62  ;;  %v467_v6 = vsel %vm432_vm2, %v464_v62, %v466_v63  ;;  %v506_v7 = vsel %vm473_vm1, %v504_v60, %v505_v0  ;;  %v508_v14 = vsel %vm473_vm1, %v505_v0, %v507_v2 }
  0x31   : > { %v2341_v61 = vsel %vm473_vm1, %v494_v12, %v495_v41  ;;  %v2352_v11 = vpack.i.bf16 %v467_v6, %v465_v5  ;;  %v2368_v19 = vpack.i.bf16 %v508_v14, %v506_v7  ;;  %v413_v22 = vsel %vm337_vm0, %v360_v4, 0.0 }
  0x32   : > { %1767 = vrot.lane.b32.xlu1 %v2301_v30, %s2082_s6  ;;  %v468_v24 = vrot.slane %v2359_v17, 1  ;;  %v469_v27 = vrot.slane %v2356_v16, 1  ;;  %v471_v28 = vrot.slane %v413_v22, 1  ;;  %v509_v31 = vrot.slane %v2359_v17, 2 }
  0x33   : > { %1762 = vrot.lane.b32.xlu0 %v2217_v36, %s2082_s6  ;;  %v510_v32 = vrot.slane %v2356_v16, 2  ;;  %v512_v33 = vrot.slane %v413_v22, 2  ;;  %v362_v38 = vrot.slane %v289_v25, 7  ;;  %v363_v12 = vrot.slane %v290_v29, 7 }
  0x34   : > { %v470_v34 = vsel %vm432_vm2, %v468_v24, %v469_v27  ;;  %v472_v37 = vsel %vm432_vm2, %v469_v27, %v471_v28  ;;  %v2387_v41 = vsel %vm337_vm0, %v354_v52, 0.0  ;;  %v458_v54 = vrot.slane %v2366_v18, 1 }
  0x35   : > { %v2383_v39 = vpack.i.bf16 %v472_v37, %v470_v34  ;;  %v511_v40 = vsel %vm473_vm1, %v509_v31, %v510_v32  ;;  %v513_v42 = vsel %vm473_vm1, %v510_v32, %v512_v33  ;;  %v2391_v46 = vsel %vm337_vm0, 0.0, %v362_v38 }
  0x36   : > { %1777 = vrot.lane.b32.xlu1 %v2217_v36, %s2078_s12  ;;  %v2347_v36 = vsel %vm337_vm0, %v353_v51, %v354_v52  ;;  %v2393_v47 = vpack.i.bf16 %v513_v42, %v511_v40  ;;  %v2396_v51 = vsel %vm337_vm0, %v362_v38, %v363_v12  ;;  %v516_v56 = vrot.slane %v2391_v46, 1 }
  0x37   : > { %1772 = vrot.lane.b32.xlu0 %v2228_v43, %s2083_s8  ;;  %v517_v58 = vrot.slane %v2396_v51, 1  ;;  %v521_v59 = vrot.slane %v2391_v46, 2  ;;  %v522_v60 = vrot.slane %v2396_v51, 2  ;;  %v365_v2 = vrot.slane %v2288_v23, 7 }
  0x38   : > { %v459_v6 = vrot.slane %v2347_v36, 1  ;;  %v366_v7 = vrot.slane %v2293_v26, 7  ;;  %v1826_v23 = vpack.i.bf16 %v498_v1, %v2341_v61  ;;  %v461_v25 = vrot.slane %v2387_v41, 1  ;;  %v2035_v61 = vld [vmem:[%s2855_s3 + $0x10] ss:$0 sps:$4 sm:$0x33]  }
  0x39   : > { %v518_v63 = vsel %vm432_vm2, %v516_v56, %v517_v58  ;;  %v523_v4 = vsel %vm473_vm1, %v521_v59, %v522_v60  ;;  %v2420_v14 = vsel %vm337_vm0, 0.0, %v365_v2  ;;  %v1836_v1 = vpack.i.bf16 %v2347_v36, %v2366_v18  ;;  %1651 = vmatprep.subr.msk.bf16.mxu0 %vm1111_vm3, %v2035_v61  ;;  %1652 = vmatprep.subr.msk.bf16.mxu1 %vm1111_vm3, %v2035_v61 }
  0x3a   : > { %1787 = vrot.lane.b32.xlu1 %v2301_v30, %s2078_s12  ;;  %v528_v22 = vrot.slane %v2420_v14, 1  ;;  %v533_v24 = vrot.slane %v2420_v14, 2  ;;  %v2431_v27 = vsel %vm337_vm0, %v365_v2, %v366_v7  ;;  %v415_v26 = vsel %vm337_vm0, %v366_v7, 0.0 }
  0x3b   : > { %1782 = vrot.lane.b32.xlu0 %v2307_v35, %s2083_s8  ;;  %v1996_v28 = vpack.i.bf16 %v2431_v27, %v2420_v14  ;;  %v529_v29 = vrot.slane %v2431_v27, 1  ;;  %v531_v31 = vrot.slane %v415_v26, 1  ;;  %v460_v32 = vsel %vm432_vm2, %v458_v54, %v459_v6 }
  0x3c   : > { %v536_v33 = vrot.slane %v415_v26, 2  ;;  %v462_v40 = vsel %vm432_vm2, %v459_v6, %v461_v25  ;;  %v1113_v54 = vsel %vm1111_vm3, %v2035_v61, 0  ;;  %v499_v56 = vrot.slane %v2366_v18, 2 }
  0x3d   : > { %v530_v34 = vsel %vm432_vm2, %v528_v22, %v529_v29  ;;  %v532_v37 = vsel %vm432_vm2, %v529_v29, %v531_v31  ;;  %1628 = vmatpush3.bf16.msra.mxu0 %v1113_v54  ;;  %1650 = vmatpush3.bf16.msra.mxu1 %v1113_v54 }
  0x3e   : > { %1797 = vrot.lane.b32.xlu1 %v2307_v35, %s2077_s10 }
  0x3f   : > { %1792 = vrot.lane.b32.xlu0 %v2228_v43, %s2077_s10  ;;  %v414_v43 = vsel %vm337_vm0, %v363_v12, 0.0  ;;  %v2006_v12 = vpack.i.bf16 %v532_v37, %v530_v34 }
  0x40   : > { %v519_v52 = vrot.slane %v414_v43, 1  ;;  %v524_v62 = vrot.slane %v414_v43, 2 }
  0x42   : > { %1807 = vrot.lane.b32.xlu1 %v2321_v44, %s2076_s7  ;;  %v520_v0 = vsel %vm432_vm2, %v517_v58, %v519_v52  ;;  %v525_v5 = vsel %vm473_vm1, %v522_v60, %v524_v62  ;;  %v500_v58 = vrot.slane %v2347_v36, 2  ;;  %v502_v52 = vrot.slane %v2387_v41, 2 }
  0x43   : > { %1802 = vrot.lane.b32.xlu0 %v2271_v15, %s2076_s7  ;;  %v2411_v3 = vpack.i.bf16 %v520_v0, %v518_v63  ;;  %v2416_v15 = vpack.i.bf16 %v525_v5, %v523_v4  ;;  %v1886_v41 = vpack.i.bf16 %v2331_v57, %v2326_v53  ;;  %v1966_v62 = vpack.i.bf16 %v2396_v51, %v2391_v46 }
  0x44   : > { %v501_v59 = vsel %vm473_vm1, %v499_v56, %v500_v58  ;;  %v503_v60 = vsel %vm473_vm1, %v500_v58, %v502_v52 }
  0x46   : > { %1817 = vrot.lane.b32.xlu1 %v2323_v48, %s2079_s14 }
  0x47   : > { %1812 = vrot.lane.b32.xlu0 %v2301_v30, %s2079_s14  ;;  %v534_v30 = vrot.slane %v2431_v27, 2 }
  0x49   : > { %v2450_v38 = vsel %vm473_vm1, %v533_v24, %v534_v30  ;;  %v537_v42 = vsel %vm473_vm1, %v534_v30, %v536_v33 }
  0x4a   : > { %1827 = vrot.lane.b32.xlu1 %v1826_v23, %s2080_s17  ;;  %v2016_v43 = vpack.i.bf16 %v537_v42, %v2450_v38 }
  0x4b   : > { %1822 = vrot.lane.b32.xlu0 %v2307_v35, %s2080_s17  ;;  %v1846_v35 = vpack.i.bf16 %v462_v40, %v460_v32 }
  0x4e   : > { %1837 = vrot.lane.b32.xlu1 %v1836_v1, %s2081_s30 }
  0x4f   : > { %1832 = vrot.lane.b32.xlu0 %v2321_v44, %s2081_s30  ;;  %v1861_v44 = vpack.i.bf16 %v503_v60, %v501_v59 }
  0x52   : > { %1847 = vrot.lane.b32.xlu1 %v1846_v35, %s2082_s6 }
  0x53   : > { %1842 = vrot.lane.b32.xlu0 %v2323_v48, %s2082_s6 }
  0x56   : > { %1857 = vrot.lane.b32.xlu1 %v2323_v48, %s2078_s12  ;;  %v1916_v48 = vpack.i.bf16 %v2356_v16, %v2359_v17 }
  0x57   : > { %1852 = vrot.lane.b32.xlu0 %v1826_v23, %s2083_s8 }
  0x5a   : > { %1867 = vrot.lane.b32.xlu1 %v1846_v35, %s2078_s12 }
  0x5b   : > { %1862 = vrot.lane.b32.xlu0 %v1861_v44, %s2083_s8 }
  0x5e   : > { %1877 = vrot.lane.b32.xlu1 %v1861_v44, %s2077_s10 }
  0x5f   : > { %1872 = vrot.lane.b32.xlu0 %v1826_v23, %s2077_s10 }
  0x62   : > { %1887 = vrot.lane.b32.xlu1 %v1886_v41, %s2076_s7 }
  0x63   : > { %1882 = vrot.lane.b32.xlu0 %v1836_v1, %s2076_s7 }
  0x66   : > { %1897 = vrot.lane.b32.xlu1 %v2352_v11, %s2079_s14 }
  0x67   : > { %1892 = vrot.lane.b32.xlu0 %v1846_v35, %s2079_s14 }
  0x6a   : > { %1907 = vrot.lane.b32.xlu1 %v2368_v19, %s2080_s17 }
  0x6b   : > { %1902 = vrot.lane.b32.xlu0 %v1861_v44, %s2080_s17 }
  0x6e   : > { %1917 = vrot.lane.b32.xlu1 %v1916_v48, %s2081_s30 }
  0x6f   : > { %1912 = vrot.lane.b32.xlu0 %v1886_v41, %s2081_s30 }
  0x72   : > { %1927 = vrot.lane.b32.xlu1 %v2383_v39, %s2082_s6 }
  0x73   : > { %1922 = vrot.lane.b32.xlu0 %v2352_v11, %s2082_s6 }
  0x76   : > { %1937 = vrot.lane.b32.xlu1 %v2352_v11, %s2078_s12 }
  0x77   : > { %1932 = vrot.lane.b32.xlu0 %v2368_v19, %s2083_s8 }
  0x7a   : > { %1947 = vrot.lane.b32.xlu1 %v2383_v39, %s2078_s12 }
  0x7b   : > { %1942 = vrot.lane.b32.xlu0 %v2393_v47, %s2083_s8 }
  0x7e   : > { %1957 = vrot.lane.b32.xlu1 %v2393_v47, %s2077_s10 }
  0x7f   : > { %1952 = vrot.lane.b32.xlu0 %v2368_v19, %s2077_s10  ;;  %s1556_s10 = sshll.u32 %s2870_s19, 5 }
  0x82   : > { %1967 = vrot.lane.b32.xlu1 %v1966_v62, %s2076_s7 }
  0x83   : > { %1962 = vrot.lane.b32.xlu0 %v1916_v48, %s2076_s7  ;;  %s1555_s7 = sshll.u32 %s2876_s28, 1  ;;  %s1558_s28 = sshll.u32 %s2870_s19, 1 }
  0x84   : > { %s259_s11 = sadd.s32 %s1556_s10, %s1555_s7  ;;  %s268_s16 = sadd.s32 %s1558_s28, %s2878_s18 }
  0x85   : > { %s1557_s12 = sshll.u32 %s259_s11, 2 }
  0x86   : > { %1977 = vrot.lane.b32.xlu1 %v2411_v3, %s2079_s14  ;;  %s2712_s15 = scalar_lea.vmem %s2856_s4, %s1557_s12 }
  0x87   : > { %1972 = vrot.lane.b32.xlu0 %v2383_v39, %s2079_s14 }
  0x8a   : > { %1987 = vrot.lane.b32.xlu1 %v2416_v15, %s2080_s17 }
  0x8b   : > { %1982 = vrot.lane.b32.xlu0 %v2393_v47, %s2080_s17  ;;  %s1559_s17 = sshll.u32 %s268_s16, 1 }
  0x8c   : > { %v2515_v11 = vpop.permute.xlu1 %1707  ;;  %s270_s25 = scalar_lea.vmem %s2857_s5, %s1559_s17 }
  0x8d   : > { %v1703_v19 = vpop.permute.xlu0 %1702  ;;  %v1709_v54 = vunpack.i.l.bf16 %v2515_v11 }
  0x8e   : > { %1997 = vrot.lane.b32.xlu1 %v1996_v28, %s2081_s30  ;;  %v1705_v22 = vunpack.i.h.bf16 %v1703_v19  ;;  %v1704_v24 = vunpack.i.l.bf16 %v1703_v19 }
  0x8f   : > { %1992 = vrot.lane.b32.xlu0 %v1966_v62, %s2081_s30 }
  0x90   : > { %v1718_v46 = vpop.permute.xlu1 %1717 }
  0x91   : > { %v1713_v51 = vpop.permute.xlu0 %1712  ;;  %v1720_v25 = vunpack.i.h.bf16 %v1718_v46  ;;  %v1719_v27 = vunpack.i.l.bf16 %v1718_v46 }
  0x92   : > { %2007 = vrot.lane.b32.xlu1 %v2006_v12, %s2082_s6  ;;  %v1715_v2 = vunpack.i.h.bf16 %v1713_v51  ;;  %v1714_v4 = vunpack.i.l.bf16 %v1713_v51 }
  0x93   : > { %2002 = vrot.lane.b32.xlu0 %v2411_v3, %s2082_s6 }
  0x94   : > { %v2525_v39 = vpop.permute.xlu1 %1727  ;;  %v926_v28 = vsel %vm922_vm4, %v2187_v13, %v1715_v2  ;;  %v925_v29 = vsel %vm922_vm4, %v2173_v10, %v1714_v4 }
  0x95   : > { %v1723_v47 = vpop.permute.xlu0 %1722  ;;  %v942_v37 = vsel %vm939_vm5, %v925_v29, %v1719_v27  ;;  %v1730_v44 = vunpack.i.h.bf16 %v2525_v39  ;;  %v1729_v41 = vunpack.i.l.bf16 %v2525_v39 }
  0x96   : > { %2017 = vrot.lane.b32.xlu1 %v2016_v43, %s2083_s8  ;;  %v1725_v32 = vunpack.i.h.bf16 %v1723_v47  ;;  %v1724_v33 = vunpack.i.l.bf16 %v1723_v47  ;;  %v1710_v43 = vunpack.i.h.bf16 %v2515_v11  ;;  %v959_v48 = vsel %vm956_vm6, %v942_v37, %v1709_v54 }
  0x97   : > { %2012 = vrot.lane.b32.xlu0 %v2416_v15, %s2083_s8 }
  0x98   : > { %v2530_v63 = vpop.permute.xlu1 %1737 }
  0x99   : > { %v1733_v0 = vpop.permute.xlu0 %1732  ;;  %v1740_v19 = vunpack.i.h.bf16 %v2530_v63  ;;  %v1739_v11 = vunpack.i.l.bf16 %v2530_v63 }
  0x9a   : > { %v1735_v38 = vunpack.i.h.bf16 %v1733_v0  ;;  %v1734_v40 = vunpack.i.l.bf16 %v1733_v0 }
  0x9c   : > { %v1753_v5 = vpop.permute.xlu1 %1752 }
  0x9d   : > { %v1743_v6 = vpop.permute.xlu0 %1742  ;;  %v1755_v7 = vunpack.i.h.bf16 %v1753_v5  ;;  %v1754_v14 = vunpack.i.l.bf16 %v1753_v5 }
  0x9e   : > { %v1745_v23 = vunpack.i.h.bf16 %v1743_v6  ;;  %v1744_v3 = vunpack.i.l.bf16 %v1743_v6 }
  0xa0   : > { %v924_v15 = vsel %vm922_vm4, %v2251_v55, %v1745_v23  ;;  %v923_v26 = vsel %vm922_vm4, %v2236_v49, %v1744_v3  ;;  %v1758_v61 = vpop.permute.xlu1 %1757  ;;  %v943_v49 = vsel %vm939_vm5, %v926_v28, %v1720_v25  ;;  %v976_v3 = vsel %vm973_vm7, %v959_v48, %v1729_v41 }
  0xa1   : > { %v941_v30 = vsel %vm939_vm5, %v924_v15, %v1755_v7  ;;  %v940_v31 = vsel %vm939_vm5, %v923_v26, %v1754_v14  ;;  %v1748_v1 = vpop.permute.xlu0 %1747  ;;  %v960_v62 = vsel %vm956_vm6, %v943_v49, %v1710_v43  ;;  %v1760_v46 = vunpack.i.h.bf16 %v1758_v61 }
  0xa2   : > { %v958_v34 = vsel %vm956_vm6, %v941_v30, %v1705_v22  ;;  %v957_v55 = vsel %vm956_vm6, %v940_v31, %v1704_v24  ;;  %v1750_v35 = vunpack.i.h.bf16 %v1748_v1  ;;  %v1749_v56 = vunpack.i.l.bf16 %v1748_v1 }
  0xa3   : > { %v974_v13 = vsel %vm973_vm7, %v957_v55, %v1724_v33  ;;  %v975_v10 = vsel %vm973_vm7, %v958_v34, %v1725_v32  ;;  %v1759_v51 = vunpack.i.l.bf16 %v1758_v61  ;;  %v977_v63 = vsel %vm973_vm7, %v960_v62, %v1730_v44 }
  0xa4   : > { %v1768_v12 = vpop.permute.xlu1 %1767  ;;  %v991_v58 = vsel %vm990_vm8, %v974_v13, %v1734_v40  ;;  %v992_v52 = vsel %vm990_vm8, %v975_v10, %v1735_v38  ;;  %v993_v25 = vsel %vm990_vm8, %v976_v3, %v1739_v11  ;;  %v994_v27 = vsel %vm990_vm8, %v977_v63, %v1740_v19 }
  0xa5   : > { %v1763_v42 = vpop.permute.xlu0 %1762  ;;  %v1008_v2 = vsel %vm1007_vm9, %v991_v58, %v1749_v56  ;;  %v1009_v4 = vsel %vm1007_vm9, %v992_v52, %v1750_v35  ;;  %v1770_v7 = vunpack.i.h.bf16 %v1768_v12  ;;  %v1769_v39 = vunpack.i.l.bf16 %v1768_v12 }
  0xa6   : > { %v1765_v59 = vunpack.i.h.bf16 %v1763_v42  ;;  %v1764_v60 = vunpack.i.l.bf16 %v1763_v42  ;;  %v1010_v29 = vsel %vm1007_vm9, %v993_v25, %v1759_v51  ;;  %v1011_v30 = vsel %vm1007_vm9, %v994_v27, %v1760_v46 }
  0xa7   : > { %v1027_v1 = vsel %vm1024_vm10, %v1010_v29, %v1769_v39  ;;  %v1028_v32 = vsel %vm1024_vm10, %v1011_v30, %v1770_v7 }
  0xa8   : > { %v1778_v47 = vpop.permute.xlu1 %1777  ;;  %v1025_v14 = vsel %vm1024_vm10, %v1008_v2, %v1764_v60  ;;  %v1026_v23 = vsel %vm1024_vm10, %v1009_v4, %v1765_v59 }
  0xa9   : > { %v1773_v0 = vpop.permute.xlu0 %1772  ;;  %v1780_v35 = vunpack.i.h.bf16 %v1778_v47  ;;  %v1779_v56 = vunpack.i.l.bf16 %v1778_v47 }
  0xaa   : > { %v1775_v5 = vunpack.i.h.bf16 %v1773_v0  ;;  %v1774_v6 = vunpack.i.l.bf16 %v1773_v0 }
  0xab   : > { %v928_v0 = vsel %vm922_vm4, %v2167_v8, %v1780_v35  ;;  %v927_v47 = vsel %vm922_vm4, %v2170_v9, %v1779_v56 }
  0xac   : > { %v1042_v22 = vsel %vm1041_vm11, %v1025_v14, %v1774_v6  ;;  %v1043_v24 = vsel %vm1041_vm11, %v1026_v23, %v1775_v5  ;;  %v1788_v15 = vpop.permute.xlu1 %1787 }
  0xad   : > { %v1783_v26 = vpop.permute.xlu0 %1782  ;;  %v1058_v28 = vpack.c.bf16 %v1043_v24, %v1042_v22  ;;  %v1790_v43 = vunpack.i.h.bf16 %v1788_v15  ;;  %v1789_v54 = vunpack.i.l.bf16 %v1788_v15 }
  0xae   : > { %v1785_v31 = vunpack.i.h.bf16 %v1783_v26  ;;  %v1784_v61 = vunpack.i.l.bf16 %v1783_v26 }
  0xaf   : > { %1629 = vmatprep.mubr.msk.bf16.mxu0 %vm1086_vm12, %v1058_v28  ;;  %v930_v19 = vsel %vm922_vm4, %v2239_v50, %v1790_v43  ;;  %v929_v11 = vsel %vm922_vm4, %v2231_v45, %v1789_v54 }
  0xb0   : > { %v1044_v33 = vsel %vm1041_vm11, %v1027_v1, %v1784_v61  ;;  %v1045_v34 = vsel %vm1041_vm11, %v1028_v32, %v1785_v31  ;;  %v1798_v13 = vpop.permute.xlu1 %1797 }
  0xb1   : > { %v1059_v55 = vpack.c.bf16 %v1045_v34, %v1044_v33  ;;  %v1793_v10 = vpop.permute.xlu0 %1792  ;;  %v1800_v58 = vunpack.i.h.bf16 %v1798_v13  ;;  %v1799_v52 = vunpack.i.l.bf16 %v1798_v13 }
  0xb2   : > { %v1795_v59 = vunpack.i.h.bf16 %v1793_v10  ;;  %v1794_v60 = vunpack.i.l.bf16 %v1793_v10 }
  0xb3   : > { %1630 = vmatmul.mubr.msk.bf16.vlgmr.msra.gmra.mrb[0].mxu0 %vm1086_vm12, %v1059_v55  ;;  %v946_v2 = vsel %vm939_vm5, %v929_v11, %v1799_v52  ;;  %v947_v4 = vsel %vm939_vm5, %v930_v19, %v1800_v58 }
  0xb4   : > { %v1808_v49 = vpop.permute.xlu1 %1807  ;;  %v945_v5 = vsel %vm939_vm5, %v928_v0, %v1795_v59  ;;  %v944_v6 = vsel %vm939_vm5, %v927_v47, %v1794_v60 }
  0xb5   : > { %v1803_v37 = vpop.permute.xlu0 %1802  ;;  %v1810_v44 = vunpack.i.h.bf16 %v1808_v49  ;;  %v1809_v41 = vunpack.i.l.bf16 %v1808_v49 }
  0xb6   : > { %v1805_v46 = vunpack.i.h.bf16 %v1803_v37  ;;  %v1804_v51 = vunpack.i.l.bf16 %v1803_v37 }
  0xb7   : > { %v963_v45 = vsel %vm956_vm6, %v946_v2, %v1809_v41  ;;  %v964_v39 = vsel %vm956_vm6, %v947_v4, %v1810_v44 }
  0xb8   : > { %v2576_v38 = vpop.permute.xlu1 %1817  ;;  %v961_v9 = vsel %vm956_vm6, %v944_v6, %v1804_v51  ;;  %v962_v63 = vsel %vm956_vm6, %v945_v5, %v1805_v46 }
  0xb9   : > { %v1813_v40 = vpop.permute.xlu0 %1812  ;;  %v1820_v25 = vunpack.i.h.bf16 %v2576_v38  ;;  %v1819_v27 = vunpack.i.l.bf16 %v2576_v38 }
  0xba   : > { %v1815_v50 = vunpack.i.h.bf16 %v1813_v40  ;;  %v1814_v7 = vunpack.i.l.bf16 %v1813_v40 }
  0xbb   : > { %v980_v43 = vsel %vm973_vm7, %v963_v45, %v1819_v27  ;;  %v981_v54 = vsel %vm973_vm7, %v964_v39, %v1820_v25 }
  0xbc   : > { %v2578_v12 = vpop.permute.xlu1 %1827  ;;  %v978_v28 = vsel %vm973_vm7, %v961_v9, %v1814_v7  ;;  %v979_v29 = vsel %vm973_vm7, %v962_v63, %v1815_v50 }
  0xbd   : > { %v1823_v42 = vpop.permute.xlu0 %1822  ;;  %v1830_v30 = vunpack.i.h.bf16 %v2578_v12  ;;  %v1829_v31 = vunpack.i.l.bf16 %v2578_v12 }
  0xbe   : > { %v1825_v14 = vunpack.i.h.bf16 %v1823_v42  ;;  %v1824_v23 = vunpack.i.l.bf16 %v1823_v42 }
  0xbf   : > { %v997_v58 = vsel %vm990_vm8, %v980_v43, %v1829_v31  ;;  %v998_v52 = vsel %vm990_vm8, %v981_v54, %v1830_v30 }
  0xc0   : > { %v1838_v48 = vpop.permute.xlu1 %1837  ;;  %v995_v61 = vsel %vm990_vm8, %v978_v28, %v1824_v23  ;;  %v996_v1 = vsel %vm990_vm8, %v979_v29, %v1825_v14 }
  0xc1   : > { %v1833_v62 = vpop.permute.xlu0 %1832  ;;  %v1840_v32 = vunpack.i.h.bf16 %v1838_v48  ;;  %v1839_v33 = vunpack.i.l.bf16 %v1838_v48 }
  0xc2   : > { %v1835_v22 = vunpack.i.h.bf16 %v1833_v62  ;;  %v1834_v24 = vunpack.i.l.bf16 %v1833_v62 }
  0xc3   : > { %v1014_v41 = vsel %vm1007_vm9, %v997_v58, %v1839_v33  ;;  %v1015_v48 = vsel %vm1007_vm9, %v998_v52, %v1840_v32 }
  0xc4   : > { %v1848_v8 = vpop.permute.xlu1 %1847  ;;  %v1012_v13 = vsel %vm1007_vm9, %v995_v61, %v1834_v24  ;;  %v1013_v10 = vsel %vm1007_vm9, %v996_v1, %v1835_v22 }
  0xc5   : > { %v1843_v3 = vpop.permute.xlu0 %1842  ;;  %v1850_v38 = vunpack.i.h.bf16 %v1848_v8  ;;  %v1849_v40 = vunpack.i.l.bf16 %v1848_v8 }
  0xc6   : > { %v1845_v15 = vunpack.i.h.bf16 %v1843_v3  ;;  %v1844_v26 = vunpack.i.l.bf16 %v1843_v3 }
  0xc7   : > { %v1031_v11 = vsel %vm1024_vm10, %v1014_v41, %v1849_v40  ;;  %v1032_v46 = vsel %vm1024_vm10, %v1015_v48, %v1850_v38 }
  0xc8   : > { %v1858_v34 = vpop.permute.xlu1 %1857  ;;  %v1029_v42 = vsel %vm1024_vm10, %v1012_v13, %v1844_v26  ;;  %v1030_v12 = vsel %vm1024_vm10, %v1013_v10, %v1845_v15 }
  0xc9   : > { %v1853_v55 = vpop.permute.xlu0 %1852  ;;  %v1860_v8 = vunpack.i.h.bf16 %v1858_v34  ;;  %v1859_v3 = vunpack.i.l.bf16 %v1858_v34 }
  0xca   : > { %v1855_v49 = vunpack.i.h.bf16 %v1853_v55  ;;  %v1854_v37 = vunpack.i.l.bf16 %v1853_v55 }
  0xcb   : > { %v932_v61 = vsel %vm922_vm4, %v2281_v20, %v1860_v8  ;;  %v931_v1 = vsel %vm922_vm4, %v2284_v21, %v1859_v3 }
  0xcc   : > { %v1046_v35 = vsel %vm1041_vm11, %v1029_v42, %v1854_v37  ;;  %v1047_v56 = vsel %vm1041_vm11, %v1030_v12, %v1855_v49  ;;  %v1868_v60 = vpop.permute.xlu1 %1867 }
  0xcd   : > { %v1060_v59 = vpack.c.bf16 %v1047_v56, %v1046_v35  ;;  %v1863_v44 = vpop.permute.xlu0 %1862  ;;  %v1870_v14 = vunpack.i.h.bf16 %v1868_v60  ;;  %v1869_v23 = vunpack.i.l.bf16 %v1868_v60 }
  0xce   : > { %v1865_v62 = vunpack.i.h.bf16 %v1863_v44  ;;  %v1864_v19 = vunpack.i.l.bf16 %v1863_v44 }
  0xcf   : > { %1633 = vmatprep.mubr.msk.bf16.mxu0 %vm1086_vm12, %v1060_v59  ;;  %v934_v28 = vsel %vm922_vm4, %v2347_v36, %v1870_v14  ;;  %v933_v29 = vsel %vm922_vm4, %v2366_v18, %v1869_v23 }
  0xd0   : > { %v1049_v51 = vsel %vm1041_vm11, %v1032_v46, %v1865_v62  ;;  %v1048_v0 = vsel %vm1041_vm11, %v1031_v11, %v1864_v19  ;;  %v1878_v2 = vpop.permute.xlu1 %1877 }
  0xd1   : > { %v1061_v47 = vpack.c.bf16 %v1049_v51, %v1048_v0  ;;  %v1873_v4 = vpop.permute.xlu0 %1872  ;;  %v1880_v9 = vunpack.i.h.bf16 %v1878_v2  ;;  %v1879_v63 = vunpack.i.l.bf16 %v1878_v2 }
  0xd2   : > { %v1875_v22 = vunpack.i.h.bf16 %v1873_v4  ;;  %v1874_v24 = vunpack.i.l.bf16 %v1873_v4 }
  0xd3   : > { %1634 = vmatmul.mubr.msk.bf16.gmra.mrb[4].mxu0 %vm1086_vm12, %v1061_v47  ;;  %v950_v32 = vsel %vm939_vm5, %v933_v29, %v1879_v63  ;;  %v951_v33 = vsel %vm939_vm5, %v934_v28, %v1880_v9 }
  0xd4   : > { %v1888_v5 = vpop.permute.xlu1 %1887  ;;  %v949_v34 = vsel %vm939_vm5, %v932_v61, %v1875_v22  ;;  %v948_v55 = vsel %vm939_vm5, %v931_v1, %v1874_v24 }
  0xd5   : > { %v1883_v6 = vpop.permute.xlu0 %1882  ;;  %v1890_v25 = vunpack.i.h.bf16 %v1888_v5  ;;  %v1889_v27 = vunpack.i.l.bf16 %v1888_v5 }
  0xd6   : > { %v1885_v30 = vunpack.i.h.bf16 %v1883_v6  ;;  %v1884_v31 = vunpack.i.l.bf16 %v1883_v6 }
  0xd7   : > { %v967_v18 = vsel %vm956_vm6, %v950_v32, %v1889_v27  ;;  %v968_v10 = vsel %vm956_vm6, %v951_v33, %v1890_v25 }
  0xd8   : > { %v2622_v50 = vpop.permute.xlu1 %1897  ;;  %v965_v21 = vsel %vm956_vm6, %v948_v55, %v1884_v31  ;;  %v966_v40 = vsel %vm956_vm6, %v949_v34, %v1885_v30 }
  0xd9   : > { %v1893_v7 = vpop.permute.xlu0 %1892  ;;  %v1900_v43 = vunpack.i.h.bf16 %v2622_v50  ;;  %v1899_v54 = vunpack.i.l.bf16 %v2622_v50 }
  0xda   : > { %v1895_v36 = vunpack.i.h.bf16 %v1893_v7  ;;  %v1894_v13 = vunpack.i.l.bf16 %v1893_v7 }
  0xdb   : > { %v984_v50 = vsel %vm973_vm7, %v967_v18, %v1899_v54  ;;  %v985_v7 = vsel %vm973_vm7, %v968_v10, %v1900_v43 }
  0xdc   : > { %v2624_v45 = vpop.permute.xlu1 %1907  ;;  %v982_v58 = vsel %vm973_vm7, %v965_v21, %v1894_v13  ;;  %v983_v52 = vsel %vm973_vm7, %v966_v40, %v1895_v36 }
  0xdd   : > { %v1903_v39 = vpop.permute.xlu0 %1902  ;;  %v1910_v59 = vunpack.i.h.bf16 %v2624_v45  ;;  %v1909_v60 = vunpack.i.l.bf16 %v2624_v45 }
  0xde   : > { %v1905_v49 = vunpack.i.h.bf16 %v1903_v39  ;;  %v1904_v37 = vunpack.i.l.bf16 %v1903_v39 }
  0xdf   : > { %v1001_v14 = vsel %vm990_vm8, %v984_v50, %v1909_v60  ;;  %v1002_v23 = vsel %vm990_vm8, %v985_v7, %v1910_v59 }
  0xe0   : > { %v1918_v15 = vpop.permute.xlu1 %1917  ;;  %v999_v44 = vsel %vm990_vm8, %v982_v58, %v1904_v37  ;;  %v1000_v41 = vsel %vm990_vm8, %v983_v52, %v1905_v49 }
  0xe1   : > { %v1913_v26 = vpop.permute.xlu0 %1912  ;;  %v1920_v48 = vunpack.i.h.bf16 %v1918_v15  ;;  %v1919_v62 = vunpack.i.l.bf16 %v1918_v15 }
  0xe2   : > { %v1915_v42 = vunpack.i.h.bf16 %v1913_v26  ;;  %v1914_v12 = vunpack.i.l.bf16 %v1913_v26 }
  0xe3   : > { %v1018_v63 = vsel %vm1007_vm9, %v1001_v14, %v1919_v62  ;;  %v1019_v22 = vsel %vm1007_vm9, %v1002_v23, %v1920_v48 }
  0xe4   : > { %v1928_v20 = vpop.permute.xlu1 %1927  ;;  %v1016_v46 = vsel %vm1007_vm9, %v999_v44, %v1914_v12  ;;  %v1017_v51 = vsel %vm1007_vm9, %v1000_v41, %v1915_v42 }
  0xe5   : > { %v1923_v38 = vpop.permute.xlu0 %1922  ;;  %v1930_v2 = vunpack.i.h.bf16 %v1928_v20  ;;  %v1929_v4 = vunpack.i.l.bf16 %v1928_v20 }
  0xe6   : > { %v1925_v35 = vunpack.i.h.bf16 %v1923_v38  ;;  %v1924_v56 = vunpack.i.l.bf16 %v1923_v38 }
  0xe7   : > { %v1035_v27 = vsel %vm1024_vm10, %v1018_v63, %v1929_v4  ;;  %v1036_v15 = vsel %vm1024_vm10, %v1019_v22, %v1930_v2 }
  0xe8   : > { %v1938_v19 = vpop.permute.xlu1 %1937  ;;  %v1033_v5 = vsel %vm1024_vm10, %v1016_v46, %v1924_v56  ;;  %v1034_v6 = vsel %vm1024_vm10, %v1017_v51, %v1925_v35 }
  0xe9   : > { %v1933_v11 = vpop.permute.xlu0 %1932  ;;  %v1940_v34 = vunpack.i.h.bf16 %v1938_v19  ;;  %v1939_v55 = vunpack.i.l.bf16 %v1938_v19 }
  0xea   : > { %v1935_v0 = vunpack.i.h.bf16 %v1933_v11  ;;  %v1934_v47 = vunpack.i.l.bf16 %v1933_v11 }
  0xeb   : > { %v936_v43 = vsel %vm922_vm4, %v2331_v57, %v1940_v34  ;;  %v935_v54 = vsel %vm922_vm4, %v2326_v53, %v1939_v55 }
  0xec   : > { %v1050_v45 = vsel %vm1041_vm11, %v1033_v5, %v1934_v47  ;;  %v1051_v39 = vsel %vm1041_vm11, %v1034_v6, %v1935_v0  ;;  %v1948_v8 = vpop.permute.xlu1 %1947 }
  0xed   : > { %v1943_v3 = vpop.permute.xlu0 %1942  ;;  %v1062_v9 = vpack.c.bf16 %v1051_v39, %v1050_v45  ;;  %v1950_v36 = vunpack.i.h.bf16 %v1948_v8  ;;  %v1949_v13 = vunpack.i.l.bf16 %v1948_v8 }
  0xee   : > { %v1945_v24 = vunpack.i.h.bf16 %v1943_v3  ;;  %v1944_v25 = vunpack.i.l.bf16 %v1943_v3 }
  0xef   : > { %1637 = vmatprep.mubr.msk.bf16.mxu1 %vm1086_vm12, %v1062_v9  ;;  %v938_v35 = vsel %vm922_vm4, %v2356_v16, %v1950_v36  ;;  %v937_v56 = vsel %vm922_vm4, %v2359_v17, %v1949_v13 }
  0xf0   : > { %v1053_v26 = vsel %vm1041_vm11, %v1036_v15, %v1945_v24  ;;  %v1052_v28 = vsel %vm1041_vm11, %v1035_v27, %v1944_v25  ;;  %v1958_v30 = vpop.permute.xlu1 %1957 }
  0xf1   : > { %v1063_v29 = vpack.c.bf16 %v1053_v26, %v1052_v28  ;;  %v1953_v31 = vpop.permute.xlu0 %1952  ;;  %v1960_v18 = vunpack.i.h.bf16 %v1958_v30  ;;  %v1959_v10 = vunpack.i.l.bf16 %v1958_v30 }
  0xf2   : > { %v1955_v49 = vunpack.i.h.bf16 %v1953_v31  ;;  %v1954_v37 = vunpack.i.l.bf16 %v1953_v31 }
  0xf3   : > { %1638 = vmatmul.mubr.msk.bf16.vlgmr.msra.gmra.mrb[0].mxu1 %vm1086_vm12, %v1063_v29  ;;  %v954_v58 = vsel %vm939_vm5, %v937_v56, %v1959_v10  ;;  %v955_v52 = vsel %vm939_vm5, %v938_v35, %v1960_v18 }
  0xf4   : > { %v1968_v61 = vpop.permute.xlu1 %1967  ;;  %v953_v59 = vsel %vm939_vm5, %v936_v43, %v1955_v49  ;;  %v952_v60 = vsel %vm939_vm5, %v935_v54, %v1954_v37 }
  0xf5   : > { %v1963_v1 = vpop.permute.xlu0 %1962  ;;  %v1970_v21 = vunpack.i.h.bf16 %v1968_v61  ;;  %v1969_v40 = vunpack.i.l.bf16 %v1968_v61 }
  0xf6   : > { %v1965_v42 = vunpack.i.h.bf16 %v1963_v1  ;;  %v1964_v12 = vunpack.i.l.bf16 %v1963_v1 }
  0xf7   : > { %v971_v19 = vsel %vm956_vm6, %v954_v58, %v1969_v40  ;;  %v972_v16 = vsel %vm956_vm6, %v955_v52, %v1970_v21 }
  0xf8   : > { %v1978_v32 = vpop.permute.xlu1 %1977  ;;  %v969_v17 = vsel %vm956_vm6, %v952_v60, %v1964_v12  ;;  %v970_v11 = vsel %vm956_vm6, %v953_v59, %v1965_v42 }
  0xf9   : > { %v1973_v33 = vpop.permute.xlu0 %1972  ;;  %v1980_v57 = vunpack.i.h.bf16 %v1978_v32  ;;  %v1979_v48 = vunpack.i.l.bf16 %v1978_v32 }
  0xfa   : > { %v1975_v62 = vunpack.i.h.bf16 %v1973_v33  ;;  %v1974_v53 = vunpack.i.l.bf16 %v1973_v33 }
  0xfb   : > { %v988_v45 = vsel %vm973_vm7, %v971_v19, %v1979_v48  ;;  %v989_v39 = vsel %vm973_vm7, %v972_v16, %v1980_v57 }
  0xfc   : > { %v1988_v20 = vpop.permute.xlu1 %1987  ;;  %v986_v14 = vsel %vm973_vm7, %v969_v17, %v1974_v53  ;;  %v987_v23 = vsel %vm973_vm7, %v970_v11, %v1975_v62 }
  0xfd   : > { %v1983_v38 = vpop.permute.xlu0 %1982  ;;  %v1990_v46 = vunpack.i.h.bf16 %v1988_v20  ;;  %v1989_v51 = vunpack.i.l.bf16 %v1988_v20 }
  0xfe   : > { %v1985_v0 = vunpack.i.h.bf16 %v1983_v38  ;;  %v1984_v47 = vunpack.i.l.bf16 %v1983_v38 }
  0xff   : > { %v1005_v22 = vsel %vm990_vm8, %v988_v45, %v1989_v51  ;;  %v1006_v24 = vsel %vm990_vm8, %v989_v39, %v1990_v46 }
 0x100   : > { %v1998_v44 = vpop.permute.xlu1 %1997  ;;  %v1003_v25 = vsel %vm990_vm8, %v986_v14, %v1984_v47  ;;  %v1004_v27 = vsel %vm990_vm8, %v987_v23, %v1985_v0 }
 0x101   : > { %v1993_v41 = vpop.permute.xlu0 %1992  ;;  %v2000_v2 = vunpack.i.h.bf16 %v1998_v44  ;;  %v1999_v4 = vunpack.i.l.bf16 %v1998_v44 }
 0x102   : > { %v1995_v5 = vunpack.i.h.bf16 %v1993_v41  ;;  %v1994_v6 = vunpack.i.l.bf16 %v1993_v41 }
 0x103   : > { %v1022_v15 = vsel %vm1007_vm9, %v1005_v22, %v1999_v4  ;;  %v1023_v26 = vsel %vm1007_vm9, %v1006_v24, %v2000_v2 }
 0x104   : > { %v2008_v50 = vpop.permute.xlu1 %2007  ;;  %v1020_v28 = vsel %vm1007_vm9, %v1003_v25, %v1994_v6  ;;  %v1021_v29 = vsel %vm1007_vm9, %v1004_v27, %v1995_v5 }
 0x105   : > { %v2003_v7 = vpop.permute.xlu0 %2002  ;;  %v2010_v8 = vunpack.i.h.bf16 %v2008_v50  ;;  %v2009_v3 = vunpack.i.l.bf16 %v2008_v50 }
 0x106   : > { %v2005_v9 = vunpack.i.h.bf16 %v2003_v7  ;;  %v2004_v63 = vunpack.i.l.bf16 %v2003_v7 }
 0x107   : > { %v1039_v34 = vsel %vm1024_vm10, %v1022_v15, %v2009_v3  ;;  %v1040_v55 = vsel %vm1024_vm10, %v1023_v26, %v2010_v8 }
 0x108   : > { %v2018_v30 = vpop.permute.xlu1 %2017  ;;  %v1037_v36 = vsel %vm1024_vm10, %v1020_v28, %v2004_v63  ;;  %v1038_v13 = vsel %vm1024_vm10, %v1021_v29, %v2005_v9 }
 0x109   : > { %v2013_v31 = vpop.permute.xlu0 %2012  ;;  %v2020_v61 = vunpack.i.h.bf16 %v2018_v30  ;;  %v2019_v1 = vunpack.i.l.bf16 %v2018_v30 }
 0x10a   : > { %v2015_v32 = vunpack.i.h.bf16 %v2013_v31  ;;  %v2014_v33 = vunpack.i.l.bf16 %v2013_v31 }
 0x10b   : > { %v1056_v18 = vsel %vm1041_vm11, %v1039_v34, %v2019_v1  ;;  %v1057_v10 = vsel %vm1041_vm11, %v1040_v55, %v2020_v61 }
 0x10c   : > { %v1054_v49 = vsel %vm1041_vm11, %v1037_v36, %v2014_v33  ;;  %v1055_v37 = vsel %vm1041_vm11, %v1038_v13, %v2015_v32  ;;  %v1065_v20 = vpack.c.bf16 %v1057_v10, %v1056_v18 }
 0x10d   : > { %v1064_v38 = vpack.c.bf16 %v1055_v37, %v1054_v49 }
 0x10f   : > { %1641 = vmatprep.mubr.msk.bf16.mxu1 %vm1086_vm12, %v1064_v38 }
 0x110   : > { %1642 = vmatmul.mubr.msk.bf16.gmra.mrb[4].mxu1 %vm1086_vm12, %v1065_v20 }
 0x186   : > { %v2714_v21 = vpop.f32.mrb[0].mxu0 }
 0x187   : > { %v1598_v40 = vpack.c.bf16 %v2714_v21, %v2714_v21  ;;  %v2718_v42 = vpop.f32.mrb[1].mxu0  ;;  %v1296_v60 = vsel %vm939_vm5, %v2714_v21, 0.0 }
 0x188   : > { %v1596_v12 = vpack.c.bf16 %v2718_v42, %v2718_v42  ;;  %v2722_v43 = vpop.f32.mrb[2].mxu0  ;;  %v1293_v56 = vsel %vm939_vm5, %v2718_v42, 0.0 }
 0x189   : > { %1279 = vst.msk [vmem:[%s2712_s15 + $0x8] sm:$0xf] %vm1276_vm13, %v1598_v40  ;;  %v1599_v54 = vpack.c.bf16 %v2722_v43, %v2722_v43  ;;  %v2728_v35 = vpop.f32.mrb[3].mxu0  ;;  %v1298_v41 = vsel %vm939_vm5, %v2722_v43, 0.0 }
 0x18a   : > { %1277 = vst.msk [vmem:[%s2712_s15] sm:$0xf] %vm1276_vm13, %v1596_v12  ;;  %v1597_v58 = vpack.c.bf16 %v2728_v35, %v2728_v35  ;;  %v1294_v52 = vsel %vm939_vm5, %v2728_v35, 0.0 }
 0x18b   : > { %1280 = vst.msk [vmem:[%s2712_s15 + $0xc] sm:$0xf] %vm1276_vm13, %v1599_v54  ;;  %v1295_v59 = vadd.f32 %v1294_v52, %v1293_v56 }
 0x18c   : > { %1278 = vst.msk [vmem:[%s2712_s15 + $0x4] sm:$0xf] %vm1276_vm13, %v1597_v58 }
 0x18d   : > { %v1297_v44 = vadd.f32 %v1296_v60, %v1295_v59 }
 0x18f   : > { %v1299_v57 = vadd.f32 %v1298_v41, %v1297_v44 }
 0x1a6   : > { %v2746_v48 = vpop.f32.mrb[4].mxu0 }
 0x1a7   : > { %v1602_v62 = vpack.c.bf16 %v2746_v48, %v2746_v48  ;;  %v2750_v53 = vpop.f32.mrb[5].mxu0  ;;  %v1304_v4 = vsel %vm939_vm5, %v2746_v48, 0.0 }
 0x1a8   : > { %v1600_v19 = vpack.c.bf16 %v2750_v53, %v2750_v53  ;;  %v1300_v16 = vsel %vm939_vm5, %v2750_v53, 0.0  ;;  %v2756_v17 = vpop.f32.mrb[6].mxu0 }
 0x1a9   : > { %1283 = vst.msk [vmem:[%s2712_s15 + $0x18] sm:$0xf] %vm1276_vm13, %v1602_v62  ;;  %v1301_v11 = vadd.f32 %v1300_v16, %v1299_v57  ;;  %v1603_v46 = vpack.c.bf16 %v2756_v17, %v2756_v17  ;;  %v2762_v51 = vpop.f32.mrb[7].mxu0  ;;  %v1306_v6 = vsel %vm939_vm5, %v2756_v17, 0.0 }
 0x1aa   : > { %1281 = vst.msk [vmem:[%s2712_s15 + $0x10] sm:$0xf] %vm1276_vm13, %v1600_v19  ;;  %v1601_v0 = vpack.c.bf16 %v2762_v51, %v2762_v51  ;;  %v1302_v47 = vsel %vm939_vm5, %v2762_v51, 0.0 }
 0x1ab   : > { %1284 = vst.msk [vmem:[%s2712_s15 + $0x1c] sm:$0xf] %vm1276_vm13, %v1603_v46  ;;  %v1303_v2 = vadd.f32 %v1302_v47, %v1301_v11 }
 0x1ac   : > { %1282 = vst.msk [vmem:[%s2712_s15 + $0x14] sm:$0xf] %vm1276_vm13, %v1601_v0 }
 0x1ad   : > { %v1305_v5 = vadd.f32 %v1304_v4, %v1303_v2 }
 0x1af   : > { %v1307_v50 = vadd.f32 %v1306_v6, %v1305_v5 }
 0x1c6   : > { %v1639_v7 = vpop.f32.mrb[0].mxu1 }
 0x1c7   : > { %v1606_v45 = vpack.c.bf16 %v1639_v7, %v1639_v7  ;;  %v1181_v39 = vpop.f32.mrb[1].mxu1  ;;  %v1312_v27 = vsel %vm939_vm5, %v1639_v7, 0.0 }
 0x1c8   : > { %v1604_v14 = vpack.c.bf16 %v1181_v39, %v1181_v39  ;;  %v1308_v23 = vsel %vm939_vm5, %v1181_v39, 0.0  ;;  %v1640_v8 = vpop.f32.mrb[2].mxu1 }
 0x1c9   : > { %1287 = vst.msk [vmem:[%s2712_s15 + $0x28] sm:$0xf] %vm1276_vm13, %v1606_v45  ;;  %v1309_v3 = vadd.f32 %v1308_v23, %v1307_v50  ;;  %v1607_v9 = vpack.c.bf16 %v1640_v8, %v1640_v8  ;;  %v1184_v63 = vpop.f32.mrb[3].mxu1  ;;  %v1314_v26 = vsel %vm939_vm5, %v1640_v8, 0.0 }
 0x1ca   : > { %1285 = vst.msk [vmem:[%s2712_s15 + $0x20] sm:$0xf] %vm1276_vm13, %v1604_v14  ;;  %v1605_v22 = vpack.c.bf16 %v1184_v63, %v1184_v63  ;;  %v1310_v24 = vsel %vm939_vm5, %v1184_v63, 0.0 }
 0x1cb   : > { %1288 = vst.msk [vmem:[%s2712_s15 + $0x2c] sm:$0xf] %vm1276_vm13, %v1607_v9  ;;  %v1311_v25 = vadd.f32 %v1310_v24, %v1309_v3 }
 0x1cc   : > { %1286 = vst.msk [vmem:[%s2712_s15 + $0x24] sm:$0xf] %vm1276_vm13, %v1605_v22 }
 0x1cd   : > { %v1313_v15 = vadd.f32 %v1312_v27, %v1311_v25 }
 0x1cf   : > { %v1315_v28 = vadd.f32 %v1314_v26, %v1313_v15 }
 0x1e3   : > { %v1643_v29 = vpop.f32.mrb[4].mxu1 }
 0x1e4   : > { %v1610_v30 = vpack.c.bf16 %v1643_v29, %v1643_v29  ;;  %v1197_v31 = vpop.f32.mrb[5].mxu1  ;;  %v1320_v10 = vsel %vm939_vm5, %v1643_v29, 0.0 }
 0x1e5   : > { %v1608_v61 = vpack.c.bf16 %v1197_v31, %v1197_v31  ;;  %v1316_v1 = vsel %vm939_vm5, %v1197_v31, 0.0  ;;  %v1644_v32 = vpop.f32.mrb[6].mxu1 }
 0x1e6   : > { %1291 = vst.msk [vmem:[%s2712_s15 + $0x38] sm:$0xf] %vm1276_vm13, %v1610_v30  ;;  %v1317_v33 = vadd.f32 %v1316_v1, %v1315_v28  ;;  %v1611_v34 = vpack.c.bf16 %v1644_v32, %v1644_v32  ;;  %v1200_v55 = vpop.f32.mrb[7].mxu1  ;;  %v1322_v37 = vsel %vm939_vm5, %v1644_v32, 0.0 }
 0x1e7   : > { %1289 = vst.msk [vmem:[%s2712_s15 + $0x30] sm:$0xf] %vm1276_vm13, %v1608_v61  ;;  %v1609_v36 = vpack.c.bf16 %v1200_v55, %v1200_v55  ;;  %v1318_v13 = vsel %vm939_vm5, %v1200_v55, 0.0 }
 0x1e8   : > { %1292 = vst.msk [vmem:[%s2712_s15 + $0x3c] sm:$0xf] %vm1276_vm13, %v1611_v34  ;;  %v1319_v18 = vadd.f32 %v1318_v13, %v1317_v33 }
 0x1e9   : > { %1290 = vst.msk [vmem:[%s2712_s15 + $0x34] sm:$0xf] %vm1276_vm13, %v1609_v36 }
 0x1ea   : > { %v1321_v49 = vadd.f32 %v1320_v10, %v1319_v18 }
 0x1ec   : > { %v1323_v20 = vadd.f32 %v1322_v37, %v1321_v49 }
 0x1ee   : > { %v1324_v38 = vrot.slane %v1323_v20, 4 }
 0x1f0   : > { %v1325_v40 = vadd.f32 %v1324_v38, %v1323_v20 }
 0x1f2   : > { %v1326_v12 = vrot.slane %v1325_v40, 2 }
 0x1f4   : > { %v1327_v54 = vadd.f32 %v1326_v12, %v1325_v40 }
 0x1f6   : > { %v1328_v56 = vrot.slane %v1327_v54, 1 }
 0x1f8   : > { %v2802_v58 = vadd.f32 %v1328_v56, %v1327_v54 }
 0x1fa   : > { %v1331_v52 = vmul.f32 0.0078125, %v2802_v58 }
 0x1fc   : > { %v1332_v59 = vsub.f32 %v2718_v42, %v1331_v52  ;;  %v1333_v60 = vsub.f32 %v2728_v35, %v1331_v52  ;;  %v1334_v44 = vsub.f32 %v2714_v21, %v1331_v52  ;;  %v1335_v41 = vsub.f32 %v2722_v43, %v1331_v52 }
 0x1fd   : > { %v1336_v57 = vsub.f32 %v2750_v53, %v1331_v52  ;;  %v1337_v62 = vsub.f32 %v2762_v51, %v1331_v52  ;;  %v1338_v19 = vsub.f32 %v2746_v48, %v1331_v52  ;;  %v1339_v16 = vsub.f32 %v2756_v17, %v1331_v52 }
 0x1fe   : > { %v1340_v11 = vsub.f32 %v1181_v39, %v1331_v52  ;;  %v1341_v46 = vsub.f32 %v1184_v63, %v1331_v52  ;;  %v1342_v0 = vsub.f32 %v1639_v7, %v1331_v52  ;;  %v1343_v47 = vsub.f32 %v1640_v8, %v1331_v52 }
 0x1ff   : > { %v1344_v2 = vsub.f32 %v1197_v31, %v1331_v52  ;;  %v1345_v42 = vsub.f32 %v1200_v55, %v1331_v52  ;;  %v1346_v4 = vsub.f32 %v1643_v29, %v1331_v52  ;;  %v1347_v35 = vsub.f32 %v1644_v32, %v1331_v52 }
 0x200   : > { %v1348_v5 = vmul.f32 %v1332_v59, %v1332_v59  ;;  %v1349_v21 = vmul.f32 %v1333_v60, %v1333_v60  ;;  %v1350_v6 = vmul.f32 %v1334_v44, %v1334_v44  ;;  %v1351_v43 = vmul.f32 %v1335_v41, %v1335_v41 }
 0x201   : > { %v1352_v48 = vmul.f32 %v1336_v57, %v1336_v57  ;;  %v1353_v39 = vmul.f32 %v1337_v62, %v1337_v62  ;;  %v1354_v23 = vmul.f32 %v1338_v19, %v1338_v19  ;;  %v1355_v9 = vmul.f32 %v1339_v16, %v1339_v16 }
 0x202   : > { %v1364_v53 = vsel %vm939_vm5, %v1348_v5, 0.0  ;;  %v1365_v51 = vsel %vm939_vm5, %v1349_v21, 0.0  ;;  %v1367_v17 = vsel %vm939_vm5, %v1350_v6, 0.0  ;;  %v1369_v7 = vsel %vm939_vm5, %v1351_v43, 0.0 }
 0x203   : > { %v1366_v50 = vadd.f32 %v1365_v51, %v1364_v53  ;;  %v1371_v8 = vsel %vm939_vm5, %v1352_v48, 0.0  ;;  %v1373_v63 = vsel %vm939_vm5, %v1353_v39, 0.0  ;;  %v1356_v24 = vmul.f32 %v1340_v11, %v1340_v11 }
 0x204   : > { %v1375_v25 = vsel %vm939_vm5, %v1354_v23, 0.0  ;;  %v1357_v15 = vmul.f32 %v1341_v46, %v1341_v46  ;;  %v1377_v26 = vsel %vm939_vm5, %v1355_v9, 0.0  ;;  %v1358_v29 = vmul.f32 %v1342_v0, %v1342_v0 }
 0x205   : > { %v1368_v45 = vadd.f32 %v1367_v17, %v1366_v50  ;;  %v1379_v30 = vsel %vm939_vm5, %v1356_v24, 0.0  ;;  %v1359_v61 = vmul.f32 %v1343_v47, %v1343_v47  ;;  %v1360_v33 = vmul.f32 %v1344_v2, %v1344_v2 }
 0x206   : > { %v1381_v1 = vsel %vm939_vm5, %v1357_v15, 0.0  ;;  %v1383_v34 = vsel %vm939_vm5, %v1358_v29, 0.0  ;;  %v1361_v36 = vmul.f32 %v1345_v42, %v1345_v42  ;;  %v1362_v10 = vmul.f32 %v1346_v4, %v1346_v4 }
 0x207   : > { %v1370_v14 = vadd.f32 %v1369_v7, %v1368_v45  ;;  %v1385_v13 = vsel %vm939_vm5, %v1359_v61, 0.0  ;;  %v1387_v49 = vsel %vm939_vm5, %v1360_v33, 0.0  ;;  %v1363_v20 = vmul.f32 %v1347_v35, %v1347_v35 }
 0x208   : > { %v1389_v38 = vsel %vm939_vm5, %v1361_v36, 0.0  ;;  %v1391_v12 = vsel %vm939_vm5, %v1362_v10, 0.0 }
 0x209   : > { %v1372_v3 = vadd.f32 %v1371_v8, %v1370_v14  ;;  %v1393_v56 = vsel %vm939_vm5, %v1363_v20, 0.0 }
 0x20b   : > { %v1374_v22 = vadd.f32 %v1373_v63, %v1372_v3 }
 0x20d   : > { %v1376_v27 = vadd.f32 %v1375_v25, %v1374_v22 }
 0x20f   : > { %v1378_v28 = vadd.f32 %v1377_v26, %v1376_v27 }
 0x211   : > { %v1380_v31 = vadd.f32 %v1379_v30, %v1378_v28 }
 0x213   : > { %v1382_v32 = vadd.f32 %v1381_v1, %v1380_v31 }
 0x215   : > { %v1384_v55 = vadd.f32 %v1383_v34, %v1382_v32 }
 0x217   : > { %v1386_v18 = vadd.f32 %v1385_v13, %v1384_v55 }
 0x219   : > { %v1388_v37 = vadd.f32 %v1387_v49, %v1386_v18 }
 0x21b   : > { %v1390_v40 = vadd.f32 %v1389_v38, %v1388_v37 }
 0x21d   : > { %v1392_v54 = vadd.f32 %v1391_v12, %v1390_v40 }
 0x21f   : > { %v1394_v52 = vadd.f32 %v1393_v56, %v1392_v54 }
 0x221   : > { %v1395_v59 = vrot.slane %v1394_v52, 4 }
 0x223   : > { %v1396_v60 = vadd.f32 %v1395_v59, %v1394_v52 }
 0x225   : > { %v1397_v44 = vrot.slane %v1396_v60, 2 }
 0x227   : > { %v1398_v41 = vadd.f32 %v1397_v44, %v1396_v60 }
 0x229   : > { %v1399_v57 = vrot.slane %v1398_v41, 1 }
 0x22b   : > { %v1400_v62 = vadd.f32 %v1399_v57, %v1398_v41 }
 0x22d   : > { %v1401_v19 = vsel %vm337_vm0, %v2802_v58, %v1400_v62 }
 0x22e   : > { %1403 = vst.msk [vmem:[%s270_s25] sm:$0x3] %vm1402_vm14, %v1401_v19 }
 0x22f PF: > { %s16_s1 = sadd.s32 1, %s2074_s1   ;;  %s2859_s18 = smov %s2066_s20 }
 0x230   : > { %p13_p12 = scmp.ge.s32.totalorder %s16_s1, 6   ;;  %s2860_s19 = smov %s2070_s21 }
 0x231   : > { %s2861_s20 = smov %s2864_s2  ;;  %s2862_s21 = smov %s2868_s22 }
 0x232   :  { %15 = sbr.rel (!%p13_p12) target bundleno = 3 (0x3), region = 81 }

// kernel: double_conv_forward.4
= control target key start
LH: loop header
LB: loop body
LE: loop exit
PB: predicated region body
PF: predicated region fallthrough
CT: control target
= control target key end

     0   :  { %s2284_s18 = smov 0   ;;  %s2286_s19 = smov 0   ;;  %s2992_s0 = inlined_call_operand.vmem [shape: bf16[2,16,16,8], index: 0, kind: input, shape index: {}]   ;;  %s2993_s1 = inlined_call_operand.vmem [shape: f32[1,8], index: 1, kind: input, shape index: {}]   ;;  %s2994_s2 = inlined_call_operand.vmem [shape: f32[1,8], index: 2, kind: input, shape index: {}]   ;;  %s2995_s3 = inlined_call_operand.vmem [shape: bf16[72,128], index: 3, kind: input, shape index: {}]   ;;  %s2996_s4 = inlined_call_operand.vmem [shape: bf16[2,16,16,8], index: 4, kind: output, shape index: {0}]   ;;  %s2997_s5 = inlined_call_operand.vmem [shape: f32[2,2,2,8], index: 5, kind: output, shape index: {1}]  }
   0x1   :  { %s2288_s20 = smov 0   ;;  %s2290_s21 = smov 0  }
   0x2   :  { %s2292_s22 = smov 0  }
   0x3 LB: > { %s25_s23 = sadd.s32 1, %s2236_s20  ;;  %s28_s24 = sadd.s32 1, %s2240_s21  ;;  %s2244_s22 = sphi %s2292_s22, %s16_s22   ;;  %s2240_s21 = sphi %s2290_s21, %s3001_s21   ;;  %s2236_s20 = sphi %s2288_s20, %s3000_s20   ;;  %s2232_s19 = sphi %s2286_s19, %s2999_s19   ;;  %s2228_s18 = sphi %s2284_s18, %s2998_s18  }
   0x4   : > { %p26_p0 = scmp.ge.s32.totalorder %s25_s23, 2  ;;  %p1664_p1 = scmp.ge.s32.totalorder %s2244_s22, 1 }
   0x5   : > { %p206_p2 = scmp.lt.s32.totalorder %s2244_s22, 5 }
   0x6   : > { %s3003_s23 = smov (%p26_p0, %s25_s23), 0  ;;  %s3005_s24 = smov (!%p26_p0, %s28_s24), %s2240_s21 }
   0x7   : > { %p207_p3 = pnand %p1664_p1, %p206_p2  ;;  %p30_p4 = scmp.ge.s32.totalorder %s3005_s24, 2 }
   0x8   : > { %p247_p5 = scmp.lt.s32.totalorder (!%p207_p3), %s2232_s19, 1  ;;  %s1716_s25 = sshll.u32 (!%p207_p3), %s2228_s18, 6  ;;  %v2328_v0 = vld [vmem:[%s2993_s1] ss:$0 sm:$0xff] (!%p207_p3)  ;;  %vm434_vm0 = vcmask (!%p207_p3), 1040384   ;;  %vm570_vm1 = vcmask (!%p207_p3), 1045504  }
   0x9   : > { %s3007_s24 = smov (%p30_p4, %s3005_s24), 0  ;;  %210 = sbr.rel (%p207_p3) target bundleno = 566 (0x236), region = 36 }
   0xa   : > { %s2337_s8 = sshll.u32 (!%p207_p3), %s2228_s18, 3  ;;  %v2343_v8 = vld [vmem:[%s2994_s2] ss:$0 sm:$0xff] (!%p207_p3)  ;;  %vm529_vm2 = vcmask (!%p207_p3), 1046528   ;;  %s2246_s15 = smov (!%p207_p3), 24   ;;  %vm1224_vm4 = vcmask (!%p207_p3), 1043456  }
   0xb   : > { %s1678_s9 = sadd.s32 (!%p207_p3), 4294967295, %s2337_s8  ;;  %s386_s14 = sadd.s32 (!%p207_p3), 8, %s2337_s8  ;;  %vm1019_vm6 = vcmask (!%p207_p3), 64512   ;;  %vm1036_vm7 = vcmask (!%p207_p3), 130048   ;;  %vm1053_vm8 = vcmask (!%p207_p3), 195584   ;;  %vm1070_vm9 = vcmask (!%p207_p3), 261120  }
   0xc   : > { %p371_p6 = scmp.gt.s32.totalorder (!%p207_p3), %s1678_s9, 0  ;;  %p387_p7 = scmp.lt.s32.totalorder (!%p207_p3), %s386_s14, 15  ;;  %vm1087_vm10 = vcmask (!%p207_p3), 326656   ;;  %vm1104_vm11 = vcmask (!%p207_p3), 392192   ;;  %vm1121_vm12 = vcmask (!%p207_p3), 457728   ;;  %vm1138_vm13 = vcmask (!%p207_p3), 523264  }
   0xd   : > { %p402_p8 = scmp.eq.s32.totalorder (!%p207_p3), %s2228_s18, 0  ;;  %s2247_s27 = smov (!%p207_p3), 48   ;;  %vm1199_vm14 = vcmask (!%p207_p3), 588800   ;;  %vm1389_vm15 = vcmask (!%p207_p3), 60416  }
   0xe   : > { %s2248_s6 = smov (!%p207_p3), 16   ;;  %p408_p9 = scmp.eq.s32.totalorder (!%p207_p3), %s2228_s18, 1 }
   0xf   : > { %p255_p10 = scmp.lt.s32.totalorder (!%p207_p3), %s2337_s8, 15  ;;  %p265_p11 = scmp.lt.s32.totalorder (!%p207_p3), %s2228_s18, 1 }
  0x10   : > { %s3009_s19 = smov (!%p247_p5, %s2232_s19), 1  ;;  %s3011_s9 = smov (!%p371_p6, %s1678_s9), 0 }
  0x11   : > { %s1714_s26 = sshll.u32 %s3009_s19, 7  ;;  %s1717_s12 = sshll.u32 %s3011_s9, 3 }
  0x12   : > { %s2323_s29 = scalar_lea.vmem %s2992_s0, %s1714_s26  ;;  %s3013_s14 = smov (!%p387_p7, %s386_s14), 15 }
  0x13   : > { %s2331_s7 = scalar_lea.vmem %s2323_s29, %s1716_s25  ;;  %s375_s13 = scalar_lea.vmem %s2323_s29, %s1717_s12 }
  0x14   : > { %v1775_v1 = vld [vmem:[%s2331_s7 + $0x8] sm:$0xff]   ;;  %v1736_v2 = vld [vmem:[%s2331_s7] sm:$0xff]   ;;  %v1776_v3 = vld [vmem:[%s2331_s7 + $0x10] sm:$0xff]   ;;  %s1718_s16 = sshll.u32 %s3013_s14, 3  ;;  %s2249_s9 = smov 8  }
  0x15   : > { %v1741_v4 = vunpack.c.l.bf16 %v1775_v1  ;;  %v1742_v5 = vunpack.c.h.bf16 %v1775_v1  ;;  %v1737_v6 = vunpack.c.l.bf16 %v1736_v2  ;;  %v1738_v7 = vunpack.c.h.bf16 %v1736_v2  ;;  %v2358_v29 = vld [vmem:[%s375_s13] sm:$0xff]   ;;  %s2400_s17 = scalar_lea.vmem %s2323_s29, %s1718_s16  ;;  %v1777_v1 = vld [vmem:[%s2331_s7 + $0x18] sm:$0xff]   ;;  %s2250_s12 = smov 32  }
  0x16   : > { %v1745_v9 = vunpack.c.l.bf16 %v1776_v3  ;;  %v1746_v10 = vunpack.c.h.bf16 %v1776_v3  ;;  %v1769_v36 = vunpack.c.l.bf16 %v2358_v29  ;;  %v1770_v63 = vunpack.c.h.bf16 %v2358_v29  ;;  %v2201_v2 = vld [vmem:[%s2995_s3] sm:$0xff]   ;;  %s403_s28 = scalar_select %p402_p8, 1, 0 }
  0x17   : > { %v318_v11 = vmul.f32 %v1741_v4, %v2328_v0  ;;  %v319_v12 = vmul.f32 %v1742_v5, %v2328_v0  ;;  %v316_v13 = vmul.f32 %v1737_v6, %v2328_v0  ;;  %v317_v14 = vmul.f32 %v1738_v7, %v2328_v0  ;;  %1795 = vmatprep.subr.bf16.mxu0 %v2201_v2  ;;  %s2251_s16 = smov 40   ;;  %s2252_s25 = smov 56  }
  0x18   : > { %v320_v15 = vmul.f32 %v1745_v9, %v2328_v0  ;;  %v321_v16 = vmul.f32 %v1746_v10, %v2328_v0  ;;  %1821 = vmatprep.subr.bf16.mxu1 %v2201_v2  ;;  %v1749_v10 = vunpack.c.l.bf16 %v1777_v1  ;;  %1796 = vmatpush3.bf16.msra.mxu0 %v2201_v2  ;;  %s2253_s26 = smov 64   ;;  %s3015_s8 = smov (!%p255_p10, %s2337_s8), 15 }
  0x19   : > { %v340_v17 = vadd.f32 %v2343_v8, %v318_v11  ;;  %v341_v18 = vadd.f32 %v2343_v8, %v319_v12  ;;  %v338_v19 = vadd.f32 %v2343_v8, %v316_v13  ;;  %v339_v20 = vadd.f32 %v2343_v8, %v317_v14  ;;  %1826 = vmatpush3.bf16.msra.mxu1 %v2201_v2  ;;  %s3017_s18 = smov (!%p265_p11, %s2228_s18), 1 }
  0x1a   : > { %v342_v21 = vadd.f32 %v2343_v8, %v320_v15  ;;  %v343_v22 = vadd.f32 %v2343_v8, %v321_v16  ;;  %v1750_v11 = vunpack.c.h.bf16 %v1777_v1  ;;  %v380_v13 = vmul.f32 %v1769_v36, %v2328_v0  ;;  %v2202_v15 = vld [vmem:[%s2995_s3 + $0x8] sm:$0xff]  }
  0x1b   : > { %v356_v23 = vmax.f32 %v340_v17, 0.0  ;;  %v357_v24 = vmax.f32 %v341_v18, 0.0  ;;  %v354_v25 = vmax.f32 %v338_v19, 0.0  ;;  %v355_v26 = vmax.f32 %v339_v20, 0.0  ;;  %1797 = vmatprep.subr.bf16.mxu0 %v2202_v15  ;;  %1822 = vmatprep.subr.bf16.mxu1 %v2202_v15 }
  0x1c   : > { %v358_v27 = vmax.f32 %v342_v21, 0.0  ;;  %v359_v28 = vmax.f32 %v343_v22, 0.0  ;;  %v381_v14 = vmul.f32 %v1770_v63, %v2328_v0  ;;  %v404_v19 = vstv %s403_s28  ;;  %1798 = vmatpush3.bf16.msra.mxu0 %v2202_v15 }
  0x1d   : > { %v441_v30 = vrot.slane %v356_v23, 7  ;;  %v442_v31 = vrot.slane %v357_v24, 7  ;;  %v438_v32 = vrot.slane %v354_v25, 7  ;;  %v439_v33 = vrot.slane %v355_v26, 7  ;;  %1827 = vmatpush3.bf16.msra.mxu1 %v2202_v15 }
  0x1e   : > { %v444_v34 = vrot.slane %v358_v27, 7  ;;  %v445_v35 = vrot.slane %v359_v28, 7  ;;  %v382_v22 = vadd.f32 %v2343_v8, %v380_v13  ;;  %v383_v23 = vadd.f32 %v2343_v8, %v381_v14  ;;  %v2203_v28 = vld [vmem:[%s2995_s3 + $0x10] sm:$0xff]  }
  0x1f   : > { %v2363_v37 = vsel %vm434_vm0, %v441_v30, %v442_v31  ;;  %v2366_v38 = vsel %vm434_vm0, 0.0, %v441_v30  ;;  %v2369_v39 = vsel %vm434_vm0, %v438_v32, %v439_v33  ;;  %v2372_v40 = vsel %vm434_vm0, 0.0, %v438_v32  ;;  %1799 = vmatprep.subr.bf16.mxu0 %v2203_v28  ;;  %1823 = vmatprep.subr.bf16.mxu1 %v2203_v28 }
  0x20   : > { %v1886_v41 = vpack.i.bf16 %v2363_v37, %v2366_v38  ;;  %v1881_v42 = vpack.i.bf16 %v2369_v39, %v2372_v40  ;;  %v2379_v43 = vsel %vm434_vm0, %v444_v34, %v445_v35  ;;  %v2382_v44 = vsel %vm434_vm0, 0.0, %v444_v34  ;;  %1800 = vmatpush3.bf16.msra.mxu0 %v2203_v28 }
  0x21   : > { %v2386_v45 = vpack.i.bf16 %v2379_v43, %v2382_v44  ;;  %v504_v46 = vsel %vm434_vm0, %v439_v33, 0.0  ;;  %v576_v47 = vrot.slane %v2372_v40, 2  ;;  %v577_v48 = vrot.slane %v2369_v39, 2  ;;  %1828 = vmatpush3.bf16.msra.mxu1 %v2203_v28 }
  0x22   : > { %1887 = vrot.lane.b32.xlu1 %v1886_v41, %s2246_s15  ;;  %1882 = vrot.lane.b32.xlu0 %v1881_v42, %s2246_s15  ;;  %v579_v49 = vrot.slane %v504_v46, 2  ;;  %v535_v50 = vrot.slane %v2372_v40, 1  ;;  %v536_v51 = vrot.slane %v2369_v39, 1  ;;  %v538_v52 = vrot.slane %v504_v46, 1  ;;  %v2204_v42 = vld [vmem:[%s2995_s3 + $0x18] sm:$0xff]  }
  0x23   : > { %v505_v53 = vsel %vm434_vm0, %v442_v31, 0.0  ;;  %v540_v54 = vrot.slane %v2366_v38, 1  ;;  %v541_v55 = vrot.slane %v2363_v37, 1  ;;  %v578_v56 = vsel %vm570_vm1, %v576_v47, %v577_v48  ;;  %1801 = vmatprep.subr.bf16.mxu0 %v2204_v42  ;;  %1824 = vmatprep.subr.bf16.mxu1 %v2204_v42 }
  0x24   : > { %v580_v57 = vsel %vm570_vm1, %v577_v48, %v579_v49  ;;  %v537_v58 = vsel %vm529_vm2, %v535_v50, %v536_v51  ;;  %v543_v59 = vrot.slane %v505_v53, 1  ;;  %v539_v61 = vsel %vm529_vm2, %v536_v51, %v538_v52  ;;  %1802 = vmatpush3.bf16.msra.mxu0 %v2204_v42 }
  0x25   : > { %v2405_v60 = vpack.i.bf16 %v580_v57, %v578_v56  ;;  %v542_v62 = vsel %vm529_vm2, %v540_v54, %v541_v55  ;;  %v1901_v3 = vpack.i.bf16 %v539_v61, %v537_v58  ;;  %v581_v5 = vrot.slane %v2366_v38, 2  ;;  %1829 = vmatpush3.bf16.msra.mxu1 %v2204_v42 }
  0x26   : > { %1897 = vrot.lane.b32.xlu1 %v2386_v45, %s2247_s27  ;;  %1892 = vrot.lane.b32.xlu0 %v1886_v41, %s2247_s27  ;;  %v544_v4 = vsel %vm529_vm2, %v541_v55, %v543_v59  ;;  %v582_v6 = vrot.slane %v2363_v37, 2  ;;  %v584_v7 = vrot.slane %v505_v53, 2  ;;  %v2423_v9 = vsel %vm434_vm0, %v445_v35, 0.0  ;;  %v1778_v59 = vld [vmem:[%s2331_s7 + $0x20] sm:$0xff]  }
  0x27   : > { %v2425_v12 = vpack.i.bf16 %v544_v4, %v542_v62  ;;  %v545_v17 = vrot.slane %v2382_v44, 1  ;;  %v546_v18 = vrot.slane %v2379_v43, 1  ;;  %v548_v21 = vrot.slane %v2423_v9, 1 }
  0x28   : > { %v583_v16 = vsel %vm570_vm1, %v581_v5, %v582_v6  ;;  %v585_v20 = vsel %vm570_vm1, %v582_v6, %v584_v7  ;;  %vm405_vm3 = vcmp.eq.s32.totalorder %v404_v19, 1  ;;  %v384_v24 = vmax.f32 %v382_v22, 0.0 }
  0x29   : > { %v385_v25 = vmax.f32 %v383_v23, 0.0  ;;  %v322_v26 = vmul.f32 %v1749_v10, %v2328_v0  ;;  %v323_v27 = vmul.f32 %v1750_v11, %v2328_v0  ;;  %v2450_v29 = vpack.i.bf16 %v585_v20, %v583_v16 }
  0x2a   : > { %1907 = vrot.lane.b32.xlu1 %v2405_v60, %s2248_s6  ;;  %1902 = vrot.lane.b32.xlu0 %v1901_v3, %s2249_s9  ;;  %v547_v30 = vsel %vm529_vm2, %v545_v17, %v546_v18  ;;  %v549_v31 = vsel %vm529_vm2, %v546_v18, %v548_v21  ;;  %v406_v32 = vsel %vm405_vm3, 0.0, %v384_v24  ;;  %v586_v2 = vrot.slane %v2382_v44, 2 }
  0x2b   : > { %v407_v33 = vsel %vm405_vm3, 0.0, %v385_v25  ;;  %v435_v34 = vrot.slane %v406_v32, 7  ;;  %v344_v36 = vadd.f32 %v2343_v8, %v322_v26  ;;  %v345_v41 = vadd.f32 %v2343_v8, %v323_v27 }
  0x2c   : > { %v436_v35 = vrot.slane %v407_v33, 7  ;;  %v2463_v46 = vpack.i.bf16 %v549_v31, %v547_v30  ;;  %v589_v4 = vrot.slane %v2423_v9, 2  ;;  %v1753_v5 = vunpack.c.l.bf16 %v1778_v59 }
  0x2d   : > { %v2469_v48 = vsel %vm434_vm0, 0.0, %v435_v34  ;;  %v360_v58 = vmax.f32 %v344_v36, 0.0  ;;  %v361_v63 = vmax.f32 %v345_v41, 0.0  ;;  %v1754_v6 = vunpack.c.h.bf16 %v1778_v59 }
  0x2e   : > { %1917 = vrot.lane.b32.xlu1 %v2425_v12, %s2250_s12  ;;  %1912 = vrot.lane.b32.xlu0 %v1901_v3, %s2250_s12  ;;  %v2466_v47 = vsel %vm434_vm0, %v435_v34, %v436_v35  ;;  %v503_v49 = vsel %vm434_vm0, %v436_v35, 0.0  ;;  %v571_v50 = vrot.slane %v2469_v48, 2  ;;  %v530_v53 = vrot.slane %v2469_v48, 1  ;;  %v1779_v34 = vld [vmem:[%s2331_s7 + $0x28] sm:$0xff]  }
  0x2f   : > { %v572_v51 = vrot.slane %v2466_v47, 2  ;;  %v574_v52 = vrot.slane %v503_v49, 2  ;;  %v531_v54 = vrot.slane %v2466_v47, 1  ;;  %v533_v55 = vrot.slane %v503_v49, 1 }
  0x30   : > { %v587_v3 = vrot.slane %v2379_v43, 2  ;;  %v447_v11 = vrot.slane %v360_v58, 7  ;;  %v448_v13 = vrot.slane %v361_v63, 7  ;;  %v324_v14 = vmul.f32 %v1753_v5, %v2328_v0 }
  0x31   : > { %v573_v56 = vsel %vm570_vm1, %v571_v50, %v572_v51  ;;  %v575_v57 = vsel %vm570_vm1, %v572_v51, %v574_v52  ;;  %v532_v61 = vsel %vm529_vm2, %v530_v53, %v531_v54  ;;  %v534_v62 = vsel %vm529_vm2, %v531_v54, %v533_v55 }
  0x32   : > { %1927 = vrot.lane.b32.xlu1 %v2450_v29, %s2251_s16  ;;  %1922 = vrot.lane.b32.xlu0 %v2405_v60, %s2251_s16  ;;  %v1951_v60 = vpack.i.bf16 %v575_v57, %v573_v56  ;;  %v1941_v1 = vpack.i.bf16 %v534_v62, %v532_v61  ;;  %v588_v7 = vsel %vm570_vm1, %v586_v2, %v587_v3  ;;  %v2502_v17 = vsel %vm434_vm0, 0.0, %v447_v11  ;;  %v1780_v61 = vld [vmem:[%s2331_s7 + $0x30] sm:$0xff]  }
  0x33   : > { %v590_v10 = vsel %vm570_vm1, %v587_v3, %v589_v4  ;;  %v325_v15 = vmul.f32 %v1754_v6, %v2328_v0  ;;  %v2499_v16 = vsel %vm434_vm0, %v447_v11, %v448_v13  ;;  %v507_v18 = vsel %vm434_vm0, %v448_v13, 0.0 }
  0x34   : > { %v1961_v9 = vpack.i.bf16 %v590_v10, %v588_v7  ;;  %v346_v19 = vadd.f32 %v2343_v8, %v324_v14  ;;  %v551_v21 = vrot.slane %v2499_v16, 1  ;;  %v553_v22 = vrot.slane %v507_v18, 1  ;;  %v2205_v7 = vld [vmem:[%s2995_s3 + $0x20] ss:$0 sps:$4 sm:$0xff]  }
  0x35   : > { %v347_v20 = vadd.f32 %v2343_v8, %v325_v15  ;;  %v1986_v25 = vpack.i.bf16 %v2499_v16, %v2502_v17  ;;  %v591_v26 = vrot.slane %v2502_v17, 2  ;;  %v592_v30 = vrot.slane %v2499_v16, 2  ;;  %1831 = vmatprep.subr.msk.bf16.mxu0 %vm1224_vm4, %v2205_v7  ;;  %1832 = vmatprep.subr.msk.bf16.mxu1 %vm1224_vm4, %v2205_v7 }
  0x36   : > { %1937 = vrot.lane.b32.xlu1 %v2463_v46, %s2252_s25  ;;  %1932 = vrot.lane.b32.xlu0 %v2425_v12, %s2252_s25  ;;  %v362_v23 = vmax.f32 %v346_v19, 0.0  ;;  %v554_v28 = vsel %vm529_vm2, %v551_v21, %v553_v22  ;;  %v594_v31 = vrot.slane %v507_v18, 2  ;;  %v1757_v41 = vunpack.c.l.bf16 %v1779_v34 }
  0x37   : > { %v363_v24 = vmax.f32 %v347_v20, 0.0  ;;  %v593_v35 = vsel %vm570_vm1, %v591_v26, %v592_v30  ;;  %v1758_v51 = vunpack.c.h.bf16 %v1779_v34  ;;  %v1761_v3 = vunpack.c.l.bf16 %v1780_v61 }
  0x38   : > { %v450_v32 = vrot.slane %v362_v23, 7  ;;  %v595_v36 = vsel %vm570_vm1, %v592_v30, %v594_v31  ;;  %v326_v55 = vmul.f32 %v1757_v41, %v2328_v0  ;;  %v1762_v6 = vunpack.c.h.bf16 %v1780_v61  ;;  %v1781_v41 = vld [vmem:[%s2331_s7 + $0x38] sm:$0xff]   ;;  %s409_s7 = scalar_select %p408_p9, 1, 0 }
  0x39   : > { %v451_v33 = vrot.slane %v363_v24, 7  ;;  %v327_v56 = vmul.f32 %v1758_v51, %v2328_v0  ;;  %v328_v13 = vmul.f32 %v1761_v3, %v2328_v0  ;;  %v1226_v19 = vsel %vm1224_vm4, %v2205_v7, 0 }
  0x3a   : > { %1952 = vrot.lane.b32.xlu1 %v1951_v60, %s2248_s6  ;;  %1942 = vrot.lane.b32.xlu0 %v1941_v1, %s2249_s9  ;;  %v2531_v49 = vsel %vm434_vm0, 0.0, %v450_v32  ;;  %v348_v59 = vadd.f32 %v2343_v8, %v326_v55 }
  0x3b   : > { %v2528_v42 = vsel %vm434_vm0, %v450_v32, %v451_v33  ;;  %v508_v50 = vsel %vm434_vm0, %v451_v33, 0.0  ;;  %v555_v52 = vrot.slane %v2531_v49, 1  ;;  %v349_v60 = vadd.f32 %v2343_v8, %v327_v56  ;;  %1804 = vmatpush3.bf16.msra.mxu0 %v1226_v19  ;;  %1830 = vmatpush3.bf16.msra.mxu1 %v1226_v19 }
  0x3c   : > { %v556_v53 = vrot.slane %v2528_v42, 1  ;;  %v558_v54 = vrot.slane %v508_v50, 1  ;;  %v2016_v57 = vpack.i.bf16 %v2528_v42, %v2531_v49  ;;  %v596_v63 = vrot.slane %v2531_v49, 2 }
  0x3d   : > { %v597_v1 = vrot.slane %v2528_v42, 2  ;;  %v599_v2 = vrot.slane %v508_v50, 2  ;;  %v364_v4 = vmax.f32 %v348_v59, 0.0  ;;  %v365_v5 = vmax.f32 %v349_v60, 0.0 }
  0x3e   : > { %1957 = vrot.lane.b32.xlu1 %v2425_v12, %s2249_s9  ;;  %1947 = vrot.lane.b32.xlu0 %v2450_v29, %s2253_s26  ;;  %v550_v12 = vrot.slane %v2502_v17, 1  ;;  %v557_v58 = vsel %vm529_vm2, %v555_v52, %v556_v53  ;;  %v350_v20 = vadd.f32 %v2343_v8, %v328_v13  ;;  %v1765_v52 = vunpack.c.l.bf16 %v1781_v41 }
  0x3f   : > { %v598_v10 = vsel %vm570_vm1, %v596_v63, %v597_v1  ;;  %v600_v11 = vsel %vm570_vm1, %v597_v1, %v599_v2  ;;  %v453_v14 = vrot.slane %v364_v4, 7  ;;  %v454_v15 = vrot.slane %v365_v5, 7  ;;  %v1772_v1 = vld [vmem:[%s2400_s17] sm:$0xff]   ;;  %s1669_s17 = sshll.u32 %s3009_s19, 5 }
  0x40   : > { %v552_v27 = vsel %vm529_vm2, %v550_v12, %v551_v21  ;;  %v2041_v18 = vpack.i.bf16 %v600_v11, %v598_v10  ;;  %v1766_v56 = vunpack.c.h.bf16 %v1781_v41  ;;  %v330_v60 = vmul.f32 %v1765_v52, %v2328_v0 }
  0x41   : > { %v2567_v12 = vsel %vm434_vm0, %v453_v14, %v454_v15  ;;  %v2570_v21 = vsel %vm434_vm0, 0.0, %v453_v14  ;;  %v509_v22 = vsel %vm434_vm0, %v454_v15, 0.0  ;;  %v1773_v5 = vunpack.c.l.bf16 %v1772_v1 }
  0x42   : > { %1967 = vrot.lane.b32.xlu1 %v2463_v46, %s2249_s9  ;;  %1962 = vrot.lane.b32.xlu0 %v1961_v9, %s2253_s26  ;;  %v560_v24 = vrot.slane %v2570_v21, 1  ;;  %v563_v26 = vrot.slane %v509_v22, 1  ;;  %v2066_v30 = vpack.i.bf16 %v2567_v12, %v2570_v21  ;;  %v601_v31 = vrot.slane %v2570_v21, 2 }
  0x43   : > { %v602_v34 = vrot.slane %v2567_v12, 2  ;;  %v331_v61 = vmul.f32 %v1766_v56, %v2328_v0  ;;  %v352_v3 = vadd.f32 %v2343_v8, %v330_v60 }
  0x45   : > { %v603_v51 = vsel %vm570_vm1, %v601_v31, %v602_v34  ;;  %v353_v4 = vadd.f32 %v2343_v8, %v331_v61  ;;  %v368_v14 = vmax.f32 %v352_v3, 0.0 }
  0x46   : > { %1977 = vrot.lane.b32.xlu1 %v1961_v9, %s2248_s6  ;;  %1972 = vrot.lane.b32.xlu0 %v2450_v29, %s2248_s6  ;;  %v1996_v29 = vpack.i.bf16 %v554_v28, %v552_v27  ;;  %v366_v27 = vmax.f32 %v350_v20, 0.0 }
  0x47   : > { %v369_v15 = vmax.f32 %v353_v4, 0.0 }
  0x4a   : > { %1987 = vrot.lane.b32.xlu1 %v1986_v25, %s2246_s15  ;;  %1982 = vrot.lane.b32.xlu0 %v2386_v45, %s2246_s15  ;;  %v2006_v45 = vpack.i.bf16 %v595_v36, %v593_v35  ;;  %v456_v35 = vrot.slane %v366_v27, 7 }
  0x4e   : > { %1997 = vrot.lane.b32.xlu1 %v1996_v29, %s2250_s12  ;;  %1992 = vrot.lane.b32.xlu0 %v2463_v46, %s2250_s12  ;;  %v559_v46 = vsel %vm529_vm2, %v556_v53, %v558_v54  ;;  %v2595_v54 = vsel %vm434_vm0, 0.0, %v456_v35 }
  0x4f   : > { %v2026_v62 = vpack.i.bf16 %v559_v46, %v557_v58  ;;  %v565_v58 = vrot.slane %v2595_v54, 1  ;;  %v606_v10 = vrot.slane %v2595_v54, 2 }
  0x52   : > { %2007 = vrot.lane.b32.xlu1 %v2006_v45, %s2251_s16  ;;  %2002 = vrot.lane.b32.xlu0 %v1961_v9, %s2251_s16  ;;  %v329_v9 = vmul.f32 %v1762_v6, %v2328_v0  ;;  %v1774_v6 = vunpack.c.h.bf16 %v1772_v1 }
  0x54   : > { %v351_v23 = vadd.f32 %v2343_v8, %v329_v9  ;;  %v396_v9 = vmul.f32 %v1773_v5, %v2328_v0 }
  0x56   : > { %2017 = vrot.lane.b32.xlu1 %v2016_v57, %s2247_s27  ;;  %2012 = vrot.lane.b32.xlu0 %v1986_v25, %s2247_s27  ;;  %v561_v25 = vrot.slane %v2567_v12, 1  ;;  %v367_v28 = vmax.f32 %v351_v23, 0.0  ;;  %v460_v23 = vrot.slane %v369_v15, 7 }
  0x58   : > { %v562_v32 = vsel %vm529_vm2, %v560_v24, %v561_v25  ;;  %v564_v33 = vsel %vm529_vm2, %v561_v25, %v563_v26  ;;  %v457_v36 = vrot.slane %v367_v28, 7  ;;  %v398_v24 = vadd.f32 %v2343_v8, %v396_v9 }
  0x59   : > { %v2076_v50 = vpack.i.bf16 %v564_v33, %v562_v32  ;;  %v410_v26 = vstv %s409_s7 }
  0x5a   : > { %2027 = vrot.lane.b32.xlu1 %v2026_v62, %s2252_s25  ;;  %2022 = vrot.lane.b32.xlu0 %v1996_v29, %s2252_s25  ;;  %v2592_v53 = vsel %vm434_vm0, %v456_v35, %v457_v36  ;;  %v510_v55 = vsel %vm434_vm0, %v457_v36, 0.0  ;;  %v400_v31 = vmax.f32 %v398_v24, 0.0  ;;  %vm411_vm5 = vcmp.eq.s32.totalorder %v410_v26, 1 }
  0x5b   : > { %v566_v46 = vrot.slane %v2592_v53, 1  ;;  %v568_v59 = vrot.slane %v510_v55, 1  ;;  %v2096_v63 = vpack.i.bf16 %v2592_v53, %v2595_v54  ;;  %v607_v11 = vrot.slane %v2592_v53, 2 }
  0x5c   : > { %v609_v13 = vrot.slane %v510_v55, 2 }
  0x5d   : > { %v569_v2 = vsel %vm529_vm2, %v566_v46, %v568_v59  ;;  %v608_v19 = vsel %vm570_vm1, %v606_v10, %v607_v11 }
  0x5e   : > { %2037 = vrot.lane.b32.xlu1 %v1996_v29, %s2249_s9  ;;  %2032 = vrot.lane.b32.xlu0 %v2006_v45, %s2253_s26  ;;  %v604_v29 = vrot.slane %v509_v22, 2  ;;  %v610_v20 = vsel %vm570_vm1, %v607_v11, %v609_v13  ;;  %v459_v22 = vrot.slane %v368_v14, 7 }
  0x60   : > { %v461_v27 = vsel %vm434_vm0, %v459_v22, %v460_v23  ;;  %v501_v28 = vsel %vm434_vm0, 0.0, %v459_v22 }
  0x61   : > { %v614_v33 = vrot.slane %v461_v27, 1  ;;  %v2146_v36 = vpack.i.bf16 %v461_v27, %v501_v28  ;;  %v618_v41 = vrot.slane %v501_v28, 2 }
  0x62   : > { %2047 = vrot.lane.b32.xlu1 %v2026_v62, %s2249_s9  ;;  %2042 = vrot.lane.b32.xlu0 %v2041_v18, %s2253_s26 }
  0x66   : > { %2057 = vrot.lane.b32.xlu1 %v2041_v18, %s2248_s6  ;;  %2052 = vrot.lane.b32.xlu0 %v2006_v45, %s2248_s6  ;;  %v605_v45 = vsel %vm570_vm1, %v602_v34, %v604_v29  ;;  %v412_v29 = vsel %vm411_vm5, 0.0, %v400_v31 }
  0x67   : > { %v462_v55 = vrot.slane %v412_v29, 7 }
  0x69   : > { %v502_v60 = vsel %vm434_vm0, 0.0, %v462_v55 }
  0x6a   : > { %2067 = vrot.lane.b32.xlu1 %v2066_v30, %s2246_s15  ;;  %2062 = vrot.lane.b32.xlu0 %v2016_v57, %s2246_s15  ;;  %v2086_v57 = vpack.i.bf16 %v605_v45, %v603_v51  ;;  %v619_v45 = vrot.slane %v461_v27, 2 }
  0x6e   : > { %2077 = vrot.lane.b32.xlu1 %v2076_v50, %s2250_s12  ;;  %2072 = vrot.lane.b32.xlu0 %v2026_v62, %s2250_s12  ;;  %v567_v62 = vsel %vm529_vm2, %v565_v58, %v566_v46  ;;  %v620_v46 = vsel %vm570_vm1, %v618_v41, %v619_v45 }
  0x6f   : > { %v2106_v7 = vpack.i.bf16 %v569_v2, %v567_v62  ;;  %v625_v62 = vrot.slane %v502_v60, 1 }
  0x72   : > { %2087 = vrot.lane.b32.xlu1 %v2086_v57, %s2251_s16  ;;  %2082 = vrot.lane.b32.xlu0 %v2041_v18, %s2251_s16  ;;  %v397_v18 = vmul.f32 %v1774_v6, %v2328_v0  ;;  %v2121_v0 = vpack.i.bf16 %v610_v20, %v608_v19 }
  0x74   : > { %v399_v25 = vadd.f32 %v2343_v8, %v397_v18  ;;  %v613_v8 = vrot.slane %v501_v28, 1 }
  0x76   : > { %2097 = vrot.lane.b32.xlu1 %v2096_v63, %s2247_s27  ;;  %2092 = vrot.lane.b32.xlu0 %v2066_v30, %s2247_s27  ;;  %v511_v30 = vsel %vm434_vm0, %v460_v23, 0.0  ;;  %v401_v32 = vmax.f32 %v399_v25, 0.0 }
  0x77   : > { %v616_v34 = vrot.slane %v511_v30, 1  ;;  %v621_v52 = vrot.slane %v511_v30, 2 }
  0x78   : > { %v413_v35 = vsel %vm411_vm5, 0.0, %v401_v32 }
  0x79   : > { %v617_v51 = vsel %vm529_vm2, %v614_v33, %v616_v34  ;;  %v463_v56 = vrot.slane %v413_v35, 7  ;;  %v622_v59 = vsel %vm570_vm1, %v619_v45, %v621_v52 }
  0x7a   : > { %2107 = vrot.lane.b32.xlu1 %v2106_v7, %s2252_s25  ;;  %2102 = vrot.lane.b32.xlu0 %v2076_v50, %s2252_s25  ;;  %v2166_v1 = vpack.i.bf16 %v622_v59, %v620_v46 }
  0x7b   : > { %v512_v61 = vsel %vm434_vm0, %v463_v56, 0.0 }
  0x7c   : > { %v628_v3 = vrot.slane %v512_v61, 1  ;;  %v633_v11 = vrot.slane %v512_v61, 2 }
  0x7e   : > { %2117 = vrot.lane.b32.xlu1 %v2076_v50, %s2249_s9  ;;  %2112 = vrot.lane.b32.xlu0 %v2086_v57, %s2253_s26  ;;  %v615_v50 = vsel %vm529_vm2, %v613_v8, %v614_v33 }
  0x7f   : > { %v2156_v58 = vpack.i.bf16 %v617_v51, %v615_v50 }
  0x82   : > { %2127 = vrot.lane.b32.xlu1 %v2106_v7, %s2249_s9  ;;  %2122 = vrot.lane.b32.xlu0 %v2121_v0, %s2253_s26 }
  0x86   : > { %2137 = vrot.lane.b32.xlu1 %v2121_v0, %s2248_s6  ;;  %2132 = vrot.lane.b32.xlu0 %v2086_v57, %s2248_s6  ;;  %v464_v57 = vsel %vm434_vm0, %v462_v55, %v463_v56 }
  0x87   : > { %v626_v2 = vrot.slane %v464_v57, 1  ;;  %v2176_v4 = vpack.i.bf16 %v464_v57, %v502_v60  ;;  %v631_v5 = vrot.slane %v464_v57, 2 }
  0x89   : > { %v627_v6 = vsel %vm529_vm2, %v625_v62, %v626_v2  ;;  %v629_v10 = vsel %vm529_vm2, %v626_v2, %v628_v3  ;;  %v634_v9 = vsel %vm570_vm1, %v631_v5, %v633_v11 }
  0x8a   : > { %2147 = vrot.lane.b32.xlu1 %v2146_v36, %s2246_s15  ;;  %2142 = vrot.lane.b32.xlu0 %v2096_v63, %s2246_s15  ;;  %v630_v63 = vrot.slane %v502_v60, 2  ;;  %s1668_s15 = sshll.u32 %s3015_s8, 1  ;;  %s1671_s8 = sshll.u32 %s3009_s19, 1 }
  0x8b   : > { %s268_s11 = sadd.s32 %s1671_s8, %s3017_s18 }
  0x8c   : > { %v632_v15 = vsel %vm570_vm1, %v630_v63, %v631_v5  ;;  %vm1515_vm1 = vcmask 58368  }
  0x8d   : > { %v2196_v20 = vpack.i.bf16 %v634_v9, %v632_v15 }
  0x8e   : > { %2157 = vrot.lane.b32.xlu1 %v2156_v58, %s2250_s12  ;;  %2152 = vrot.lane.b32.xlu0 %v2106_v7, %s2250_s12  ;;  %v2186_v7 = vpack.i.bf16 %v629_v10, %v627_v6  ;;  %s1672_s12 = sshll.u32 %s268_s11, 1 }
  0x92   : > { %2167 = vrot.lane.b32.xlu1 %v2166_v1, %s2251_s16  ;;  %2162 = vrot.lane.b32.xlu0 %v2121_v0, %s2251_s16  ;;  %s270_s16 = scalar_lea.vmem %s2997_s5, %s1672_s12 }
  0x94   : > { %v1888_v13 = vpop.permute.xlu1 %1887  ;;  %v2650_v14 = vpop.permute.xlu0 %1882 }
  0x95   : > { %v1889_v41 = vunpack.i.l.bf16 %v1888_v13 }
  0x96   : > { %2177 = vrot.lane.b32.xlu1 %v2176_v4, %s2247_s27  ;;  %2172 = vrot.lane.b32.xlu0 %v2146_v36, %s2247_s27  ;;  %v1890_v36 = vunpack.i.h.bf16 %v1888_v13  ;;  %s259_s27 = sadd.s32 %s1669_s17, %s1668_s15 }
  0x97   : > { %s1670_s30 = sshll.u32 %s259_s27, 2 }
  0x98   : > { %v2656_v18 = vpop.permute.xlu1 %1897  ;;  %v2658_v19 = vpop.permute.xlu0 %1892  ;;  %s2852_s10 = scalar_lea.vmem %s2996_s4, %s1670_s30 }
  0x99   : > { %v1900_v55 = vunpack.i.h.bf16 %v2656_v18  ;;  %v1899_v56 = vunpack.i.l.bf16 %v2656_v18 }
  0x9a   : > { %2187 = vrot.lane.b32.xlu1 %v2186_v7, %s2252_s25  ;;  %2182 = vrot.lane.b32.xlu0 %v2156_v58, %s2252_s25 }
  0x9c   : > { %v1908_v22 = vpop.permute.xlu1 %1907  ;;  %v1903_v23 = vpop.permute.xlu0 %1902 }
  0x9d   : > { %v1905_v0 = vunpack.i.h.bf16 %v1903_v23  ;;  %v1904_v26 = vunpack.i.l.bf16 %v1903_v23  ;;  %v1910_v27 = vunpack.i.h.bf16 %v1908_v22  ;;  %v1909_v28 = vunpack.i.l.bf16 %v1908_v22 }
  0x9e   : > { %2197 = vrot.lane.b32.xlu1 %v2196_v20, %s2253_s26  ;;  %2192 = vrot.lane.b32.xlu0 %v2166_v1, %s2253_s26 }
  0x9f   : > { %v1023_v32 = vsel %vm1019_vm6, %v2369_v39, %v1905_v0  ;;  %v1022_v8 = vsel %vm1019_vm6, %v2372_v40, %v1904_v26  ;;  %v1885_v39 = vunpack.i.h.bf16 %v2650_v14  ;;  %v1884_v40 = vunpack.i.l.bf16 %v2650_v14 }
  0xa0   : > { %v1918_v24 = vpop.permute.xlu1 %1917  ;;  %v1913_v25 = vpop.permute.xlu0 %1912  ;;  %v1040_v33 = vsel %vm1036_vm7, %v1023_v32, %v1910_v27  ;;  %v1039_v34 = vsel %vm1036_vm7, %v1022_v8, %v1909_v28 }
  0xa1   : > { %v1920_v50 = vunpack.i.h.bf16 %v1918_v24  ;;  %v1919_v51 = vunpack.i.l.bf16 %v1918_v24  ;;  %v1056_v45 = vsel %vm1053_vm8, %v1039_v34, %v1889_v41  ;;  %v1057_v52 = vsel %vm1053_vm8, %v1040_v33, %v1890_v36 }
  0xa2   : > { %v1915_v63 = vunpack.i.h.bf16 %v1913_v25  ;;  %v1914_v4 = vunpack.i.l.bf16 %v1913_v25  ;;  %v1895_v24 = vunpack.i.h.bf16 %v2658_v19 }
  0xa3   : > { %v1073_v2 = vsel %vm1070_vm9, %v1056_v45, %v1919_v51  ;;  %v1074_v3 = vsel %vm1070_vm9, %v1057_v52, %v1920_v50 }
  0xa4   : > { %v1928_v30 = vpop.permute.xlu1 %1927  ;;  %v1923_v31 = vpop.permute.xlu0 %1922 }
  0xa5   : > { %v1930_v58 = vunpack.i.h.bf16 %v1928_v30  ;;  %v1929_v46 = vunpack.i.l.bf16 %v1928_v30  ;;  %v1925_v5 = vunpack.i.h.bf16 %v1923_v31  ;;  %v1924_v6 = vunpack.i.l.bf16 %v1923_v31 }
  0xa7   : > { %v1090_v13 = vsel %vm1087_vm10, %v1073_v2, %v1929_v46  ;;  %v1091_v14 = vsel %vm1087_vm10, %v1074_v3, %v1930_v58 }
  0xa8   : > { %v1938_v29 = vpop.permute.xlu1 %1937  ;;  %v2670_v35 = vpop.permute.xlu0 %1932  ;;  %v1107_v26 = vsel %vm1104_vm11, %v1090_v13, %v1899_v56  ;;  %v1108_v27 = vsel %vm1104_vm11, %v1091_v14, %v1900_v55 }
  0xa9   : > { %v1940_v20 = vunpack.i.h.bf16 %v1938_v29  ;;  %v1939_v22 = vunpack.i.l.bf16 %v1938_v29  ;;  %v1935_v31 = vunpack.i.h.bf16 %v2670_v35  ;;  %v1934_v32 = vunpack.i.l.bf16 %v2670_v35 }
  0xab   : > { %v1124_v29 = vsel %vm1121_vm12, %v1107_v26, %v1939_v22  ;;  %v1125_v36 = vsel %vm1121_vm12, %v1108_v27, %v1940_v20 }
  0xac   : > { %v1953_v59 = vpop.permute.xlu1 %1952  ;;  %v1943_v57 = vpop.permute.xlu0 %1942 }
  0xad   : > { %v1955_v60 = vunpack.i.h.bf16 %v1953_v59  ;;  %v1954_v61 = vunpack.i.l.bf16 %v1953_v59  ;;  %v1945_v1 = vunpack.i.h.bf16 %v1943_v57  ;;  %v1944_v62 = vunpack.i.l.bf16 %v1943_v57 }
  0xaf   : > { %v1021_v10 = vsel %vm1019_vm6, %v2466_v47, %v1945_v1  ;;  %v1020_v11 = vsel %vm1019_vm6, %v2469_v48, %v1944_v62  ;;  %v1894_v48 = vunpack.i.l.bf16 %v2658_v19 }
  0xb0   : > { %v1038_v7 = vsel %vm1036_vm7, %v1021_v10, %v1955_v60  ;;  %v1037_v15 = vsel %vm1036_vm7, %v1020_v11, %v1954_v61  ;;  %v2688_v9 = vpop.permute.xlu1 %1957  ;;  %v1948_v18 = vpop.permute.xlu0 %1947 }
  0xb1   : > { %v1055_v23 = vsel %vm1053_vm8, %v1038_v7, %v1885_v39  ;;  %v1054_v47 = vsel %vm1053_vm8, %v1037_v15, %v1884_v40  ;;  %v1950_v51 = vunpack.i.h.bf16 %v1948_v18  ;;  %v1949_v39 = vunpack.i.l.bf16 %v1948_v18 }
  0xb2   : > { %v1071_v25 = vsel %vm1070_vm9, %v1054_v47, %v1914_v4  ;;  %v1072_v0 = vsel %vm1070_vm9, %v1055_v23, %v1915_v63 }
  0xb3   : > { %v1088_v28 = vsel %vm1087_vm10, %v1071_v25, %v1924_v6  ;;  %v1089_v30 = vsel %vm1087_vm10, %v1072_v0, %v1925_v5  ;;  %v1960_v5 = vunpack.i.h.bf16 %v2688_v9  ;;  %v1959_v6 = vunpack.i.l.bf16 %v2688_v9 }
  0xb4   : > { %v1968_v8 = vpop.permute.xlu1 %1967  ;;  %v1963_v33 = vpop.permute.xlu0 %1962  ;;  %v1105_v19 = vsel %vm1104_vm11, %v1088_v28, %v1894_v48  ;;  %v1106_v34 = vsel %vm1104_vm11, %v1089_v30, %v1895_v24 }
  0xb5   : > { %v1965_v41 = vunpack.i.h.bf16 %v1963_v33  ;;  %v1964_v50 = vunpack.i.l.bf16 %v1963_v33  ;;  %v1122_v40 = vsel %vm1121_vm12, %v1105_v19, %v1934_v32  ;;  %v1123_v45 = vsel %vm1121_vm12, %v1106_v34, %v1935_v31 }
  0xb6   : > { %v1139_v58 = vsel %vm1138_vm13, %v1122_v40, %v1949_v39  ;;  %v1140_v46 = vsel %vm1138_vm13, %v1123_v45, %v1950_v51  ;;  %v1970_v63 = vunpack.i.h.bf16 %v1968_v8  ;;  %v1969_v4 = vunpack.i.l.bf16 %v1968_v8 }
  0xb7   : > { %v1141_v35 = vsel %vm1138_vm13, %v1124_v29, %v1964_v50  ;;  %v1142_v52 = vsel %vm1138_vm13, %v1125_v36, %v1965_v41  ;;  %v1155_v57 = vpack.c.bf16 %v1140_v46, %v1139_v58  ;;  %v1025_v48 = vsel %vm1019_vm6, %v2363_v37, %v1960_v5 }
  0xb8   : > { %v1978_v55 = vpop.permute.xlu1 %1977  ;;  %v1973_v56 = vpop.permute.xlu0 %1972  ;;  %v1156_v59 = vpack.c.bf16 %v1142_v52, %v1141_v35  ;;  %v1027_v22 = vsel %vm1019_vm6, %v2379_v43, %v1970_v63  ;;  %v1026_v23 = vsel %vm1019_vm6, %v2382_v44, %v1969_v4  ;;  %v1024_v9 = vsel %vm1019_vm6, %v2366_v38, %v1959_v6 }
  0xb9   : > { %1805 = vmatprep.mubr.msk.bf16.mxu0 %vm1199_vm14, %v1155_v57  ;;  %v1980_v10 = vunpack.i.h.bf16 %v1978_v55  ;;  %v1979_v11 = vunpack.i.l.bf16 %v1978_v55  ;;  %v1975_v13 = vunpack.i.h.bf16 %v1973_v56  ;;  %v1974_v14 = vunpack.i.l.bf16 %v1973_v56 }
  0xba   : > { %1806 = vmatmul.mubr.msk.bf16.vlgmr.msra.gmra.mrb[0].mxu0 %vm1199_vm14, %v1156_v59 }
  0xbb   : > { %v1043_v25 = vsel %vm1036_vm7, %v1026_v23, %v1979_v11  ;;  %v1044_v0 = vsel %vm1036_vm7, %v1027_v22, %v1980_v10  ;;  %v1042_v26 = vsel %vm1036_vm7, %v1025_v48, %v1975_v13  ;;  %v1041_v27 = vsel %vm1036_vm7, %v1024_v9, %v1974_v14 }
  0xbc   : > { %v1988_v60 = vpop.permute.xlu1 %1987  ;;  %v1983_v61 = vpop.permute.xlu0 %1982 }
  0xbd   : > { %v1990_v7 = vunpack.i.h.bf16 %v1988_v60  ;;  %v1989_v15 = vunpack.i.l.bf16 %v1988_v60  ;;  %v1985_v47 = vunpack.i.h.bf16 %v1983_v61  ;;  %v1984_v24 = vunpack.i.l.bf16 %v1983_v61 }
  0xbf   : > { %v1060_v44 = vsel %vm1053_vm8, %v1043_v25, %v1989_v15  ;;  %v1061_v30 = vsel %vm1053_vm8, %v1044_v0, %v1990_v7  ;;  %v1058_v38 = vsel %vm1053_vm8, %v1041_v27, %v1984_v24  ;;  %v1059_v33 = vsel %vm1053_vm8, %v1042_v26, %v1985_v47 }
  0xc0   : > { %v2714_v1 = vpop.permute.xlu1 %1997  ;;  %v1993_v62 = vpop.permute.xlu0 %1992 }
  0xc1   : > { %v1995_v43 = vunpack.i.h.bf16 %v1993_v62  ;;  %v1994_v28 = vunpack.i.l.bf16 %v1993_v62  ;;  %v2000_v29 = vunpack.i.h.bf16 %v2714_v1  ;;  %v1999_v36 = vunpack.i.l.bf16 %v2714_v1 }
  0xc3   : > { %v1075_v51 = vsel %vm1070_vm9, %v1058_v38, %v1994_v28  ;;  %v1076_v39 = vsel %vm1070_vm9, %v1059_v33, %v1995_v43  ;;  %v1077_v63 = vsel %vm1070_vm9, %v1060_v44, %v1999_v36  ;;  %v1078_v4 = vsel %vm1070_vm9, %v1061_v30, %v2000_v29 }
  0xc4   : > { %v2716_v2 = vpop.permute.xlu1 %2007  ;;  %v2003_v3 = vpop.permute.xlu0 %2002 }
  0xc5   : > { %v2005_v31 = vunpack.i.h.bf16 %v2003_v3  ;;  %v2004_v32 = vunpack.i.l.bf16 %v2003_v3  ;;  %v2010_v40 = vunpack.i.h.bf16 %v2716_v2  ;;  %v2009_v45 = vunpack.i.l.bf16 %v2716_v2 }
  0xc7   : > { %v1092_v35 = vsel %vm1087_vm10, %v1075_v51, %v2004_v32  ;;  %v1093_v52 = vsel %vm1087_vm10, %v1076_v39, %v2005_v31  ;;  %v1094_v10 = vsel %vm1087_vm10, %v1077_v63, %v2009_v45  ;;  %v1095_v11 = vsel %vm1087_vm10, %v1078_v4, %v2010_v40 }
  0xc8   : > { %v2018_v18 = vpop.permute.xlu1 %2017  ;;  %v2013_v20 = vpop.permute.xlu0 %2012 }
  0xc9   : > { %v2015_v19 = vunpack.i.h.bf16 %v2013_v20  ;;  %v2014_v34 = vunpack.i.l.bf16 %v2013_v20  ;;  %v2020_v55 = vunpack.i.h.bf16 %v2018_v18  ;;  %v2019_v56 = vunpack.i.l.bf16 %v2018_v18 }
  0xcb   : > { %v1109_v59 = vsel %vm1104_vm11, %v1092_v35, %v2014_v34  ;;  %v1110_v57 = vsel %vm1104_vm11, %v1093_v52, %v2015_v19  ;;  %v1111_v15 = vsel %vm1104_vm11, %v1094_v10, %v2019_v56  ;;  %v1112_v18 = vsel %vm1104_vm11, %v1095_v11, %v2020_v55 }
  0xcc   : > { %v2028_v37 = vpop.permute.xlu1 %2027  ;;  %v2023_v8 = vpop.permute.xlu0 %2022 }
  0xcd   : > { %v2025_v41 = vunpack.i.h.bf16 %v2023_v8  ;;  %v2024_v50 = vunpack.i.l.bf16 %v2023_v8  ;;  %v2030_v1 = vunpack.i.h.bf16 %v2028_v37  ;;  %v2029_v62 = vunpack.i.l.bf16 %v2028_v37 }
  0xcf   : > { %v1126_v3 = vsel %vm1121_vm12, %v1109_v59, %v2024_v50  ;;  %v1127_v2 = vsel %vm1121_vm12, %v1110_v57, %v2025_v41  ;;  %v1128_v23 = vsel %vm1121_vm12, %v1111_v15, %v2029_v62  ;;  %v1129_v47 = vsel %vm1121_vm12, %v1112_v18, %v2030_v1 }
  0xd0   : > { %v2038_v58 = vpop.permute.xlu1 %2037  ;;  %v2033_v46 = vpop.permute.xlu0 %2032 }
  0xd1   : > { %v2035_v60 = vunpack.i.h.bf16 %v2033_v46  ;;  %v2034_v61 = vunpack.i.l.bf16 %v2033_v46  ;;  %v2040_v37 = vunpack.i.h.bf16 %v2038_v58  ;;  %v2039_v8 = vunpack.i.l.bf16 %v2038_v58 }
  0xd3   : > { %v1143_v5 = vsel %vm1138_vm13, %v1126_v3, %v2034_v61  ;;  %v1144_v6 = vsel %vm1138_vm13, %v1127_v2, %v2035_v60  ;;  %v1029_v35 = vsel %vm1019_vm6, %v2499_v16, %v2040_v37  ;;  %v1028_v52 = vsel %vm1019_vm6, %v2502_v17, %v2039_v8 }
  0xd4   : > { %v1157_v13 = vpack.c.bf16 %v1144_v6, %v1143_v5  ;;  %v2048_v14 = vpop.permute.xlu1 %2047  ;;  %v2043_v7 = vpop.permute.xlu0 %2042 }
  0xd5   : > { %v2045_v20 = vunpack.i.h.bf16 %v2043_v7  ;;  %v2044_v22 = vunpack.i.l.bf16 %v2043_v7  ;;  %v2050_v31 = vunpack.i.h.bf16 %v2048_v14  ;;  %v2049_v32 = vunpack.i.l.bf16 %v2048_v14 }
  0xd6   : > { %1809 = vmatprep.mubr.msk.bf16.mxu0 %vm1199_vm14, %v1157_v13 }
  0xd7   : > { %v1146_v24 = vsel %vm1138_vm13, %v1129_v47, %v2045_v20  ;;  %v1145_v48 = vsel %vm1138_vm13, %v1128_v23, %v2044_v22  ;;  %v1031_v51 = vsel %vm1019_vm6, %v2528_v42, %v2050_v31  ;;  %v1030_v39 = vsel %vm1019_vm6, %v2531_v49, %v2049_v32 }
  0xd8   : > { %v1158_v9 = vpack.c.bf16 %v1146_v24, %v1145_v48  ;;  %v2058_v25 = vpop.permute.xlu1 %2057  ;;  %v2053_v0 = vpop.permute.xlu0 %2052 }
  0xd9   : > { %v2060_v38 = vunpack.i.h.bf16 %v2058_v25  ;;  %v2059_v33 = vunpack.i.l.bf16 %v2058_v25  ;;  %v2055_v19 = vunpack.i.h.bf16 %v2053_v0  ;;  %v2054_v34 = vunpack.i.l.bf16 %v2053_v0 }
  0xda   : > { %1810 = vmatmul.mubr.msk.bf16.gmra.mrb[4].mxu0 %vm1199_vm14, %v1158_v9 }
  0xdb   : > { %v1047_v55 = vsel %vm1036_vm7, %v1030_v39, %v2059_v33  ;;  %v1048_v56 = vsel %vm1036_vm7, %v1031_v51, %v2060_v38  ;;  %v1046_v58 = vsel %vm1036_vm7, %v1029_v35, %v2055_v19  ;;  %v1045_v46 = vsel %vm1036_vm7, %v1028_v52, %v2054_v34 }
  0xdc   : > { %v2068_v26 = vpop.permute.xlu1 %2067  ;;  %v2063_v27 = vpop.permute.xlu0 %2062 }
  0xdd   : > { %v2070_v29 = vunpack.i.h.bf16 %v2068_v26  ;;  %v2069_v36 = vunpack.i.l.bf16 %v2068_v26  ;;  %v2065_v40 = vunpack.i.h.bf16 %v2063_v27  ;;  %v2064_v45 = vunpack.i.l.bf16 %v2063_v27 }
  0xdf   : > { %v1064_v49 = vsel %vm1053_vm8, %v1047_v55, %v2069_v36  ;;  %v1065_v57 = vsel %vm1053_vm8, %v1048_v56, %v2070_v29  ;;  %v1062_v17 = vsel %vm1053_vm8, %v1045_v46, %v2064_v45  ;;  %v1063_v62 = vsel %vm1053_vm8, %v1046_v58, %v2065_v40 }
  0xe0   : > { %v2762_v43 = vpop.permute.xlu1 %2077  ;;  %v2073_v28 = vpop.permute.xlu0 %2072 }
  0xe1   : > { %v2075_v42 = vunpack.i.h.bf16 %v2073_v28  ;;  %v2074_v59 = vunpack.i.l.bf16 %v2073_v28  ;;  %v2080_v63 = vunpack.i.h.bf16 %v2762_v43  ;;  %v2079_v4 = vunpack.i.l.bf16 %v2762_v43 }
  0xe3   : > { %v1079_v10 = vsel %vm1070_vm9, %v1062_v17, %v2074_v59  ;;  %v1080_v11 = vsel %vm1070_vm9, %v1063_v62, %v2075_v42  ;;  %v1081_v43 = vsel %vm1070_vm9, %v1064_v49, %v2079_v4  ;;  %v1082_v28 = vsel %vm1070_vm9, %v1065_v57, %v2080_v63 }
  0xe4   : > { %v2764_v44 = vpop.permute.xlu1 %2087  ;;  %v2083_v30 = vpop.permute.xlu0 %2082 }
  0xe5   : > { %v2085_v60 = vunpack.i.h.bf16 %v2083_v30  ;;  %v2084_v61 = vunpack.i.l.bf16 %v2083_v30  ;;  %v2090_v13 = vunpack.i.h.bf16 %v2764_v44  ;;  %v2089_v14 = vunpack.i.l.bf16 %v2764_v44 }
  0xe7   : > { %v1096_v7 = vsel %vm1087_vm10, %v1079_v10, %v2084_v61  ;;  %v1097_v15 = vsel %vm1087_vm10, %v1080_v11, %v2085_v60  ;;  %v1098_v31 = vsel %vm1087_vm10, %v1081_v43, %v2089_v14  ;;  %v1099_v32 = vsel %vm1087_vm10, %v1082_v28, %v2090_v13 }
  0xe8   : > { %v2098_v41 = vpop.permute.xlu1 %2097  ;;  %v2093_v50 = vpop.permute.xlu0 %2092 }
  0xe9   : > { %v2095_v3 = vunpack.i.h.bf16 %v2093_v50  ;;  %v2094_v2 = vunpack.i.l.bf16 %v2093_v50  ;;  %v2100_v18 = vunpack.i.h.bf16 %v2098_v41  ;;  %v2099_v20 = vunpack.i.l.bf16 %v2098_v41 }
  0xeb   : > { %v1113_v47 = vsel %vm1104_vm11, %v1096_v7, %v2094_v2  ;;  %v1114_v24 = vsel %vm1104_vm11, %v1097_v15, %v2095_v3  ;;  %v1115_v33 = vsel %vm1104_vm11, %v1098_v31, %v2099_v20  ;;  %v1116_v19 = vsel %vm1104_vm11, %v1099_v32, %v2100_v18 }
  0xec   : > { %v2108_v16 = vpop.permute.xlu1 %2107  ;;  %v2103_v1 = vpop.permute.xlu0 %2102 }
  0xed   : > { %v2105_v5 = vunpack.i.h.bf16 %v2103_v1  ;;  %v2104_v6 = vunpack.i.l.bf16 %v2103_v1  ;;  %v2110_v25 = vunpack.i.h.bf16 %v2108_v16  ;;  %v2109_v0 = vunpack.i.l.bf16 %v2108_v16 }
  0xef   : > { %v1130_v26 = vsel %vm1121_vm12, %v1113_v47, %v2104_v6  ;;  %v1131_v27 = vsel %vm1121_vm12, %v1114_v24, %v2105_v5  ;;  %v1132_v36 = vsel %vm1121_vm12, %v1115_v33, %v2109_v0  ;;  %v1133_v41 = vsel %vm1121_vm12, %v1116_v19, %v2110_v25 }
  0xf0   : > { %v2118_v22 = vpop.permute.xlu1 %2117  ;;  %v2113_v23 = vpop.permute.xlu0 %2112 }
  0xf1   : > { %v2115_v48 = vunpack.i.h.bf16 %v2113_v23  ;;  %v2114_v9 = vunpack.i.l.bf16 %v2113_v23  ;;  %v2120_v58 = vunpack.i.h.bf16 %v2118_v22  ;;  %v2119_v46 = vunpack.i.l.bf16 %v2118_v22 }
  0xf3   : > { %v1147_v44 = vsel %vm1138_vm13, %v1130_v26, %v2114_v9  ;;  %v1148_v30 = vsel %vm1138_vm13, %v1131_v27, %v2115_v48  ;;  %v1033_v63 = vsel %vm1019_vm6, %v2567_v12, %v2120_v58  ;;  %v1032_v4 = vsel %vm1019_vm6, %v2570_v21, %v2119_v46 }
  0xf4   : > { %v2128_v37 = vpop.permute.xlu1 %2127  ;;  %v2123_v8 = vpop.permute.xlu0 %2122  ;;  %v1159_v38 = vpack.c.bf16 %v1148_v30, %v1147_v44 }
  0xf5   : > { %v2125_v34 = vunpack.i.h.bf16 %v2123_v8  ;;  %v2124_v29 = vunpack.i.l.bf16 %v2123_v8  ;;  %v2130_v42 = vunpack.i.h.bf16 %v2128_v37  ;;  %v2129_v59 = vunpack.i.l.bf16 %v2128_v37 }
  0xf6   : > { %1813 = vmatprep.mubr.msk.bf16.mxu1 %vm1199_vm14, %v1159_v38 }
  0xf7   : > { %v1150_v50 = vsel %vm1138_vm13, %v1133_v41, %v2125_v34  ;;  %v1149_v51 = vsel %vm1138_vm13, %v1132_v36, %v2124_v29  ;;  %v1035_v5 = vsel %vm1019_vm6, %v2592_v53, %v2130_v42  ;;  %v1034_v6 = vsel %vm1019_vm6, %v2595_v54, %v2129_v59 }
  0xf8   : > { %v1160_v39 = vpack.c.bf16 %v1150_v50, %v1149_v51  ;;  %v2138_v40 = vpop.permute.xlu1 %2137  ;;  %v2133_v45 = vpop.permute.xlu0 %2132 }
  0xf9   : > { %v2140_v49 = vunpack.i.h.bf16 %v2138_v40  ;;  %v2139_v57 = vunpack.i.l.bf16 %v2138_v40  ;;  %v2135_v60 = vunpack.i.h.bf16 %v2133_v45  ;;  %v2134_v61 = vunpack.i.l.bf16 %v2133_v45 }
  0xfa   : > { %1814 = vmatmul.mubr.msk.bf16.vlgmr.msra.gmra.mrb[0].mxu1 %vm1199_vm14, %v1160_v39 }
  0xfb   : > { %v1051_v10 = vsel %vm1036_vm7, %v1034_v6, %v2139_v57  ;;  %v1052_v11 = vsel %vm1036_vm7, %v1035_v5, %v2140_v49  ;;  %v1050_v13 = vsel %vm1036_vm7, %v1033_v63, %v2135_v60  ;;  %v1049_v14 = vsel %vm1036_vm7, %v1032_v4, %v2134_v61 }
  0xfc   : > { %v2148_v35 = vpop.permute.xlu1 %2147  ;;  %v2143_v52 = vpop.permute.xlu0 %2142 }
  0xfd   : > { %v2150_v17 = vunpack.i.h.bf16 %v2148_v35  ;;  %v2149_v62 = vunpack.i.l.bf16 %v2148_v35  ;;  %v2145_v3 = vunpack.i.h.bf16 %v2143_v52  ;;  %v2144_v2 = vunpack.i.l.bf16 %v2143_v52 }
  0xff   : > { %v1068_v22 = vsel %vm1053_vm8, %v1051_v10, %v2149_v62  ;;  %v1069_v53 = vsel %vm1053_vm8, %v1052_v11, %v2150_v17  ;;  %v1066_v54 = vsel %vm1053_vm8, %v1049_v14, %v2144_v2  ;;  %v1067_v23 = vsel %vm1053_vm8, %v1050_v13, %v2145_v3 }
 0x100   : > { %v2158_v55 = vpop.permute.xlu1 %2157  ;;  %v2153_v56 = vpop.permute.xlu0 %2152 }
 0x101   : > { %v2160_v12 = vunpack.i.h.bf16 %v2158_v55  ;;  %v2159_v18 = vunpack.i.l.bf16 %v2158_v55  ;;  %v2155_v20 = vunpack.i.h.bf16 %v2153_v56  ;;  %v2154_v21 = vunpack.i.l.bf16 %v2153_v56 }
 0x103   : > { %v1085_v44 = vsel %vm1070_vm9, %v1068_v22, %v2159_v18  ;;  %v1086_v30 = vsel %vm1070_vm9, %v1069_v53, %v2160_v12  ;;  %v1083_v31 = vsel %vm1070_vm9, %v1066_v54, %v2154_v21  ;;  %v1084_v32 = vsel %vm1070_vm9, %v1067_v23, %v2155_v20 }
 0x104   : > { %v2168_v16 = vpop.permute.xlu1 %2167  ;;  %v2163_v1 = vpop.permute.xlu0 %2162 }
 0x105   : > { %v2170_v47 = vunpack.i.h.bf16 %v2168_v16  ;;  %v2169_v24 = vunpack.i.l.bf16 %v2168_v16  ;;  %v2165_v48 = vunpack.i.h.bf16 %v2163_v1  ;;  %v2164_v9 = vunpack.i.l.bf16 %v2163_v1 }
 0x107   : > { %v1102_v19 = vsel %vm1087_vm10, %v1085_v44, %v2169_v24  ;;  %v1103_v34 = vsel %vm1087_vm10, %v1086_v30, %v2170_v47  ;;  %v1100_v29 = vsel %vm1087_vm10, %v1083_v31, %v2164_v9  ;;  %v1101_v36 = vsel %vm1087_vm10, %v1084_v32, %v2165_v48 }
 0x108   : > { %v2178_v7 = vpop.permute.xlu1 %2177  ;;  %v2173_v15 = vpop.permute.xlu0 %2172 }
 0x109   : > { %v2180_v25 = vunpack.i.h.bf16 %v2178_v7  ;;  %v2179_v0 = vunpack.i.l.bf16 %v2178_v7  ;;  %v2175_v26 = vunpack.i.h.bf16 %v2173_v15  ;;  %v2174_v27 = vunpack.i.l.bf16 %v2173_v15 }
 0x10b   : > { %v1119_v41 = vsel %vm1104_vm11, %v1102_v19, %v2179_v0  ;;  %v1120_v50 = vsel %vm1104_vm11, %v1103_v34, %v2180_v25  ;;  %v1117_v51 = vsel %vm1104_vm11, %v1100_v29, %v2174_v27  ;;  %v1118_v39 = vsel %vm1104_vm11, %v1101_v36, %v2175_v26 }
 0x10c   : > { %v2188_v43 = vpop.permute.xlu1 %2187  ;;  %v2183_v28 = vpop.permute.xlu0 %2182 }
 0x10d   : > { %v2190_v37 = vunpack.i.h.bf16 %v2188_v43  ;;  %v2189_v8 = vunpack.i.l.bf16 %v2188_v43  ;;  %v2185_v38 = vunpack.i.h.bf16 %v2183_v28  ;;  %v2184_v33 = vunpack.i.l.bf16 %v2183_v28 }
 0x10f   : > { %v1136_v58 = vsel %vm1121_vm12, %v1119_v41, %v2189_v8  ;;  %v1137_v46 = vsel %vm1121_vm12, %v1120_v50, %v2190_v37  ;;  %v1134_v42 = vsel %vm1121_vm12, %v1117_v51, %v2184_v33  ;;  %v1135_v59 = vsel %vm1121_vm12, %v1118_v39, %v2185_v38 }
 0x110   : > { %v2198_v40 = vpop.permute.xlu1 %2197  ;;  %v2193_v45 = vpop.permute.xlu0 %2192 }
 0x111   : > { %v2200_v35 = vunpack.i.h.bf16 %v2198_v40  ;;  %v2199_v52 = vunpack.i.l.bf16 %v2198_v40  ;;  %v2195_v55 = vunpack.i.h.bf16 %v2193_v45  ;;  %v2194_v56 = vunpack.i.l.bf16 %v2193_v45 }
 0x113   : > { %v1153_v49 = vsel %vm1138_vm13, %v1136_v58, %v2199_v52  ;;  %v1154_v57 = vsel %vm1138_vm13, %v1137_v46, %v2200_v35  ;;  %v1151_v60 = vsel %vm1138_vm13, %v1134_v42, %v2194_v56  ;;  %v1152_v61 = vsel %vm1138_vm13, %v1135_v59, %v2195_v55 }
 0x114   : > { %v1162_v16 = vpack.c.bf16 %v1154_v57, %v1153_v49  ;;  %v1161_v1 = vpack.c.bf16 %v1152_v61, %v1151_v60 }
 0x116   : > { %1817 = vmatprep.mubr.msk.bf16.mxu1 %vm1199_vm14, %v1161_v1 }
 0x117   : > { %1818 = vmatmul.mubr.msk.bf16.gmra.mrb[4].mxu1 %vm1199_vm14, %v1162_v16 }
 0x18d   : > { %v2854_v17 = vpop.f32.mrb[0].mxu0 }
 0x18e   : > { %v1721_v62 = vpack.c.bf16 %v2854_v17, %v2854_v17  ;;  %v2858_v3 = vpop.f32.mrb[1].mxu0  ;;  %v1409_v14 = vsel %vm1019_vm6, %v2854_v17, 0.0 }
 0x18f   : > { %v1719_v2 = vpack.c.bf16 %v2858_v3, %v2858_v3  ;;  %v2862_v63 = vpop.f32.mrb[2].mxu0  ;;  %v1406_v6 = vsel %vm1019_vm6, %v2858_v3, 0.0 }
 0x190   : > { %1392 = vst.msk [vmem:[%s2852_s10 + $0x8] sm:$0xf] %vm1389_vm15, %v1721_v62  ;;  %v1722_v4 = vpack.c.bf16 %v2862_v63, %v2862_v63  ;;  %v2868_v5 = vpop.f32.mrb[3].mxu0  ;;  %v1411_v15 = vsel %vm1019_vm6, %v2862_v63, 0.0 }
 0x191   : > { %1390 = vst.msk [vmem:[%s2852_s10] sm:$0xf] %vm1389_vm15, %v1719_v2  ;;  %v1720_v10 = vpack.c.bf16 %v2868_v5, %v2868_v5  ;;  %v1407_v11 = vsel %vm1019_vm6, %v2868_v5, 0.0 }
 0x192   : > { %1393 = vst.msk [vmem:[%s2852_s10 + $0xc] sm:$0xf] %vm1389_vm15, %v1722_v4  ;;  %v1408_v13 = vadd.f32 %v1407_v11, %v1406_v6 }
 0x193   : > { %1391 = vst.msk [vmem:[%s2852_s10 + $0x4] sm:$0xf] %vm1389_vm15, %v1720_v10 }
 0x194   : > { %v1410_v7 = vadd.f32 %v1409_v14, %v1408_v13 }
 0x196   : > { %v1412_v12 = vadd.f32 %v1411_v15, %v1410_v7 }
 0x1ad   : > { %v2886_v18 = vpop.f32.mrb[4].mxu0 }
 0x1ae   : > { %v1725_v20 = vpack.c.bf16 %v2886_v18, %v2886_v18  ;;  %v2890_v21 = vpop.f32.mrb[5].mxu0  ;;  %v1417_v0 = vsel %vm1019_vm6, %v2886_v18, 0.0 }
 0x1af   : > { %v1723_v22 = vpack.c.bf16 %v2890_v21, %v2890_v21  ;;  %v1413_v53 = vsel %vm1019_vm6, %v2890_v21, 0.0  ;;  %v2896_v54 = vpop.f32.mrb[6].mxu0 }
 0x1b0   : > { %1396 = vst.msk [vmem:[%s2852_s10 + $0x18] sm:$0xf] %vm1389_vm15, %v1725_v20  ;;  %v1414_v23 = vadd.f32 %v1413_v53, %v1412_v12  ;;  %v1726_v47 = vpack.c.bf16 %v2896_v54, %v2896_v54  ;;  %v2902_v24 = vpop.f32.mrb[7].mxu0  ;;  %v1419_v27 = vsel %vm1019_vm6, %v2896_v54, 0.0 }
 0x1b1   : > { %1394 = vst.msk [vmem:[%s2852_s10 + $0x10] sm:$0xf] %vm1389_vm15, %v1723_v22  ;;  %v1724_v48 = vpack.c.bf16 %v2902_v24, %v2902_v24  ;;  %v1415_v9 = vsel %vm1019_vm6, %v2902_v24, 0.0 }
 0x1b2   : > { %1397 = vst.msk [vmem:[%s2852_s10 + $0x1c] sm:$0xf] %vm1389_vm15, %v1726_v47  ;;  %v1416_v25 = vadd.f32 %v1415_v9, %v1414_v23 }
 0x1b3   : > { %1395 = vst.msk [vmem:[%s2852_s10 + $0x14] sm:$0xf] %vm1389_vm15, %v1724_v48 }
 0x1b4   : > { %v1418_v26 = vadd.f32 %v1417_v0, %v1416_v25 }
 0x1b6   : > { %v1420_v43 = vadd.f32 %v1419_v27, %v1418_v26 }
 0x1cd   : > { %v1815_v28 = vpop.f32.mrb[0].mxu1 }
 0x1ce   : > { %v1729_v44 = vpack.c.bf16 %v1815_v28, %v1815_v28  ;;  %v1294_v30 = vpop.f32.mrb[1].mxu1  ;;  %v1425_v36 = vsel %vm1019_vm6, %v1815_v28, 0.0 }
 0x1cf   : > { %v1727_v31 = vpack.c.bf16 %v1294_v30, %v1294_v30  ;;  %v1421_v32 = vsel %vm1019_vm6, %v1294_v30, 0.0  ;;  %v1816_v37 = vpop.f32.mrb[2].mxu1 }
 0x1d0   : > { %1400 = vst.msk [vmem:[%s2852_s10 + $0x28] sm:$0xf] %vm1389_vm15, %v1729_v44  ;;  %v1422_v8 = vadd.f32 %v1421_v32, %v1420_v43  ;;  %v1730_v38 = vpack.c.bf16 %v1816_v37, %v1816_v37  ;;  %v1297_v33 = vpop.f32.mrb[3].mxu1  ;;  %v1427_v50 = vsel %vm1019_vm6, %v1816_v37, 0.0 }
 0x1d1   : > { %1398 = vst.msk [vmem:[%s2852_s10 + $0x20] sm:$0xf] %vm1389_vm15, %v1727_v31  ;;  %v1728_v19 = vpack.c.bf16 %v1297_v33, %v1297_v33  ;;  %v1423_v34 = vsel %vm1019_vm6, %v1297_v33, 0.0 }
 0x1d2   : > { %1401 = vst.msk [vmem:[%s2852_s10 + $0x2c] sm:$0xf] %vm1389_vm15, %v1730_v38  ;;  %v1424_v29 = vadd.f32 %v1423_v34, %v1422_v8 }
 0x1d3   : > { %1399 = vst.msk [vmem:[%s2852_s10 + $0x24] sm:$0xf] %vm1389_vm15, %v1728_v19 }
 0x1d4   : > { %v1426_v41 = vadd.f32 %v1425_v36, %v1424_v29 }
 0x1d6   : > { %v1428_v51 = vadd.f32 %v1427_v50, %v1426_v41 }
 0x1ea   : > { %v1819_v39 = vpop.f32.mrb[4].mxu1 }
 0x1eb   : > { %v1733_v40 = vpack.c.bf16 %v1819_v39, %v1819_v39  ;;  %v1310_v45 = vpop.f32.mrb[5].mxu1  ;;  %v1433_v57 = vsel %vm1019_vm6, %v1819_v39, 0.0 }
 0x1ec   : > { %v1731_v35 = vpack.c.bf16 %v1310_v45, %v1310_v45  ;;  %v1429_v52 = vsel %vm1019_vm6, %v1310_v45, 0.0  ;;  %v1820_v55 = vpop.f32.mrb[6].mxu1 }
 0x1ed   : > { %1404 = vst.msk [vmem:[%s2852_s10 + $0x38] sm:$0xf] %vm1389_vm15, %v1733_v40  ;;  %v1430_v56 = vadd.f32 %v1429_v52, %v1428_v51  ;;  %v1734_v58 = vpack.c.bf16 %v1820_v55, %v1820_v55  ;;  %v1313_v46 = vpop.f32.mrb[7].mxu1  ;;  %v1435_v61 = vsel %vm1019_vm6, %v1820_v55, 0.0 }
 0x1ee   : > { %1402 = vst.msk [vmem:[%s2852_s10 + $0x30] sm:$0xf] %vm1389_vm15, %v1731_v35  ;;  %v1732_v42 = vpack.c.bf16 %v1313_v46, %v1313_v46  ;;  %v1431_v59 = vsel %vm1019_vm6, %v1313_v46, 0.0 }
 0x1ef   : > { %1405 = vst.msk [vmem:[%s2852_s10 + $0x3c] sm:$0xf] %vm1389_vm15, %v1734_v58  ;;  %v1432_v49 = vadd.f32 %v1431_v59, %v1430_v56 }
 0x1f0   : > { %1403 = vst.msk [vmem:[%s2852_s10 + $0x34] sm:$0xf] %vm1389_vm15, %v1732_v42 }
 0x1f1   : > { %v1434_v60 = vadd.f32 %v1433_v57, %v1432_v49 }
 0x1f3   : > { %v1436_v16 = vadd.f32 %v1435_v61, %v1434_v60 }
 0x1f5   : > { %v1437_v1 = vrot.slane %v1436_v16, 4 }
 0x1f7   : > { %v1438_v62 = vadd.f32 %v1437_v1, %v1436_v16 }
 0x1f9   : > { %v1439_v2 = vrot.slane %v1438_v62, 2 }
 0x1fb   : > { %v1440_v4 = vadd.f32 %v1439_v2, %v1438_v62 }
 0x1fd   : > { %v1441_v6 = vrot.slane %v1440_v4, 1 }
 0x1ff   : > { %v2942_v10 = vadd.f32 %v1441_v6, %v1440_v4 }
 0x201   : > { %v1444_v11 = vmul.f32 0.0078125, %v2942_v10 }
 0x203   : > { %v1445_v13 = vsub.f32 %v2858_v3, %v1444_v11  ;;  %v1446_v14 = vsub.f32 %v2868_v5, %v1444_v11  ;;  %v1447_v7 = vsub.f32 %v2854_v17, %v1444_v11  ;;  %v1448_v15 = vsub.f32 %v2862_v63, %v1444_v11 }
 0x204   : > { %v1449_v12 = vsub.f32 %v2890_v21, %v1444_v11  ;;  %v1450_v20 = vsub.f32 %v2902_v24, %v1444_v11  ;;  %v1451_v22 = vsub.f32 %v2886_v18, %v1444_v11  ;;  %v1452_v53 = vsub.f32 %v2896_v54, %v1444_v11 }
 0x205   : > { %v1453_v23 = vsub.f32 %v1294_v30, %v1444_v11  ;;  %v1454_v47 = vsub.f32 %v1297_v33, %v1444_v11  ;;  %v1455_v48 = vsub.f32 %v1815_v28, %v1444_v11  ;;  %v1456_v9 = vsub.f32 %v1816_v37, %v1444_v11 }
 0x206   : > { %v1457_v25 = vsub.f32 %v1310_v45, %v1444_v11  ;;  %v1458_v3 = vsub.f32 %v1313_v46, %v1444_v11  ;;  %v1459_v0 = vsub.f32 %v1819_v39, %v1444_v11  ;;  %v1460_v5 = vsub.f32 %v1820_v55, %v1444_v11 }
 0x207   : > { %v1461_v26 = vmul.f32 %v1445_v13, %v1445_v13  ;;  %v1462_v17 = vmul.f32 %v1446_v14, %v1446_v14  ;;  %v1463_v27 = vmul.f32 %v1447_v7, %v1447_v7  ;;  %v1464_v63 = vmul.f32 %v1448_v15, %v1448_v15 }
 0x208   : > { %v1465_v18 = vmul.f32 %v1449_v12, %v1449_v12  ;;  %v1466_v30 = vmul.f32 %v1450_v20, %v1450_v20  ;;  %v1467_v32 = vmul.f32 %v1451_v22, %v1451_v22  ;;  %v1468_v38 = vmul.f32 %v1452_v53, %v1452_v53 }
 0x209   : > { %v1477_v21 = vsel %vm1019_vm6, %v1461_v26, 0.0  ;;  %v1478_v24 = vsel %vm1019_vm6, %v1462_v17, 0.0  ;;  %v1480_v54 = vsel %vm1019_vm6, %v1463_v27, 0.0  ;;  %v1482_v28 = vsel %vm1019_vm6, %v1464_v63, 0.0 }
 0x20a   : > { %v1479_v43 = vadd.f32 %v1478_v24, %v1477_v21  ;;  %v1484_v37 = vsel %vm1019_vm6, %v1465_v18, 0.0  ;;  %v1486_v33 = vsel %vm1019_vm6, %v1466_v30, 0.0  ;;  %v1469_v34 = vmul.f32 %v1453_v23, %v1453_v23 }
 0x20b   : > { %v1488_v29 = vsel %vm1019_vm6, %v1467_v32, 0.0  ;;  %v1470_v41 = vmul.f32 %v1454_v47, %v1454_v47  ;;  %v1490_v50 = vsel %vm1019_vm6, %v1468_v38, 0.0  ;;  %v1471_v39 = vmul.f32 %v1455_v48, %v1455_v48 }
 0x20c   : > { %v1481_v44 = vadd.f32 %v1480_v54, %v1479_v43  ;;  %v1492_v40 = vsel %vm1019_vm6, %v1469_v34, 0.0  ;;  %v1472_v35 = vmul.f32 %v1456_v9, %v1456_v9  ;;  %v1473_v56 = vmul.f32 %v1457_v25, %v1457_v25 }
 0x20d   : > { %v1494_v52 = vsel %vm1019_vm6, %v1470_v41, 0.0  ;;  %v1496_v58 = vsel %vm1019_vm6, %v1471_v39, 0.0  ;;  %v1474_v42 = vmul.f32 %v1458_v3, %v1458_v3  ;;  %v1475_v57 = vmul.f32 %v1459_v0, %v1459_v0 }
 0x20e   : > { %v1483_v31 = vadd.f32 %v1482_v28, %v1481_v44  ;;  %v1498_v59 = vsel %vm1019_vm6, %v1472_v35, 0.0  ;;  %v1500_v60 = vsel %vm1019_vm6, %v1473_v56, 0.0  ;;  %v1476_v16 = vmul.f32 %v1460_v5, %v1460_v5 }
 0x20f   : > { %v1502_v1 = vsel %vm1019_vm6, %v1474_v42, 0.0  ;;  %v1504_v2 = vsel %vm1019_vm6, %v1475_v57, 0.0 }
 0x210   : > { %v1485_v8 = vadd.f32 %v1484_v37, %v1483_v31  ;;  %v1506_v6 = vsel %vm1019_vm6, %v1476_v16, 0.0 }
 0x212   : > { %v1487_v19 = vadd.f32 %v1486_v33, %v1485_v8 }
 0x214   : > { %v1489_v36 = vadd.f32 %v1488_v29, %v1487_v19 }
 0x216   : > { %v1491_v51 = vadd.f32 %v1490_v50, %v1489_v36 }
 0x218   : > { %v1493_v45 = vadd.f32 %v1492_v40, %v1491_v51 }
 0x21a   : > { %v1495_v55 = vadd.f32 %v1494_v52, %v1493_v45 }
 0x21c   : > { %v1497_v46 = vadd.f32 %v1496_v58, %v1495_v55 }
 0x21e   : > { %v1499_v49 = vadd.f32 %v1498_v59, %v1497_v46 }
 0x220   : > { %v1501_v61 = vadd.f32 %v1500_v60, %v1499_v49 }
 0x222   : > { %v1503_v62 = vadd.f32 %v1502_v1, %v1501_v61 }
 0x224   : > { %v1505_v4 = vadd.f32 %v1504_v2, %v1503_v62 }
 0x226   : > { %v1507_v11 = vadd.f32 %v1506_v6, %v1505_v4 }
 0x228   : > { %v1508_v13 = vrot.slane %v1507_v11, 4 }
 0x22a   : > { %v1509_v14 = vadd.f32 %v1508_v13, %v1507_v11 }
 0x22c   : > { %v1510_v7 = vrot.slane %v1509_v14, 2 }
 0x22e   : > { %v1511_v15 = vadd.f32 %v1510_v7, %v1509_v14 }
 0x230   : > { %v1512_v12 = vrot.slane %v1511_v15, 1 }
 0x232   : > { %v1513_v20 = vadd.f32 %v1512_v12, %v1511_v15 }
 0x234   : > { %v1514_v22 = vsel %vm434_vm0, %v2942_v10, %v1513_v20 }
 0x235   : > { %1516 = vst.msk [vmem:[%s270_s16] sm:$0x3] %vm1515_vm1, %v1514_v22 }
 0x236 PF: > { %s16_s22 = sadd.s32 1, %s2244_s22   ;;  %s2998_s18 = smov %s2236_s20 }
 0x237   : > { %p13_p12 = scmp.ge.s32.totalorder %s16_s22, 6   ;;  %s2999_s19 = smov %s2240_s21 }
 0x238   : > { %s3000_s20 = smov %s3003_s23  ;;  %s3001_s21 = smov %s3007_s24 }
 0x239   :  { %15 = sbr.rel (!%p13_p12) target bundleno = 3 (0x3), region = 81 }

</bundles_post_ra>
